<compile_context>
chip_gen: v5e
topology: v5e:2x2
jax: 0.10.0
libtpu: 0.0.40
codegen_flags: <defaults>
</compile_context>

<pallas_src>
import functools

import jax
import jax.numpy as jnp
from jax.experimental import pallas as pl
from jax.experimental.pallas import tpu as pltpu


def _log_sigmoid(z):
    # numerically stable logsigmoid: min(z, 0) - log1p(exp(-|z|))
    return jnp.minimum(z, 0.0) - jnp.log1p(jnp.exp(-jnp.abs(z)))


def _make_kernel(C, K):
    del K  # only the split point C is needed inside the kernel

    def kernel(vc_ref, u_ref, out_ref):
        # vc_ref: (TB, n), u_ref: (TB, C+K, n), out_ref: (1, TB)
        vc = vc_ref[...].astype(jnp.float32)
        u = u_ref[...].astype(jnp.float32)

        # single fused multiply + lane reduce for both positive and negative paths
        s = jnp.sum(u * vc[:, None, :], axis=-1)          # (TB, C+K)

        # z = [s_pos, -s_neg]: negate only the tiny score slice, not (-vc)
        col = jax.lax.broadcasted_iota(jnp.int32, s.shape, 1)
        z = jnp.where(col < C, s, -s)                      # (TB, C+K)

        loss = jnp.sum(_log_sigmoid(z), axis=-1)           # (TB,)
        out_ref[...] = (-loss)[None, :]                    # lane-dense (1, TB) store

    return kernel


def skipgram_forward(V_weight, U_weight, x, positive_w, negative_w,
                     *, tb=None, embed_dtype=None):
    """Replicates SkipGramModel.forward. Returns -loss of shape (B,)."""
    B = x.shape[0]
    C = positive_w.shape[1]
    K = negative_w.shape[1]
    n = V_weight.shape[1]

    # Optional bf16-in-HBM: cast the (small) vocab tables once so the big
    # gathered tensors (the kernel's HBM traffic) are half-width on v6e/v7x.
    if embed_dtype is not None:
        V_weight = V_weight.astype(embed_dtype)
        U_weight = U_weight.astype(embed_dtype)
    itemsize = jnp.dtype(V_weight.dtype).itemsize

    # Pick the batch tile: biggest multiple of 128 whose double-buffered input
    # tiles fit a conservative VMEM budget (headroom for v7x's 64 MiB VMEM).
    if tb is None:
        budget = 24 * 1024 * 1024
        per_row = (1 + C + K) * n * itemsize * 2 + 2 * 4   # dbl-buffered in + out
        tb = (budget // per_row) // 128 * 128
    tb = int(max(128, (tb // 128) * 128))
    tb = min(tb, max(128, ((B + 127) // 128) * 128))       # don't over-pad tiny B

    Bp = ((B + tb - 1) // tb) * tb
    pad = Bp - B

    # Pad the tiny index arrays (not the big gathered tensors); padded rows are
    # discarded by the final slice, so gathering row 0 for them is harmless.
    x_p = jnp.pad(x, (0, pad))
    ctx_neg = jnp.concatenate([positive_w, negative_w], axis=1)   # (B, C+K)
    ctx_neg_p = jnp.pad(ctx_neg, ((0, pad), (0, 0)))

    # Embedding gathers (glue, XLA).  See TODO(synk) at top of file.
    vc = jnp.take(V_weight, x_p, axis=0)                   # (Bp, n)
    u_all = jnp.take(U_weight, ctx_neg_p, axis=0)          # (Bp, C+K, n)

    num_blocks = Bp // tb
    out = pl.pallas_call(
        _make_kernel(C, K),
        out_shape=jax.ShapeDtypeStruct((1, Bp), jnp.float32),
        grid_spec=pltpu.PrefetchScalarGridSpec(
            num_scalar_prefetch=0,
            grid=(num_blocks,),
            in_specs=[
                pl.BlockSpec((tb, n), lambda i: (i, 0)),
                pl.BlockSpec((tb, C + K, n), lambda i: (i, 0, 0)),
            ],
            out_specs=pl.BlockSpec((1, tb), lambda i: (0, i)),
        ),
        compiler_params=pltpu.CompilerParams(
            dimension_semantics=("parallel",),
            vmem_limit_bytes=32 * 1024 * 1024,
        ),
    )(vc, u_all)
    return out[0, :B]


def reference_forward(V_weight, U_weight, x, positive_w, negative_w):
    vc = jnp.take(V_weight, x, axis=0)
    u_context = jnp.take(U_weight, positive_w, axis=0)
    u_negative = jnp.take(U_weight, negative_w, axis=0)
    uv_context = jnp.einsum("bcd,bd->bc", u_context, vc)
    uv_negative = jnp.einsum("bkd,bd->bk", u_negative, -vc)
    log_pos = jax.nn.log_sigmoid(uv_context).sum(1)
    log_neg = jax.nn.log_sigmoid(uv_negative).sum(1)
    return -(log_pos + log_neg)


if __name__ == "__main__":
    # Small, deterministic synthetic setup.
    Vocab = 1000   # vocabulary size
    n = 128        # embedding dim (multiple of 128 -> full-lane vregs)
    B = 250        # batch size (not a multiple of 128 -> exercises padding)
    C = 4          # positive context window size
    K = 5          # negative samples per example

    key = jax.random.PRNGKey(0)
    k_v, k_u, k_x, k_p, k_n = jax.random.split(key, 5)

    # nn.Embedding weights: normal_(mean=-initrange, std=initrange), initrange = 0.5 / n
    initrange = 0.5 / n
    V_weight = (jax.random.normal(k_v, (Vocab, n), jnp.float32) * initrange) - initrange
    U_weight = (jax.random.normal(k_u, (Vocab, n), jnp.float32) * initrange) - initrange

    x = jax.random.randint(k_x, (B,), 0, Vocab, dtype=jnp.int32)
    positive_w = jax.random.randint(k_p, (B, C), 0, Vocab, dtype=jnp.int32)
    negative_w = jax.random.randint(k_n, (B, K), 0, Vocab, dtype=jnp.int32)

    ref = reference_forward(V_weight, U_weight, x, positive_w, negative_w)

    # f32 path (tb=128 -> 2 grid steps, exercises blocking + padding).
    out = skipgram_forward(V_weight, U_weight, x, positive_w, negative_w, tb=128)
    jax.block_until_ready(out)
    assert out.shape == (B,)
    assert jnp.allclose(out, ref, atol=5e-5, rtol=1e-5), (out, ref)

    # bf16-in-HBM path (halves DMA bytes on v6e/v7x; compute stays f32 in-kernel).
    out_bf16 = skipgram_forward(V_weight, U_weight, x, positive_w, negative_w,
                                tb=128, embed_dtype=jnp.bfloat16)
    jax.block_until_ready(out_bf16)
    assert out_bf16.shape == (B,)
    assert jnp.allclose(out_bf16, ref, atol=1e-2, rtol=1e-2), (out_bf16, ref)

    print("KERNEL_OK")
</pallas_src>

<mosaic_0001>
module attributes {stable_mosaic.version = 11 : i64} {
  func.func @kernel(%arg0: i32, %arg1: memref<128x128xf32, #tpu.memory_space<vmem>>, %arg2: memref<128x9x128xf32, #tpu.memory_space<vmem>>, %arg3: memref<1x128xf32, #tpu.memory_space<vmem>>) attributes {dimension_semantics = [#tpu.dimension_semantics<parallel>], iteration_bounds = array<i64: 2>, scalar_prefetch = 0 : i64, scratch_operands = 0 : i64, tpu.core_type = #tpu.core_type<tc>, window_params = [{transform_indices = @transform_0, window_bounds = array<i64: 128, 128>}, {transform_indices = @transform_1, window_bounds = array<i64: 128, 9, 128>}, {transform_indices = @transform_2, window_bounds = array<i64: 1, 128>}]} {
    %c0 = arith.constant 0 : index
    %c0_0 = arith.constant 0 : index
    %0 = vector.load %arg1[%c0, %c0_0] : memref<128x128xf32, #tpu.memory_space<vmem>>, vector<128x128xf32>
    %c0_1 = arith.constant 0 : index
    %c0_2 = arith.constant 0 : index
    %c0_3 = arith.constant 0 : index
    %1 = vector.load %arg2[%c0_1, %c0_2, %c0_3] : memref<128x9x128xf32, #tpu.memory_space<vmem>>, vector<128x9x128xf32>
    %2 = vector.shape_cast %0 : vector<128x128xf32> to vector<128x1x128xf32>
    %3 = vector.broadcast %2 : vector<128x1x128xf32> to vector<128x9x128xf32>
    %4 = arith.mulf %1, %3 : vector<128x9x128xf32>
    %cst = arith.constant dense<0.000000e+00> : vector<128x9xf32>
    %5 = vector.multi_reduction <add>, %4, %cst [2] : vector<128x9x128xf32> to vector<128x9xf32>
    %6 = tpu.iota {dimensions = array<i32: 1>} : vector<128x9xi32>
    %c4_i32 = arith.constant 4 : i32
    %7 = vector.broadcast %c4_i32 : i32 to vector<128x9xi32>
    %8 = arith.cmpi slt, %6, %7 : vector<128x9xi32>
    %cst_4 = arith.constant 0.000000e+00 : f32
    %9 = vector.broadcast %cst_4 : f32 to vector<128x9xf32>
    %10 = arith.subf %9, %5 : vector<128x9xf32>
    %11 = arith.select %8, %5, %10 : vector<128x9xi1>, vector<128x9xf32>
    %cst_5 = arith.constant 0.000000e+00 : f32
    %12 = vector.broadcast %cst_5 : f32 to vector<128x9xf32>
    %13 = arith.minimumf %11, %12 : vector<128x9xf32>
    %14 = math.absf %11 : vector<128x9xf32>
    %cst_6 = arith.constant 0.000000e+00 : f32
    %15 = vector.broadcast %cst_6 : f32 to vector<128x9xf32>
    %16 = arith.subf %15, %14 : vector<128x9xf32>
    %17 = math.exp %16 : vector<128x9xf32>
    %18 = math.log1p %17 : vector<128x9xf32>
    %19 = arith.subf %13, %18 : vector<128x9xf32>
    %cst_7 = arith.constant dense<0.000000e+00> : vector<128xf32>
    %20 = vector.multi_reduction <add>, %19, %cst_7 [1] : vector<128x9xf32> to vector<128xf32>
    %cst_8 = arith.constant 0.000000e+00 : f32
    %21 = vector.broadcast %cst_8 : f32 to vector<128xf32>
    %22 = arith.subf %21, %20 : vector<128xf32>
    %23 = vector.shape_cast %22 : vector<128xf32> to vector<1x128xf32>
    %c0_9 = arith.constant 0 : index
    %c0_10 = arith.constant 0 : index
    %24 = vector.load %arg3[%c0_9, %c0_10] : memref<1x128xf32, #tpu.memory_space<vmem>>, vector<1x128xf32>
    tpu.vector_store %arg3[%c0_9, %c0_10], %23 {strides = array<i32>} : memref<1x128xf32, #tpu.memory_space<vmem>>, vector<1x128xf32>,
    return
  }
  func.func @transform_0(%arg0: i32) -> (i32, i32) {
    %c0_i32 = arith.constant 0 : i32
    %c0_i32_0 = arith.constant 0 : i32
    return %arg0, %c0_i32 : i32, i32
  }
  func.func @transform_1(%arg0: i32) -> (i32, i32, i32) {
    %c0_i32 = arith.constant 0 : i32
    %c0_i32_0 = arith.constant 0 : i32
    %c0_i32_1 = arith.constant 0 : i32
    return %arg0, %c0_i32, %c0_i32_0 : i32, i32, i32
  }
  func.func @transform_2(%arg0: i32) -> (i32, i32) {
    %c0_i32 = arith.constant 0 : i32
    %c0_i32_0 = arith.constant 0 : i32
    return %c0_i32, %arg0 : i32, i32
  }
}

</mosaic_0001>

<bundles_post_ra>
// kernel: tpu_custom_call.1
= control target key start
LH: loop header
LB: loop body
LE: loop exit
PB: predicated region body
PF: predicated region fallthrough
CT: control target
= control target key end

     0   :  { %7 = vsyncpa [#allocation3], 0  ;;  %s6954_s0 = inlined_call_operand.vmem [shape: f32[256,128], index: 0, kind: input, shape index: {}]   ;;  %s6955_s1 = inlined_call_operand.vmem [shape: f32[256,9,128], index: 1, kind: input, shape index: {}]   ;;  %s6956_s2 = inlined_call_operand.hbm [shape: f32[1,256], index: 2, kind: output, shape index: {}]  }
   0x1   :  { %9 = vsyncpa [#allocation3 + $0x1], 0  ;;  %s4197_s9 = smov 0   ;;  %s4199_s10 = smov 0  }
   0x2   :  { %s4201_s11 = smov 0   ;;  %s4203_s12 = smov 0  }
   0x3 LB: > { %s4218_s13 = sadd.s32 4294967295, %s4180_s12   ;;  %s4003_s14 = sadd.s32 4294967294, %s4180_s12   ;;  %s4180_s12 = sphi %s4203_s12, %s7132_s12   ;;  %s4176_s11 = sphi %s4201_s11, %s7131_s11   ;;  %s4172_s10 = sphi %s4199_s10, %s7130_s10   ;;  %s4168_s9 = sphi %s4197_s9, %s7129_s9  }
   0x4   : > { %s4222_s15 = sadd.s32 1, %s4180_s12   ;;  %s74_s16 = sadd.s32 1, %s4176_s11 }
   0x5   : > { %s71_s17 = ssub.s32 %s4180_s12, %s4222_s15  ;;  %p84_p0 = scmp.ne.s32.totalorder %s4176_s11, %s4172_s10 }
   0x6   : > { %p72_p1 = scmp.eq.s32.totalorder %s71_s17, 0  ;;  %p85_p2 = scmp.eq.s32.totalorder %s4218_s13, 1 }
   0x7   : > { %p90_p3 = scmp.ne.s32.totalorder %s4172_s10, %s4168_s9  ;;  %p91_p4 = scmp.eq.s32.totalorder %s4003_s14, 1 }
   0x8   : > { %s4233_s18 = scalar_select %p72_p1, %s4176_s11, %s74_s16  }
   0x9   : > { %p4235_p5 = por %p85_p2, %p84_p0  ;;  %p4239_p6 = por %p91_p4, %p90_p3 }
   0xa   : > { %p4006_p7 = scmp.ge.s32.totalorder %s4180_s12, 1  ;;  %p128_p8 = scmp.lt.s32.totalorder %s4180_s12, 3 }
   0xc   : > { %p129_p9 = pnand %p4006_p7, %p128_p8 }
   0xe   : > { %132 = sbr.rel (%p129_p9) target bundleno = 985 (0x3d9), region = 28 }
  0x13   : > { %s4007_s21 = sshll.u32 %s4218_s13, 4  ;;  %s4009_s22 = sshll.u32 %s4218_s13, 7  ;;  %vm1082_vm0 = vcmask 1040384   ;;  %vm2239_vm1 = vcmask 130112   ;;  %vm2622_vm2 = vcmask 1041409   ;;  %vm2624_vm3 = vcmask 1042434  }
  0x14   : > { %p156_p10 = scmp.lt.s32.totalorder %s4007_s21, 31  ;;  %p162_p11 = scmp.lt.s32.totalorder %s4009_s22, 255  ;;  %vm2626_vm4 = vcmask 1043459   ;;  %vm2628_vm5 = vcmask 1044484   ;;  %vm2630_vm6 = vcmask 1045509   ;;  %vm2632_vm7 = vcmask 1046534  }
  0x15   : > { %vm2634_vm8 = vcmask 1047559   ;;  %vm3781_vm12 = vcmask 72704   ;;  %s153_s3 = sand.u32 1, %s4172_s10   ;;  %s3932_s6 = scalar_lea.hbm %s6956_s2, %s4218_s13 }
  0x16   : > { %s7134_s21 = smov (!%p156_p10, %s4007_s21), 31  ;;  %s7136_s22 = smov (!%p162_p11, %s4009_s22), 255 }
  0x17   : > { %s4008_s23 = sshll.u32 %s7134_s21, 3  ;;  %s4014_s27 = sshll.u32 %s7136_s22, 4 }
  0x18   : > { %s4250_s26 = scalar_lea.vmem %s6954_s0, %s4008_s23  ;;  %s4255_s30 = scalar_lea.vmem %s6955_s1, %s4014_s27 }
  0x19   : > { %v168_v0 = vld [vmem:[%s4250_s26] sm:$0xff]  ;;  %v186_v6 = vld [vmem:[%s4255_s30 + $0x10] sm:$0xff]  ;;  %v185_v10 = vld [vmem:[%s4255_s30 + $0x8] sm:$0x1]  ;;  %s154_s7 = scalar_lea.vmem [#allocation2], %s153_s3  ;;  %s3936_s14 = sshll.u32 %s3932_s6, 4  ;;  %s3937_s14 = int_to_ptr.hbm [resolvable:$true] %s3936_s14 }
  0x1a   : > { %v184_v1 = vld [vmem:[%s4255_s30] sm:$0xff]  ;;  %v568_v2 = vperm.slane %v168_v0, 0  ;;  %v457_v3 = vrot.slane %v168_v0, 2  ;;  %v456_v4 = vrot.slane %v168_v0, 1  ;;  %v189_v13 = vld [vmem:[%s4255_s30 + $0x28] sm:$0x1] }
  0x1b   : > { %v188_v5 = vld [vmem:[%s4255_s30 + $0x20] sm:$0xff]  ;;  %v187_v14 = vld [vmem:[%s4255_s30 + $0x18] sm:$0x1]  ;;  %v458_v18 = vrot.slane %v168_v0, 3  ;;  %v459_v20 = vrot.slane %v168_v0, 4  ;;  %v190_v25 = vld [vmem:[%s4255_s30 + $0x30] sm:$0xff] }
  0x1c   : > { %v824_v7 = vmul.f32 %v568_v2, %v184_v1  ;;  %v570_v8 = vperm.slane %v457_v3, 0  ;;  %v569_v9 = vperm.slane %v456_v4, 0  ;;  %v825_v15 = vmul.f32 %v568_v2, %v185_v10  ;;  %v191_v24 = vld [vmem:[%s4255_s30 + $0x38] sm:$0x1]  ;;  %v192_v27 = vld [vmem:[%s4255_s30 + $0x40] sm:$0xff]  ;;  %v194_v38 = vld [vmem:[%s4255_s30 + $0x50] sm:$0xff] }
  0x1d   : > { %v571_v23 = vperm.slane %v458_v18, 0  ;;  %v572_v26 = vperm.slane %v459_v20, 0  ;;  %v460_v29 = vrot.slane %v168_v0, 5  ;;  %v193_v32 = vld [vmem:[%s4255_s30 + $0x48] sm:$0x1]  ;;  %v461_v39 = vrot.slane %v168_v0, 6 }
  0x1e   : > { %1080 = vadd.xlane.f32.xlu0 %v824_v7  ;;  %v828_v11 = vmul.f32 %v570_v8, %v188_v5  ;;  %v826_v12 = vmul.f32 %v569_v9, %v186_v6  ;;  %v829_v16 = vmul.f32 %v570_v8, %v189_v13  ;;  %v827_v17 = vmul.f32 %v569_v9, %v187_v14  ;;  %v195_v35 = vld [vmem:[%s4255_s30 + $0x58] sm:$0x1]  ;;  %v197_v45 = vld [vmem:[%s4255_s30 + $0x68] sm:$0x1]  ;;  %v196_v46 = vld [vmem:[%s4255_s30 + $0x60] sm:$0xff]  ;;  %s3934_s8 = sshll.u32 %s154_s7, 4  ;;  %s3935_s8 = int_to_ptr.vmem [resolvable:$true] %s3934_s8 }
  0x1f   : > { %v1083_v19 = vsel %vm1082_vm0, %v825_v15, 0.0  ;;  %v831_v28 = vmul.f32 %v571_v23, %v191_v24  ;;  %v830_v30 = vmul.f32 %v571_v23, %v190_v25  ;;  %v832_v31 = vmul.f32 %v572_v26, %v192_v27  ;;  %v198_v48 = vld [vmem:[%s4255_s30 + $0x70] sm:$0xff]  ;;  %v4280_v51 = vld [vmem:[%s4250_s26 + $0x8] sm:$0xff]  ;;  %v199_v53 = vld [vmem:[%s4255_s30 + $0x78] sm:$0x1]  ;;  %s3924_s13 = scalar_lea.sflag [#allocation3], %s153_s3 }
  0x20   : > { %1091 = vadd.xlane.f32.xlu2 %v828_v11  ;;  %1086 = vadd.xlane.f32.xlu1 %v826_v12  ;;  %v1093_v21 = vsel %vm1082_vm0, %v829_v16, 0.0  ;;  %v1088_v22 = vsel %vm1082_vm0, %v827_v17, 0.0  ;;  %v573_v34 = vperm.slane %v460_v29, 0  ;;  %v833_v36 = vmul.f32 %v572_v26, %v193_v32  ;;  %v201_v56 = vld [vmem:[%s4255_s30 + $0x88] sm:$0x1]  ;;  %v200_v59 = vld [vmem:[%s4255_s30 + $0x80] sm:$0xff] }
  0x21   : > { %v1098_v33 = vsel %vm1082_vm0, %v831_v28, 0.0  ;;  %v462_v42 = vrot.slane %v168_v0, 7  ;;  %v574_v44 = vperm.slane %v461_v39, 0  ;;  %v576_v55 = vperm.slane %v4280_v51, 0  ;;  %v203_v2 = vld [vmem:[%s4255_s30 + $0x98] sm:$0x1] }
  0x22   : > { %v835_v37 = vmul.f32 %v573_v34, %v195_v35  ;;  %v1103_v40 = vsel %vm1082_vm0, %v833_v36, 0.0  ;;  %v834_v41 = vmul.f32 %v573_v34, %v194_v38  ;;  %v463_v60 = vrot.slane %v4280_v51, 1  ;;  %v202_v3 = vld [vmem:[%s4255_s30 + $0x90] sm:$0xff]  ;;  %v204_v5 = vld [vmem:[%s4255_s30 + $0xa0] sm:$0xff]  ;;  %v205_v10 = vld [vmem:[%s4255_s30 + $0xa8] sm:$0x1] }
  0x23   : > { %v575_v47 = vperm.slane %v462_v42, 0  ;;  %v837_v49 = vmul.f32 %v574_v44, %v197_v45  ;;  %v836_v50 = vmul.f32 %v574_v44, %v196_v46  ;;  %v841_v58 = vmul.f32 %v576_v55, %v201_v56  ;;  %v207_v13 = vld [vmem:[%s4255_s30 + $0xb8] sm:$0x1]  ;;  %v206_v16 = vld [vmem:[%s4255_s30 + $0xb0] sm:$0xff]  ;;  %v209_v23 = vld [vmem:[%s4255_s30 + $0xc8] sm:$0x1] }
  0x24   : > { %v1108_v43 = vsel %vm1082_vm0, %v835_v37, 0.0  ;;  %v840_v62 = vmul.f32 %v576_v55, %v200_v59  ;;  %v464_v63 = vrot.slane %v4280_v51, 2  ;;  %v577_v1 = vperm.slane %v463_v60, 0  ;;  %v208_v24 = vld [vmem:[%s4255_s30 + $0xc0] sm:$0xff]  ;;  %v210_v26 = vld [vmem:[%s4255_s30 + $0xd0] sm:$0xff]  ;;  %s4132_s16 = sshra.s32 %s3937_s14, 4  ;;  %s4133_s16 = int_to_ptr.hbm [resolvable:$true] %s4132_s16 }
  0x25   : > { %v838_v52 = vmul.f32 %v575_v47, %v198_v48  ;;  %v1113_v54 = vsel %vm1082_vm0, %v837_v49, 0.0  ;;  %v839_v57 = vmul.f32 %v575_v47, %v199_v53  ;;  %v1123_v0 = vsel %vm1082_vm0, %v841_v58, 0.0  ;;  %v213_v34 = vld [vmem:[%s4255_s30 + $0xe8] sm:$0x1]  ;;  %v212_v37 = vld [vmem:[%s4255_s30 + $0xe0] sm:$0xff]  ;;  %v214_v45 = vld [vmem:[%s4255_s30 + $0xf0] sm:$0xff]  ;;  %p4139_p1 = scmp.lt.s32.totalorder %s4133_s16, %s6956_s2 }
  0x26   : > { %1084 = vadd.xlane.f32.xlu0 %v1083_v19  ;;  %v578_v4 = vperm.slane %v464_v63, 0  ;;  %v843_v6 = vmul.f32 %v577_v1, %v203_v2  ;;  %v465_v7 = vrot.slane %v4280_v51, 3  ;;  %v842_v8 = vmul.f32 %v577_v1, %v202_v3  ;;  %v215_v44 = vld [vmem:[%s4255_s30 + $0xf8] sm:$0x1]  ;;  %v216_v47 = vld [vmem:[%s4255_s30 + $0x100] sm:$0xff]  ;;  %v218_v58 = vld [vmem:[%s4255_s30 + $0x110] sm:$0xff] }
  0x27   : > { %v1118_v61 = vsel %vm1082_vm0, %v839_v57, 0.0  ;;  %v466_v17 = vrot.slane %v4280_v51, 4  ;;  %v467_v20 = vrot.slane %v4280_v51, 5  ;;  %v468_v28 = vrot.slane %v4280_v51, 6  ;;  %v219_v55 = vld [vmem:[%s4255_s30 + $0x118] sm:$0x1] }
  0x28   : > { %1094 = vadd.xlane.f32.xlu2 %v1093_v21  ;;  %1089 = vadd.xlane.f32.xlu1 %v1088_v22  ;;  %v844_v9 = vmul.f32 %v578_v4, %v204_v5  ;;  %v1128_v11 = vsel %vm1082_vm0, %v843_v6, 0.0  ;;  %v579_v12 = vperm.slane %v465_v7, 0  ;;  %v845_v14 = vmul.f32 %v578_v4, %v205_v10  ;;  %v221_v1 = vld [vmem:[%s4255_s30 + $0x128] sm:$0x1]  ;;  %v220_v2 = vld [vmem:[%s4255_s30 + $0x120] sm:$0xff]  ;;  %v222_v4 = vld [vmem:[%s4255_s30 + $0x130] sm:$0xff] }
  0x29   : > { %v580_v22 = vperm.slane %v466_v17, 0  ;;  %v581_v25 = vperm.slane %v467_v20, 0  ;;  %v469_v38 = vrot.slane %v4280_v51, 7  ;;  %s4134_s17 = scalar_lea.hbm %s4133_s16, 1  ;;  %s4138_s23 = scalar_lea.hbm %s6956_s2, 2 }
  0x2a   : > { %v847_v15 = vmul.f32 %v579_v12, %v207_v13  ;;  %v1133_v18 = vsel %vm1082_vm0, %v845_v14, 0.0  ;;  %v846_v19 = vmul.f32 %v579_v12, %v206_v16  ;;  %v225_v12 = vld [vmem:[%s4255_s30 + $0x148] sm:$0x1]  ;;  %p4135_p12 = scmp.ne.s32.totalorder %s4133_s16, %s4134_s17  ;;  %p4140_p2 = scmp.lt.s32.totalorder %s4138_s23, %s4134_s17 }
  0x2b   : > { %v849_v27 = vmul.f32 %v580_v22, %v209_v23  ;;  %v848_v29 = vmul.f32 %v580_v22, %v208_v24  ;;  %v583_v42 = vperm.slane %v469_v38, 0  ;;  %v227_v22 = vld [vmem:[%s4255_s30 + $0x158] sm:$0x1]  ;;  %v226_v23 = vld [vmem:[%s4255_s30 + $0x150] sm:$0xff] }
  0x2c   : > { %v1138_v21 = vsel %vm1082_vm0, %v847_v15, 0.0  ;;  %v224_v15 = vld [vmem:[%s4255_s30 + $0x140] sm:$0xff]  ;;  %v4353_v38 = vld [vmem:[%s4250_s26 + $0x18] sm:$0xff]  ;;  %p4136_p13 = pnand %p4135_p12, %p4235_p5  ;;  %p4141_p3 = por %p4140_p2, %p4139_p1 }
  0x2d   : > { %v1143_v32 = vsel %vm1082_vm0, %v849_v27, 0.0  ;;  %v855_v48 = vmul.f32 %v583_v42, %v215_v44 }
  0x2e   : > { %1096 = vadd.xlane.f32.xlu0 %v830_v30  ;;  %v850_v30 = vmul.f32 %v581_v25, %v210_v26  ;;  %p4137_p0 = pneg %p4136_p13 }
  0x2f   : > { %v1158_v53 = vsel %vm1082_vm0, %v855_v48, 0.0 }
  0x30   : > { %1101 = vadd.xlane.f32.xlu2 %v832_v31  ;;  %1099 = vadd.xlane.f32.xlu1 %v1098_v33  ;;  %v211_v31 = vld [vmem:[%s4255_s30 + $0xd8] sm:$0x1]  ;;  %v582_v33 = vperm.slane %v468_v28, 0  ;;  %p4142_p4 = pnand %p4141_p3, %p4137_p0 }
  0x31   : > { %v851_v35 = vmul.f32 %v581_v25, %v211_v31  ;;  %v228_v25 = vld [vmem:[%s4255_s30 + $0x160] sm:$0xff] }
  0x32   : > { %v853_v36 = vmul.f32 %v582_v33, %v213_v34 }
  0x33   : > { %v1148_v39 = vsel %vm1082_vm0, %v851_v35, 0.0 }
  0x36   : > { %1104 = vadd.xlane.f32.xlu0 %v1103_v40  ;;  %v852_v40 = vmul.f32 %v582_v33, %v212_v37  ;;  %v231_v33 = vld [vmem:[%s4255_s30 + $0x178] sm:$0x1]  ;;  %v230_v37 = vld [vmem:[%s4255_s30 + $0x170] sm:$0xff] }
  0x38   : > { %1109 = vadd.xlane.f32.xlu2 %v1108_v43  ;;  %1106 = vadd.xlane.f32.xlu1 %v834_v41  ;;  %v1153_v41 = vsel %vm1082_vm0, %v853_v36, 0.0  ;;  %v4315_v43 = vld [vmem:[%s4250_s26 + $0x10] sm:$0xff] }
  0x39   : > { %v584_v46 = vperm.slane %v4315_v43, 0  ;;  %v470_v49 = vrot.slane %v4315_v43, 1  ;;  %v471_v59 = vrot.slane %v4315_v43, 2  ;;  %v473_v6 = vrot.slane %v4315_v43, 4 }
  0x3a   : > { %v474_v16 = vrot.slane %v4315_v43, 5  ;;  %v476_v27 = vrot.slane %v4315_v43, 7 }
  0x3b   : > { %v856_v51 = vmul.f32 %v584_v46, %v216_v47  ;;  %v232_v47 = vld [vmem:[%s4255_s30 + $0x180] sm:$0xff] }
  0x3e   : > { %1111 = vadd.xlane.f32.xlu0 %v836_v50  ;;  %v854_v50 = vmul.f32 %v583_v42, %v214_v45  ;;  %v592_v45 = vperm.slane %v4353_v38, 0 }
  0x40   : > { %1116 = vadd.xlane.f32.xlu2 %v838_v52  ;;  %1114 = vadd.xlane.f32.xlu1 %v1113_v54  ;;  %v217_v52 = vld [vmem:[%s4255_s30 + $0x108] sm:$0x1]  ;;  %v585_v54 = vperm.slane %v470_v49, 0 }
  0x41   : > { %v857_v56 = vmul.f32 %v584_v46, %v217_v52  ;;  %v233_v46 = vld [vmem:[%s4255_s30 + $0x188] sm:$0x1]  ;;  %v478_v52 = vrot.slane %v4353_v38, 2 }
  0x42   : > { %v859_v57 = vmul.f32 %v585_v54, %v219_v55 }
  0x43   : > { %v1163_v60 = vsel %vm1082_vm0, %v857_v56, 0.0 }
  0x44   : > { %v1168_v63 = vsel %vm1082_vm0, %v859_v57, 0.0  ;;  %v235_v57 = vld [vmem:[%s4255_s30 + $0x198] sm:$0x1] }
  0x46   : > { %1119 = vadd.xlane.f32.xlu0 %v1118_v61  ;;  %v858_v61 = vmul.f32 %v585_v54, %v218_v58 }
  0x48   : > { %1124 = vadd.xlane.f32.xlu2 %v1123_v0  ;;  %1121 = vadd.xlane.f32.xlu1 %v840_v62  ;;  %v472_v62 = vrot.slane %v4315_v43, 3  ;;  %v586_v0 = vperm.slane %v471_v59, 0  ;;  %v594_v59 = vperm.slane %v478_v52, 0 }
  0x4a   : > { %v587_v3 = vperm.slane %v472_v62, 0  ;;  %v861_v5 = vmul.f32 %v586_v0, %v221_v1  ;;  %v860_v7 = vmul.f32 %v586_v0, %v220_v2  ;;  %v236_v0 = vld [vmem:[%s4255_s30 + $0x1a0] sm:$0xff]  ;;  %v479_v1 = vrot.slane %v4353_v38, 3 }
  0x4c   : > { %v1173_v10 = vsel %vm1082_vm0, %v861_v5, 0.0  ;;  %v876_v5 = vmul.f32 %v594_v59, %v236_v0 }
  0x4e   : > { %1126 = vadd.xlane.f32.xlu0 %v842_v8  ;;  %v862_v8 = vmul.f32 %v587_v3, %v222_v4 }
  0x50   : > { %1131 = vadd.xlane.f32.xlu2 %v844_v9  ;;  %1129 = vadd.xlane.f32.xlu1 %v1128_v11  ;;  %v223_v9 = vld [vmem:[%s4255_s30 + $0x138] sm:$0x1]  ;;  %v588_v11 = vperm.slane %v473_v6, 0  ;;  %v480_v6 = vrot.slane %v4353_v38, 4 }
  0x51   : > { %v863_v13 = vmul.f32 %v587_v3, %v223_v9  ;;  %v239_v9 = vld [vmem:[%s4255_s30 + $0x1b8] sm:$0x1] }
  0x52   : > { %v865_v14 = vmul.f32 %v588_v11, %v225_v12 }
  0x53   : > { %v1178_v17 = vsel %vm1082_vm0, %v863_v13, 0.0  ;;  %v240_v13 = vld [vmem:[%s4255_s30 + $0x1c0] sm:$0xff] }
  0x54   : > { %v1183_v20 = vsel %vm1082_vm0, %v865_v14, 0.0 }
  0x56   : > { %1134 = vadd.xlane.f32.xlu0 %v1133_v18  ;;  %v864_v18 = vmul.f32 %v588_v11, %v224_v15  ;;  %v596_v11 = vperm.slane %v480_v6, 0  ;;  %v481_v15 = vrot.slane %v4353_v38, 5 }
  0x58   : > { %1139 = vadd.xlane.f32.xlu2 %v1138_v21  ;;  %1136 = vadd.xlane.f32.xlu1 %v846_v19  ;;  %v475_v19 = vrot.slane %v4315_v43, 6  ;;  %v589_v21 = vperm.slane %v474_v16, 0  ;;  %v477_v43 = vrot.slane %v4353_v38, 1 }
  0x5a   : > { %v590_v24 = vperm.slane %v475_v19, 0  ;;  %v867_v26 = vmul.f32 %v589_v21, %v227_v22  ;;  %v866_v28 = vmul.f32 %v589_v21, %v226_v23  ;;  %v593_v48 = vperm.slane %v477_v43, 0  ;;  %v243_v23 = vld [vmem:[%s4255_s30 + $0x1d8] sm:$0x1] }
  0x5b   : > { %v880_v19 = vmul.f32 %v596_v11, %v240_v13  ;;  %v597_v22 = vperm.slane %v481_v15, 0  ;;  %v252_v13 = vld [vmem:[%s4255_s30 + $0x220] sm:$0xff] }
  0x5c   : > { %v1188_v31 = vsel %vm1082_vm0, %v867_v26, 0.0 }
  0x5d   : > { %v883_v26 = vmul.f32 %v597_v22, %v243_v23 }
  0x5e   : > { %1141 = vadd.xlane.f32.xlu0 %v848_v29  ;;  %v868_v29 = vmul.f32 %v590_v24, %v228_v25 }
  0x60   : > { %1146 = vadd.xlane.f32.xlu2 %v850_v30  ;;  %1144 = vadd.xlane.f32.xlu1 %v1143_v32  ;;  %v229_v30 = vld [vmem:[%s4255_s30 + $0x168] sm:$0x1]  ;;  %v591_v32 = vperm.slane %v476_v27, 0  ;;  %v242_v27 = vld [vmem:[%s4255_s30 + $0x1d0] sm:$0xff] }
  0x61   : > { %v869_v34 = vmul.f32 %v590_v24, %v229_v30 }
  0x62   : > { %v871_v36 = vmul.f32 %v591_v32, %v231_v33  ;;  %v870_v42 = vmul.f32 %v591_v32, %v230_v37  ;;  %v882_v32 = vmul.f32 %v597_v22, %v242_v27  ;;  %v483_v33 = vrot.slane %v4353_v38, 7  ;;  %v245_v37 = vld [vmem:[%s4255_s30 + $0x1e8] sm:$0x1] }
  0x63   : > { %v253_v22 = vld [vmem:[%s4255_s30 + $0x228] sm:$0x1] }
  0x64   : > { %v1198_v44 = vsel %vm1082_vm0, %v871_v36, 0.0 }
  0x66   : > { %1149 = vadd.xlane.f32.xlu0 %v1148_v39 }
  0x68   : > { %1154 = vadd.xlane.f32.xlu2 %v1153_v41  ;;  %1151 = vadd.xlane.f32.xlu1 %v852_v40  ;;  %v1193_v41 = vsel %vm1082_vm0, %v869_v34, 0.0  ;;  %v1228_v34 = vsel %vm1082_vm0, %v883_v26, 0.0  ;;  %v255_v26 = vld [vmem:[%s4255_s30 + $0x238] sm:$0x1] }
  0x6e   : > { %1156 = vadd.xlane.f32.xlu0 %v854_v50  ;;  %v234_v50 = vld [vmem:[%s4255_s30 + $0x190] sm:$0xff] }
  0x6f   : > { %v874_v56 = vmul.f32 %v593_v48, %v234_v50 }
  0x70   : > { %1161 = vadd.xlane.f32.xlu2 %v856_v51  ;;  %1159 = vadd.xlane.f32.xlu1 %v1158_v53  ;;  %v873_v51 = vmul.f32 %v592_v45, %v233_v46  ;;  %v872_v53 = vmul.f32 %v592_v45, %v232_v47  ;;  %v4417_v47 = vld [vmem:[%s4250_s26 + $0x20] sm:$0xff] }
  0x71   : > { %v486_v15 = vrot.slane %v4417_v47, 3 }
  0x72   : > { %v1203_v58 = vsel %vm1082_vm0, %v873_v51, 0.0  ;;  %v247_v51 = vld [vmem:[%s4255_s30 + $0x1f8] sm:$0x1] }
  0x76   : > { %1164 = vadd.xlane.f32.xlu0 %v1163_v60  ;;  %v237_v60 = vld [vmem:[%s4255_s30 + $0x1a8] sm:$0x1] }
  0x78   : > { %1169 = vadd.xlane.f32.xlu2 %v1168_v63  ;;  %1166 = vadd.xlane.f32.xlu1 %v858_v61  ;;  %v875_v61 = vmul.f32 %v593_v48, %v235_v57  ;;  %v877_v63 = vmul.f32 %v594_v59, %v237_v60  ;;  %v248_v60 = vld [vmem:[%s4255_s30 + $0x200] sm:$0xff] }
  0x7a   : > { %v1208_v4 = vsel %vm1082_vm0, %v875_v61, 0.0  ;;  %v484_v61 = vrot.slane %v4417_v47, 1 }
  0x7e   : > { %1171 = vadd.xlane.f32.xlu0 %v860_v7  ;;  %v1213_v7 = vsel %vm1082_vm0, %v877_v63, 0.0 }
  0x80   : > { %1176 = vadd.xlane.f32.xlu2 %v862_v8  ;;  %1174 = vadd.xlane.f32.xlu1 %v1173_v10  ;;  %v595_v8 = vperm.slane %v479_v1, 0  ;;  %v238_v10 = vld [vmem:[%s4255_s30 + $0x1b0] sm:$0xff] }
  0x82   : > { %v879_v14 = vmul.f32 %v595_v8, %v239_v9  ;;  %v878_v16 = vmul.f32 %v595_v8, %v238_v10  ;;  %v251_v8 = vld [vmem:[%s4255_s30 + $0x218] sm:$0x1]  ;;  %v250_v9 = vld [vmem:[%s4255_s30 + $0x210] sm:$0xff] }
  0x84   : > { %v1218_v21 = vsel %vm1082_vm0, %v879_v14, 0.0 }
  0x86   : > { %1179 = vadd.xlane.f32.xlu0 %v1178_v17 }
  0x88   : > { %1184 = vadd.xlane.f32.xlu2 %v1183_v20  ;;  %1181 = vadd.xlane.f32.xlu1 %v864_v18  ;;  %v241_v20 = vld [vmem:[%s4255_s30 + $0x1c8] sm:$0x1] }
  0x89   : > { %v881_v24 = vmul.f32 %v596_v11, %v241_v20 }
  0x8e   : > { %1186 = vadd.xlane.f32.xlu0 %v866_v28  ;;  %v482_v28 = vrot.slane %v4353_v38, 6 }
  0x90   : > { %1191 = vadd.xlane.f32.xlu2 %v868_v29  ;;  %1189 = vadd.xlane.f32.xlu1 %v1188_v31  ;;  %v1223_v31 = vsel %vm1082_vm0, %v881_v24, 0.0  ;;  %v598_v36 = vperm.slane %v482_v28, 0  ;;  %v603_v24 = vperm.slane %v486_v15, 0 }
  0x91   : > { %v4349_v35 = vpop.xlane.xlu0 %1080 }
  0x92   : > { %v885_v45 = vmul.f32 %v598_v36, %v245_v37 }
  0x93   : > { %v4355_v39 = vpop.xlane.xlu2 %1091  ;;  %v4357_v40 = vpop.xlane.xlu1 %1086 }
  0x94   : > { %v1233_v52 = vsel %vm1082_vm0, %v885_v45, 0.0 }
  0x96   : > { %1194 = vadd.xlane.f32.xlu0 %v1193_v41  ;;  %v244_v41 = vld [vmem:[%s4255_s30 + $0x1e0] sm:$0xff] }
  0x97   : > { %v884_v46 = vmul.f32 %v598_v36, %v244_v41 }
  0x98   : > { %1199 = vadd.xlane.f32.xlu2 %v1198_v44  ;;  %1196 = vadd.xlane.f32.xlu1 %v870_v42  ;;  %v599_v42 = vperm.slane %v483_v33, 0  ;;  %v246_v44 = vld [vmem:[%s4255_s30 + $0x1f0] sm:$0xff]  ;;  %v487_v33 = vrot.slane %v4417_v47, 4 }
  0x99   : > { %v4365_v49 = vpop.xlane.xlu0 %1084 }
  0x9a   : > { %v886_v50 = vmul.f32 %v599_v42, %v246_v44  ;;  %v887_v57 = vmul.f32 %v599_v42, %v247_v51  ;;  %v488_v42 = vrot.slane %v4417_v47, 5  ;;  %v604_v45 = vperm.slane %v487_v33, 0  ;;  %v264_v33 = vld [vmem:[%s4255_s30 + $0x280] sm:$0xff] }
  0x9b   : > { %v4369_v54 = vpop.xlane.xlu2 %1094  ;;  %v4371_v55 = vpop.xlane.xlu1 %1089 }
  0x9c   : > { %v1238_v1 = vsel %vm1082_vm0, %v887_v57, 0.0  ;;  %v605_v51 = vperm.slane %v488_v42, 0  ;;  %v489_v57 = vrot.slane %v4417_v47, 6 }
  0x9e   : > { %1201 = vadd.xlane.f32.xlu0 %v872_v53  ;;  %v600_v53 = vperm.slane %v4417_v47, 0 }
  0xa0   : > { %1206 = vadd.xlane.f32.xlu2 %v874_v56  ;;  %1204 = vadd.xlane.f32.xlu1 %v1203_v58  ;;  %v249_v56 = vld [vmem:[%s4255_s30 + $0x208] sm:$0x1] }
  0xa1   : > { %v4376_v62 = vpop.xlane.xlu0 %1096  ;;  %v889_v59 = vmul.f32 %v600_v53, %v249_v56 }
  0xa3   : > { %v4380_v2 = vpop.xlane.xlu2 %1101  ;;  %v4382_v3 = vpop.xlane.xlu1 %1099  ;;  %v1243_v6 = vsel %vm1082_vm0, %v889_v59, 0.0 }
  0xa6   : > { %1209 = vadd.xlane.f32.xlu0 %v1208_v4  ;;  %v888_v4 = vmul.f32 %v600_v53, %v248_v60  ;;  %v258_v53 = vld [vmem:[%s4255_s30 + $0x250] sm:$0xff] }
  0xa8   : > { %1214 = vadd.xlane.f32.xlu2 %v1213_v7  ;;  %1211 = vadd.xlane.f32.xlu1 %v876_v5  ;;  %v485_v5 = vrot.slane %v4417_v47, 2  ;;  %v601_v7 = vperm.slane %v484_v61, 0 }
  0xa9   : > { %v4389_v12 = vpop.xlane.xlu0 %1104 }
  0xaa   : > { %v602_v10 = vperm.slane %v485_v5, 0  ;;  %v891_v14 = vmul.f32 %v601_v7, %v251_v8 }
  0xab   : > { %v4393_v17 = vpop.xlane.xlu2 %1109  ;;  %v4395_v18 = vpop.xlane.xlu1 %1106 }
  0xac   : > { %v1248_v23 = vsel %vm1082_vm0, %v891_v14, 0.0  ;;  %v893_v27 = vmul.f32 %v602_v10, %v253_v22  ;;  %v490_v14 = vrot.slane %v4417_v47, 7 }
  0xae   : > { %1216 = vadd.xlane.f32.xlu0 %v878_v16  ;;  %v890_v16 = vmul.f32 %v601_v7, %v250_v9  ;;  %v1253_v37 = vsel %vm1082_vm0, %v893_v27, 0.0  ;;  %v261_v7 = vld [vmem:[%s4255_s30 + $0x268] sm:$0x1]  ;;  %v263_v27 = vld [vmem:[%s4255_s30 + $0x278] sm:$0x1] }
  0xb0   : > { %1221 = vadd.xlane.f32.xlu2 %v880_v19  ;;  %1219 = vadd.xlane.f32.xlu1 %v1218_v21  ;;  %v892_v21 = vmul.f32 %v602_v10, %v252_v13  ;;  %v260_v13 = vld [vmem:[%s4255_s30 + $0x260] sm:$0xff] }
  0xb1   : > { %v4400_v25 = vpop.xlane.xlu0 %1111 }
  0xb3   : > { %v4404_v29 = vpop.xlane.xlu2 %1116  ;;  %v4406_v30 = vpop.xlane.xlu1 %1114 }
  0xb6   : > { %1224 = vadd.xlane.f32.xlu0 %v1223_v31  ;;  %v895_v31 = vmul.f32 %v603_v24, %v255_v26  ;;  %v4486_v26 = vld [vmem:[%s4250_s26 + $0x28] sm:$0xff] }
  0xb7   : > { %v608_v47 = vperm.slane %v4486_v26, 0 }
  0xb8   : > { %1229 = vadd.xlane.f32.xlu2 %v1228_v34  ;;  %1226 = vadd.xlane.f32.xlu1 %v882_v32  ;;  %v254_v32 = vld [vmem:[%s4255_s30 + $0x230] sm:$0xff]  ;;  %v1258_v44 = vsel %vm1082_vm0, %v895_v31, 0.0 }
  0xb9   : > { %v4413_v43 = vpop.xlane.xlu0 %1119  ;;  %v894_v41 = vmul.f32 %v603_v24, %v254_v32  ;;  %v607_v24 = vperm.slane %v490_v14, 0  ;;  %v262_v31 = vld [vmem:[%s4255_s30 + $0x270] sm:$0xff] }
  0xbb   : > { %v4419_v38 = vpop.xlane.xlu2 %1124  ;;  %v4421_v48 = vpop.xlane.xlu1 %1121  ;;  %v902_v42 = vmul.f32 %v607_v24, %v262_v31  ;;  %v270_v31 = vld [vmem:[%s4255_s30 + $0x2b0] sm:$0xff] }
  0xbe   : > { %1231 = vadd.xlane.f32.xlu0 %v884_v46  ;;  %v257_v46 = vld [vmem:[%s4255_s30 + $0x248] sm:$0x1] }
  0xbf   : > { %v897_v56 = vmul.f32 %v604_v45, %v257_v46  ;;  %v904_v46 = vmul.f32 %v608_v47, %v264_v33  ;;  %v494_v33 = vrot.slane %v4486_v26, 4 }
  0xc0   : > { %1236 = vadd.xlane.f32.xlu2 %v886_v50  ;;  %1234 = vadd.xlane.f32.xlu1 %v1233_v52  ;;  %v256_v50 = vld [vmem:[%s4255_s30 + $0x240] sm:$0xff] }
  0xc1   : > { %v4427_v58 = vpop.xlane.xlu0 %1126  ;;  %v896_v59 = vmul.f32 %v604_v45, %v256_v50  ;;  %v1263_v5 = vsel %vm1082_vm0, %v897_v56, 0.0  ;;  %v265_v50 = vld [vmem:[%s4255_s30 + $0x288] sm:$0x1]  ;;  %v267_v56 = vld [vmem:[%s4255_s30 + $0x298] sm:$0x1] }
  0xc3   : > { %v4431_v63 = vpop.xlane.xlu2 %1131  ;;  %v4433_v0 = vpop.xlane.xlu1 %1129 }
  0xc6   : > { %1239 = vadd.xlane.f32.xlu0 %v1238_v1  ;;  %v898_v1 = vmul.f32 %v605_v51, %v258_v53 }
  0xc8   : > { %1244 = vadd.xlane.f32.xlu2 %v1243_v6  ;;  %1241 = vadd.xlane.f32.xlu1 %v888_v4  ;;  %v259_v4 = vld [vmem:[%s4255_s30 + $0x258] sm:$0x1]  ;;  %v606_v6 = vperm.slane %v489_v57, 0  ;;  %v905_v57 = vmul.f32 %v608_v47, %v265_v50 }
  0xc9   : > { %v4440_v11 = vpop.xlane.xlu0 %1134  ;;  %v899_v8 = vmul.f32 %v605_v51, %v259_v4  ;;  %v266_v4 = vld [vmem:[%s4255_s30 + $0x290] sm:$0xff]  ;;  %v271_v50 = vld [vmem:[%s4255_s30 + $0x2b8] sm:$0x1] }
  0xca   : > { %v901_v10 = vmul.f32 %v606_v6, %v261_v7  ;;  %v900_v22 = vmul.f32 %v606_v6, %v260_v13  ;;  %v493_v13 = vrot.slane %v4486_v26, 3 }
  0xcb   : > { %v4444_v19 = vpop.xlane.xlu2 %1139  ;;  %v4446_v20 = vpop.xlane.xlu1 %1136 }
  0xce   : > { %1246 = vadd.xlane.f32.xlu0 %v890_v16 }
  0xd0   : > { %1251 = vadd.xlane.f32.xlu2 %v892_v21  ;;  %1249 = vadd.xlane.f32.xlu1 %v1248_v23  ;;  %v1268_v21 = vsel %vm1082_vm0, %v899_v8, 0.0  ;;  %v1273_v23 = vsel %vm1082_vm0, %v901_v10, 0.0  ;;  %v1283_v8 = vsel %vm1082_vm0, %v905_v57, 0.0 }
  0xd1   : > { %v4451_v28 = vpop.xlane.xlu0 %1141 }
  0xd3   : > { %v4455_v34 = vpop.xlane.xlu2 %1146  ;;  %v4457_v36 = vpop.xlane.xlu1 %1144 }
  0xd6   : > { %1254 = vadd.xlane.f32.xlu0 %v1253_v37  ;;  %v903_v37 = vmul.f32 %v607_v24, %v263_v27  ;;  %v611_v24 = vperm.slane %v493_v13, 0 }
  0xd8   : > { %1259 = vadd.xlane.f32.xlu2 %v1258_v44  ;;  %1256 = vadd.xlane.f32.xlu1 %v894_v41  ;;  %v491_v41 = vrot.slane %v4486_v26, 1  ;;  %v1278_v51 = vsel %vm1082_vm0, %v903_v37, 0.0  ;;  %v911_v57 = vmul.f32 %v611_v24, %v271_v50 }
  0xd9   : > { %v4464_v52 = vpop.xlane.xlu0 %1149 }
  0xda   : > { %v609_v53 = vperm.slane %v491_v41, 0 }
  0xdb   : > { %v4468_v60 = vpop.xlane.xlu2 %1154  ;;  %v4470_v61 = vpop.xlane.xlu1 %1151 }
  0xdc   : > { %v906_v10 = vmul.f32 %v609_v53, %v266_v4 }
  0xde   : > { %1261 = vadd.xlane.f32.xlu0 %v896_v59 }
  0xe0   : > { %1266 = vadd.xlane.f32.xlu2 %v898_v1  ;;  %1264 = vadd.xlane.f32.xlu1 %v1263_v5  ;;  %v907_v1 = vmul.f32 %v609_v53, %v267_v56  ;;  %v492_v5 = vrot.slane %v4486_v26, 2  ;;  %v612_v53 = vperm.slane %v494_v33, 0  ;;  %v273_v56 = vld [vmem:[%s4255_s30 + $0x2c8] sm:$0x1] }
  0xe1   : > { %v4475_v9 = vpop.xlane.xlu0 %1156 }
  0xe2   : > { %v1288_v14 = vsel %vm1082_vm0, %v907_v1, 0.0  ;;  %v913_v4 = vmul.f32 %v612_v53, %v273_v56 }
  0xe3   : > { %v4479_v15 = vpop.xlane.xlu2 %1161  ;;  %v4481_v16 = vpop.xlane.xlu1 %1159 }
  0xe6   : > { %1269 = vadd.xlane.f32.xlu0 %v1268_v21  ;;  %v610_v21 = vperm.slane %v492_v5, 0  ;;  %v272_v5 = vld [vmem:[%s4255_s30 + $0x2c0] sm:$0xff] }
  0xe8   : > { %1274 = vadd.xlane.f32.xlu2 %v1273_v23  ;;  %1271 = vadd.xlane.f32.xlu1 %v900_v22  ;;  %v269_v22 = vld [vmem:[%s4255_s30 + $0x2a8] sm:$0x1]  ;;  %v268_v23 = vld [vmem:[%s4255_s30 + $0x2a0] sm:$0xff] }
  0xe9   : > { %v4491_v32 = vpop.xlane.xlu0 %1164  ;;  %v909_v47 = vmul.f32 %v610_v21, %v269_v22  ;;  %v908_v37 = vmul.f32 %v610_v21, %v268_v23  ;;  %v912_v21 = vmul.f32 %v612_v53, %v272_v5  ;;  %v496_v22 = vrot.slane %v4486_v26, 6  ;;  %v277_v5 = vld [vmem:[%s4255_s30 + $0x2e8] sm:$0x1] }
  0xea   : > { %v1303_v23 = vsel %vm1082_vm0, %v913_v4, 0.0 }
  0xeb   : > { %v4495_v44 = vpop.xlane.xlu2 %1169  ;;  %v4497_v45 = vpop.xlane.xlu1 %1166  ;;  %v614_v33 = vperm.slane %v496_v22, 0 }
  0xed   : > { %v917_v22 = vmul.f32 %v614_v33, %v277_v5  ;;  %v281_v5 = vld [vmem:[%s4255_s30 + $0x308] sm:$0x1] }
  0xee   : > { %1276 = vadd.xlane.f32.xlu0 %v902_v42 }
  0xf0   : > { %1281 = vadd.xlane.f32.xlu2 %v904_v46  ;;  %1279 = vadd.xlane.f32.xlu1 %v1278_v51  ;;  %v910_v46 = vmul.f32 %v611_v24, %v270_v31  ;;  %v1293_v51 = vsel %vm1082_vm0, %v909_v47, 0.0  ;;  %v275_v31 = vld [vmem:[%s4255_s30 + $0x2d8] sm:$0x1]  ;;  %v274_v47 = vld [vmem:[%s4255_s30 + $0x2d0] sm:$0xff] }
  0xf1   : > { %v4502_v59 = vpop.xlane.xlu0 %1171 }
  0xf3   : > { %v4506_v6 = vpop.xlane.xlu2 %1176  ;;  %v4508_v7 = vpop.xlane.xlu1 %1174 }
  0xf6   : > { %1284 = vadd.xlane.f32.xlu0 %v1283_v8  ;;  %v495_v8 = vrot.slane %v4486_v26, 5 }
  0xf8   : > { %1289 = vadd.xlane.f32.xlu2 %v1288_v14  ;;  %1286 = vadd.xlane.f32.xlu1 %v906_v10  ;;  %v1298_v14 = vsel %vm1082_vm0, %v911_v57, 0.0  ;;  %v613_v24 = vperm.slane %v495_v8, 0 }
  0xf9   : > { %v4515_v27 = vpop.xlane.xlu0 %1179 }
  0xfa   : > { %v915_v50 = vmul.f32 %v613_v24, %v275_v31  ;;  %v914_v53 = vmul.f32 %v613_v24, %v274_v47  ;;  %v278_v24 = vld [vmem:[%s4255_s30 + $0x2f0] sm:$0xff] }
  0xfb   : > { %v4519_v41 = vpop.xlane.xlu2 %1184  ;;  %v4521_v42 = vpop.xlane.xlu1 %1181  ;;  %v4554_v31 = vld [vmem:[%s4250_s26 + $0x30] sm:$0xff] }
  0xfc   : > { %7003 = vst [vmem:[#allocation5_spill] sm:$0xff] %v4519_v41  ;;  %v1308_v8 = vsel %vm1082_vm0, %v915_v50, 0.0  ;;  %v1313_v50 = vsel %vm1082_vm0, %v917_v22, 0.0 }
  0xfd   : > { %7004 = vst [vmem:[#allocation6_spill] sm:$0xff] %v4521_v42 }
  0xfe   : > { %1291 = vadd.xlane.f32.xlu0 %v908_v37 }
 0x100   : > { %1296 = vadd.xlane.f32.xlu2 %v910_v46  ;;  %1294 = vadd.xlane.f32.xlu1 %v1293_v51  ;;  %v276_v46 = vld [vmem:[%s4255_s30 + $0x2e0] sm:$0xff]  ;;  %v497_v51 = vrot.slane %v4486_v26, 7 }
 0x101   : > { %v4526_v1 = vpop.xlane.xlu0 %1186  ;;  %v916_v4 = vmul.f32 %v614_v33, %v276_v46 }
 0x102   : > { %7005 = vst [vmem:[#allocation7_spill] sm:$0xff] %v4526_v1 }
 0x103   : > { %v4530_v10 = vpop.xlane.xlu2 %1191  ;;  %v4532_v13 = vpop.xlane.xlu1 %1189 }
 0x104   : > { %7006 = vst [vmem:[#allocation8_spill] sm:$0xff] %v4530_v10 }
 0x105   : > { %7007 = vst [vmem:[#allocation9_spill] sm:$0xff] %v4532_v13  ;;  %v1728_v13 = vsub.f32 0.0, %v4355_v39 }
 0x106   : > { %1299 = vadd.xlane.f32.xlu0 %v1298_v14  ;;  %v615_v14 = vperm.slane %v497_v51, 0 }
 0x108   : > { %1304 = vadd.xlane.f32.xlu2 %v1303_v23  ;;  %1301 = vadd.xlane.f32.xlu1 %v912_v21  ;;  %v279_v21 = vld [vmem:[%s4255_s30 + $0x2f8] sm:$0x1]  ;;  %v918_v51 = vmul.f32 %v615_v14, %v278_v24 }
 0x109   : > { %v4539_v37 = vpop.xlane.xlu0 %1194  ;;  %v919_v26 = vmul.f32 %v615_v14, %v279_v21  ;;  %v499_v14 = vrot.slane %v4554_v31, 2 }
 0x10a   : > { %7008 = vst [vmem:[#allocation10_spill] sm:$0xff] %v4539_v37 }
 0x10b   : > { %v4543_v56 = vpop.xlane.xlu2 %1199  ;;  %v4545_v57 = vpop.xlane.xlu1 %1196  ;;  %v1318_v33 = vsel %vm1082_vm0, %v919_v26, 0.0  ;;  %v618_v37 = vperm.slane %v499_v14, 0 }
 0x10c   : > { %7009 = vst [vmem:[#allocation11_spill] sm:$0xff] %v4543_v56 }
 0x10d   : > { %7010 = vst [vmem:[#allocation12_spill] sm:$0xff] %v4545_v57 }
 0x10e   : > { %1306 = vadd.xlane.f32.xlu0 %v914_v53  ;;  %v498_v53 = vrot.slane %v4554_v31, 1 }
 0x110   : > { %1311 = vadd.xlane.f32.xlu2 %v916_v4  ;;  %1309 = vadd.xlane.f32.xlu1 %v1308_v8  ;;  %v616_v4 = vperm.slane %v4554_v31, 0  ;;  %v280_v8 = vld [vmem:[%s4255_s30 + $0x300] sm:$0xff]  ;;  %v617_v21 = vperm.slane %v498_v53, 0 }
 0x111   : > { %v4550_v23 = vpop.xlane.xlu0 %1201 }
 0x112   : > { %7011 = vst [vmem:[#allocation13_spill] sm:$0xff] %v4550_v23  ;;  %v921_v23 = vmul.f32 %v616_v4, %v281_v5  ;;  %v920_v22 = vmul.f32 %v616_v4, %v280_v8  ;;  %v284_v4 = vld [vmem:[%s4255_s30 + $0x320] sm:$0xff]  ;;  %v500_v8 = vrot.slane %v4554_v31, 3 }
 0x113   : > { %v4556_v47 = vpop.xlane.xlu2 %1206  ;;  %v4558_v46 = vpop.xlane.xlu1 %1204  ;;  %v924_v14 = vmul.f32 %v618_v37, %v284_v4  ;;  %v1721_v4 = vlaneseq }
 0x114   : > { %7012 = vst [vmem:[#allocation14_spill] sm:$0xff] %v4556_v47  ;;  %v1323_v56 = vsel %vm1082_vm0, %v921_v23, 0.0 }
 0x115   : > { %7013 = vst [vmem:[#allocation15_spill] sm:$0xff] %v4558_v46  ;;  %v282_v46 = vld [vmem:[%s4255_s30 + $0x310] sm:$0xff] }
 0x116   : > { %1314 = vadd.xlane.f32.xlu0 %v1313_v50  ;;  %v922_v57 = vmul.f32 %v617_v21, %v282_v46  ;;  %v283_v50 = vld [vmem:[%s4255_s30 + $0x318] sm:$0x1] }
 0x117   : > { %v923_v53 = vmul.f32 %v617_v21, %v283_v50  ;;  %v286_v50 = vld [vmem:[%s4255_s30 + $0x330] sm:$0xff] }
 0x118   : > { %1319 = vadd.xlane.f32.xlu2 %v1318_v33  ;;  %1316 = vadd.xlane.f32.xlu1 %v918_v51  ;;  %v285_v51 = vld [vmem:[%s4255_s30 + $0x328] sm:$0x1] }
 0x119   : > { %v4566_v47 = vpop.xlane.xlu0 %1209  ;;  %v925_v5 = vmul.f32 %v618_v37, %v285_v51  ;;  %v1328_v23 = vsel %vm1082_vm0, %v923_v53, 0.0  ;;  %v502_v53 = vrot.slane %v4554_v31, 5 }
 0x11a   : > { %7014 = vst [vmem:[#allocation16_spill] sm:$0xff] %v4566_v47 }
 0x11b   : > { %v4570_v24 = vpop.xlane.xlu2 %1214  ;;  %v4572_v26 = vpop.xlane.xlu1 %1211  ;;  %v1333_v21 = vsel %vm1082_vm0, %v925_v5, 0.0  ;;  %v621_v47 = vperm.slane %v502_v53, 0  ;;  %v1724_v53 = vsub.f32 0.0, %v4349_v35 }
 0x11c   : > { %7015 = vst [vmem:[#allocation17_spill] sm:$0xff] %v4570_v24 }
 0x11d   : > { %7016 = vst [vmem:[#allocation18_spill] sm:$0xff] %v4572_v26 }
 0x11e   : > { %1321 = vadd.xlane.f32.xlu0 %v920_v22  ;;  %v501_v22 = vrot.slane %v4554_v31, 4 }
 0x120   : > { %1326 = vadd.xlane.f32.xlu2 %v922_v57  ;;  %1324 = vadd.xlane.f32.xlu1 %v1323_v56  ;;  %v619_v57 = vperm.slane %v500_v8, 0  ;;  %v287_v56 = vld [vmem:[%s4255_s30 + $0x338] sm:$0x1]  ;;  %v620_v51 = vperm.slane %v501_v22, 0  ;;  %v4601_v22 = vand.u32 127, %v1721_v4 }
 0x121   : > { %v4577_v33 = vpop.xlane.xlu0 %1216 }
 0x122   : > { %7017 = vst [vmem:[#allocation19_spill] sm:$0xff] %v4577_v33  ;;  %v926_v37 = vmul.f32 %v619_v57, %v286_v50  ;;  %vm1723_vm9 = vcmp.lt.s32.totalorder %v4601_v22, 4 }
 0x123   : > { %v4581_v26 = vpop.xlane.xlu2 %1221  ;;  %v4583_v46 = vpop.xlane.xlu1 %1219 }
 0x124   : > { %7018 = vst [vmem:[#allocation20_spill] sm:$0xff] %v4581_v26  ;;  %v288_v26 = vld [vmem:[%s4255_s30 + $0x340] sm:$0xff] }
 0x125   : > { %7019 = vst [vmem:[#allocation21_spill] sm:$0xff] %v4583_v46  ;;  %v927_v46 = vmul.f32 %v619_v57, %v287_v56  ;;  %v928_v8 = vmul.f32 %v620_v51, %v288_v26  ;;  %v4604_v57 = vadd.s32 4294967288, %v4601_v22  ;;  %v503_v26 = vrot.slane %v4554_v31, 6 }
 0x126   : > { %1329 = vadd.xlane.f32.xlu0 %v1328_v23  ;;  %v289_v23 = vld [vmem:[%s4255_s30 + $0x348] sm:$0x1] }
 0x127   : > { %v2238_v10 = vperm.slane %v4365_v49, %v4604_v57  ;;  %v622_v1 = vperm.slane %v503_v26, 0 }
 0x128   : > { %1334 = vadd.xlane.f32.xlu2 %v1333_v21  ;;  %1331 = vadd.xlane.f32.xlu1 %v924_v14  ;;  %v1338_v21 = vsel %vm1082_vm0, %v927_v46, 0.0  ;;  %v291_v14 = vld [vmem:[%s4255_s30 + $0x358] sm:$0x1]  ;;  %v1727_v46 = vsub.f32 0.0, %v4371_v55 }
 0x129   : > { %v4590_v33 = vpop.xlane.xlu0 %1224  ;;  %v931_v50 = vmul.f32 %v621_v47, %v291_v14  ;;  %v2242_v14 = vperm.slane %v4371_v55, %v4604_v57 }
 0x12a   : > { %7020 = vst [vmem:[#allocation22_spill] sm:$0xff] %v4590_v33  ;;  %v929_v33 = vmul.f32 %v620_v51, %v289_v23  ;;  %v1725_v51 = vsub.f32 0.0, %v4365_v49  ;;  %v3017_v55 = vperm.slane %v1727_v46, %v4604_v57  ;;  %v2244_v49 = vperm.slane %v4355_v39, %v4601_v22 }
 0x12b   : > { %v4594_v24 = vpop.xlane.xlu2 %1229  ;;  %v4596_v5 = vpop.xlane.xlu1 %1226 }
 0x12c   : > { %7021 = vst [vmem:[#allocation23_spill] sm:$0xff] %v4594_v24  ;;  %v290_v24 = vld [vmem:[%s4255_s30 + $0x350] sm:$0xff]  ;;  %v1343_v23 = vsel %vm1082_vm0, %v929_v33, 0.0  ;;  %v2241_v33 = vperm.slane %v4357_v40, %v4601_v22 }
 0x12d   : > { %7022 = vst [vmem:[#allocation24_spill] sm:$0xff] %v4596_v5  ;;  %v504_v5 = vrot.slane %v4554_v31, 7  ;;  %v2236_v31 = vperm.slane %v4349_v35, %v4601_v22  ;;  %v3019_v35 = vperm.slane %v1728_v13, %v4601_v22  ;;  %v1732_v13 = vsub.f32 0.0, %v4380_v2 }
 0x12e   : > { %1336 = vadd.xlane.f32.xlu0 %v926_v37  ;;  %v1726_v37 = vsub.f32 0.0, %v4357_v40  ;;  %v3014_v40 = vperm.slane %v1725_v51, %v4604_v57  ;;  %v2243_v26 = vsel %vm2239_vm1, %v2242_v14, %v2241_v33  ;;  %v1731_v14 = vsub.f32 0.0, %v4382_v3 }
 0x12f   : > { %v623_v46 = vperm.slane %v504_v5, 0  ;;  %v2240_v39 = vsel %vm2239_vm1, %v2238_v10, %v2236_v31  ;;  %v2248_v10 = vperm.slane %v4382_v3, %v4604_v57  ;;  %v2247_v3 = vperm.slane %v4376_v62, %v4601_v22 }
 0x130   : > { %1341 = vadd.xlane.f32.xlu2 %v928_v8  ;;  %1339 = vadd.xlane.f32.xlu1 %v1338_v21  ;;  %v1729_v21 = vsub.f32 0.0, %v4369_v54  ;;  %v2623_v5 = vsel %vm2622_vm2, %v2243_v26, %v2240_v39 }
 0x131   : > { %v4606_v56 = vpop.xlane.xlu0 %1231 }
 0x132   : > { %7023 = vst [vmem:[#allocation25_spill] sm:$0xff] %v4606_v56  ;;  %v930_v56 = vmul.f32 %v621_v47, %v290_v24  ;;  %v293_v47 = vld [vmem:[%s4255_s30 + $0x368] sm:$0x1]  ;;  %v3016_v24 = vperm.slane %v1726_v37, %v4601_v22  ;;  %v294_v37 = vld [vmem:[%s4255_s30 + $0x370] sm:$0xff] }
 0x133   : > { %v4614_v4 = vpop.xlane.xlu2 %1236  ;;  %v4616_v8 = vpop.xlane.xlu1 %1234  ;;  %v933_v41 = vmul.f32 %v622_v1, %v293_v47  ;;  %v1730_v47 = vsub.f32 0.0, %v4376_v62  ;;  %v934_v31 = vmul.f32 %v623_v46, %v294_v37 }
 0x134   : > { %7024 = vst [vmem:[#allocation26_spill] sm:$0xff] %v4614_v4  ;;  %v1348_v4 = vsel %vm1082_vm0, %v931_v50, 0.0  ;;  %v292_v50 = vld [vmem:[%s4255_s30 + $0x360] sm:$0xff] }
 0x135   : > { %7025 = vst [vmem:[#allocation27_spill] sm:$0xff] %v4616_v8  ;;  %v2245_v8 = vperm.slane %v4369_v54, %v4604_v57  ;;  %v3020_v54 = vperm.slane %v1729_v21, %v4604_v57  ;;  %v3018_v21 = vsel %vm2239_vm1, %v3017_v55, %v3016_v24 }
 0x136   : > { %1344 = vadd.xlane.f32.xlu0 %v1343_v23  ;;  %v3013_v23 = vperm.slane %v1724_v53, %v4601_v22  ;;  %v1733_v53 = vsub.f32 0.0, %v4389_v12 }
 0x137   : > { %v2246_v51 = vsel %vm2239_vm1, %v2245_v8, %v2244_v49  ;;  %v295_v49 = vld [vmem:[%s4255_s30 + $0x378] sm:$0x1] }
 0x138   : > { %1349 = vadd.xlane.f32.xlu2 %v1348_v4  ;;  %1346 = vadd.xlane.f32.xlu1 %v930_v56  ;;  %v932_v4 = vmul.f32 %v622_v1, %v292_v50  ;;  %v4652_v56 = vld [vmem:[%s4250_s26 + $0x38] sm:$0xff]  ;;  %v3015_v55 = vsel %vm2239_vm1, %v3014_v40, %v3013_v23  ;;  %v3021_v1 = vsel %vm2239_vm1, %v3020_v54, %v3019_v35  ;;  %v1353_v50 = vsel %vm1082_vm0, %v933_v41, 0.0  ;;  %v297_v54 = vld [vmem:[%s4255_s30 + $0x388] sm:$0x1] }
 0x139   : > { %v4645_v42 = vpop.xlane.xlu0 %1239  ;;  %v3397_v24 = vsel %vm2622_vm2, %v3018_v21, %v3015_v55  ;;  %v624_v26 = vperm.slane %v4652_v56, 0  ;;  %v2625_v39 = vsel %vm2624_vm3, %v2246_v51, %v2623_v5  ;;  %v3023_v40 = vperm.slane %v1731_v14, %v4604_v57 }
 0x13a   : > { %v3025_v23 = vperm.slane %v1732_v13, %v4601_v22  ;;  %v2249_v35 = vsel %vm2239_vm1, %v2248_v10, %v2247_v3  ;;  %v3026_v37 = vperm.slane %v1733_v53, %v4604_v57  ;;  %v935_v62 = vmul.f32 %v623_v46, %v295_v49  ;;  %v296_v53 = vld [vmem:[%s4255_s30 + $0x380] sm:$0xff] }
 0x13b   : > { %v4659_v33 = vpop.xlane.xlu2 %1244  ;;  %v4661_v8 = vpop.xlane.xlu1 %1241  ;;  %v3022_v41 = vperm.slane %v1730_v47, %v4601_v22  ;;  %v3398_v21 = vsel %vm2624_vm3, %v3021_v1, %v3397_v24  ;;  %v1735_v51 = vsub.f32 0.0, %v4393_v17  ;;  %v1734_v5 = vsub.f32 0.0, %v4395_v18 }
 0x13c   : > { %v2250_v14 = vperm.slane %v4380_v2, %v4601_v22  ;;  %v937_v10 = vmul.f32 %v624_v26, %v297_v54  ;;  %v505_v46 = vrot.slane %v4652_v56, 1  ;;  %v2627_v55 = vsel %vm2626_vm4, %v2249_v35, %v2625_v39 }
 0x13d   : > { %v3024_v1 = vsel %vm2239_vm1, %v3023_v40, %v3022_v41  ;;  %v1738_v47 = vsub.f32 0.0, %v4404_v29  ;;  %v2251_v2 = vperm.slane %v4389_v12, %v4604_v57  ;;  %v3027_v49 = vsel %vm2239_vm1, %v3026_v37, %v3025_v23 }
 0x13e   : > { %1351 = vadd.xlane.f32.xlu0 %v932_v4  ;;  %v1737_v4 = vsub.f32 0.0, %v4406_v30  ;;  %v1736_v24 = vsub.f32 0.0, %v4400_v25  ;;  %v1358_v39 = vsel %vm1082_vm0, %v935_v62, 0.0  ;;  %v3029_v40 = vperm.slane %v1735_v51, %v4604_v57 }
 0x13f   : > { %v3028_v54 = vperm.slane %v1734_v5, %v4601_v22  ;;  %v936_v35 = vmul.f32 %v624_v26, %v296_v53  ;;  %v506_v41 = vrot.slane %v4652_v56, 2  ;;  %v3399_v12 = vsel %vm2626_vm4, %v3024_v1, %v3398_v21  ;;  %v299_v5 = vld [vmem:[%s4255_s30 + $0x398] sm:$0x1] }
 0x140   : > { %1356 = vadd.xlane.f32.xlu2 %v934_v31  ;;  %1354 = vadd.xlane.f32.xlu1 %v1353_v50  ;;  %v1739_v31 = vsub.f32 0.0, %v4413_v43  ;;  %v3032_v23 = vperm.slane %v1737_v4, %v4604_v57  ;;  %v1363_v37 = vsel %vm1082_vm0, %v937_v10, 0.0  ;;  %v2253_v62 = vperm.slane %v4395_v18, %v4601_v22 }
 0x141   : > { %v4685_v13 = vpop.xlane.xlu0 %1246  ;;  %v3034_v51 = vperm.slane %v1738_v47, %v4601_v22  ;;  %v2252_v21 = vsel %vm2239_vm1, %v2251_v2, %v2250_v14  ;;  %v3400_v4 = vsel %vm2628_vm5, %v3027_v49, %v3399_v12  ;;  %v3031_v10 = vperm.slane %v1736_v24, %v4601_v22 }
 0x142   : > { %7026 = vst [vmem:[#allocation28_spill] sm:$0xff] %v4685_v13  ;;  %v2254_v13 = vperm.slane %v4393_v17, %v4604_v57  ;;  %v3035_v26 = vperm.slane %v1739_v31, %v4604_v57  ;;  %v2257_v53 = vperm.slane %v4406_v30, %v4604_v57  ;;  %v298_v17 = vld [vmem:[%s4255_s30 + $0x390] sm:$0xff]  ;;  %v2259_v18 = vperm.slane %v4404_v29, %v4601_v22  ;;  %v300_v30 = vld [vmem:[%s4255_s30 + $0x3a0] sm:$0xff] }
 0x143   : > { %v4697_v3 = vpop.xlane.xlu2 %1251  ;;  %v4699_v50 = vpop.xlane.xlu1 %1249  ;;  %v2260_v1 = vperm.slane %v4413_v43, %v4604_v57  ;;  %v626_v47 = vperm.slane %v506_v41, 0  ;;  %v2256_v14 = vperm.slane %v4400_v25, %v4601_v22  ;;  %v3033_v31 = vsel %vm2239_vm1, %v3032_v23, %v3031_v10 }
 0x144   : > { %7027 = vst [vmem:[#allocation29_spill] sm:$0xff] %v4697_v3  ;;  %v625_v3 = vperm.slane %v505_v46, 0  ;;  %v3030_v46 = vsel %vm2239_vm1, %v3029_v40, %v3028_v54  ;;  %v507_v24 = vrot.slane %v4652_v56, 3  ;;  %v2629_v29 = vsel %vm2628_vm5, %v2252_v21, %v2627_v55  ;;  %v301_v55 = vld [vmem:[%s4255_s30 + $0x3a8] sm:$0x1] }
 0x145   : > { %v3036_v43 = vsel %vm2239_vm1, %v3035_v26, %v3034_v51  ;;  %v3401_v54 = vsel %vm2630_vm6, %v3030_v46, %v3400_v4  ;;  %v2258_v25 = vsel %vm2239_vm1, %v2257_v53, %v2256_v14  ;;  %v2261_v12 = vsel %vm2239_vm1, %v2260_v1, %v2259_v18  ;;  %v302_v46 = vld [vmem:[%s4255_s30 + $0x3b0] sm:$0xff] }
 0x146   : > { %1359 = vadd.xlane.f32.xlu0 %v1358_v39  ;;  %v939_v49 = vmul.f32 %v625_v3, %v299_v5  ;;  %v2255_v39 = vsel %vm2239_vm1, %v2254_v13, %v2253_v62  ;;  %v938_v40 = vmul.f32 %v625_v3, %v298_v17  ;;  %v940_v23 = vmul.f32 %v626_v47, %v300_v30  ;;  %v303_v5 = vld [vmem:[%s4255_s30 + $0x3b8] sm:$0x1] }
 0x147   : > { %v3402_v13 = vsel %vm2632_vm7, %v3033_v31, %v3401_v54  ;;  %v2631_v3 = vsel %vm2630_vm6, %v2255_v39, %v2629_v29  ;;  %v627_v62 = vperm.slane %v507_v24, 0  ;;  %v941_v21 = vmul.f32 %v626_v47, %v301_v55 }
 0x148   : > { %1364 = vadd.xlane.f32.xlu2 %v1363_v37  ;;  %1361 = vadd.xlane.f32.xlu1 %v936_v35  ;;  %v1368_v37 = vsel %vm1082_vm0, %v939_v49, 0.0  ;;  %v3403_v51 = vsel %vm2634_vm8, %v3036_v43, %v3402_v13  ;;  %v2633_v26 = vsel %vm2632_vm7, %v2258_v25, %v2631_v3  ;;  %v508_v18 = vrot.slane %v4652_v56, 4 }
 0x149   : > { %v4729_v2 = vpop.xlane.xlu0 %1254  ;;  %v2635_v4 = vsel %vm2634_vm8, %v2261_v12, %v2633_v26  ;;  %v943_v17 = vmul.f32 %v627_v62, %v303_v5  ;;  %v1741_v1 = vsub.f32 0.0, %v4419_v38  ;;  %v1740_v14 = vsub.f32 0.0, %v4421_v48 }
 0x14a   : > { %v4754_v10 = vsel %vm1723_vm9, %v2635_v4, %v3403_v51  ;;  %v1743_v47 = vsub.f32 0.0, %v4433_v0  ;;  %v1373_v49 = vsel %vm1082_vm0, %v941_v21, 0.0  ;;  %v1742_v29 = vsub.f32 0.0, %v4427_v58  ;;  %v304_v51 = vld [vmem:[%s4255_s30 + $0x3c0] sm:$0xff] }
 0x14b   : > { %v4738_v35 = vpop.xlane.xlu2 %1259  ;;  %v4740_v41 = vpop.xlane.xlu1 %1256  ;;  %v3557_v24 = vand.u32 2147483647, %v4754_v10  ;;  %v942_v39 = vmul.f32 %v627_v62, %v302_v46  ;;  %v509_v43 = vrot.slane %v4652_v56, 5  ;;  %v2262_v54 = vperm.slane %v4421_v48, %v4601_v22 }
 0x14c   : > { %v1378_v25 = vsel %vm1082_vm0, %v943_v17, 0.0  ;;  %v628_v12 = vperm.slane %v508_v18, 0  ;;  %v3037_v55 = vperm.slane %v1740_v14, %v4601_v22  ;;  %v1744_v13 = vsub.f32 0.0, %v4431_v63  ;;  %v306_v18 = vld [vmem:[%s4255_s30 + $0x3d0] sm:$0xff] }
 0x14d   : > { %v1745_v3 = vsub.f32 0.0, %v4440_v11  ;;  %v2266_v48 = vperm.slane %v4433_v0, %v4604_v57  ;;  %v3041_v62 = vperm.slane %v1743_v47, %v4604_v57  ;;  %v3573_v26 = vsub.f32 0.0, %v3557_v24 }
 0x14e   : > { %1366 = vadd.xlane.f32.xlu0 %v938_v40  ;;  %v2263_v40 = vperm.slane %v4419_v38, %v4604_v57  ;;  %v2265_v38 = vperm.slane %v4427_v58, %v4601_v22  ;;  %v3040_v5 = vperm.slane %v1742_v29, %v4601_v22  ;;  %v2268_v21 = vperm.slane %v4431_v63, %v4601_v22 }
 0x14f   : > { %v2269_v4 = vperm.slane %v4440_v11, %v4604_v57  ;;  %v629_v17 = vperm.slane %v509_v43, 0  ;;  %v1747_v58 = vsub.f32 0.0, %v4444_v19  ;;  %v1746_v46 = vsub.f32 0.0, %v4446_v20 }
 0x150   : > { %1371 = vadd.xlane.f32.xlu2 %v940_v23  ;;  %1369 = vadd.xlane.f32.xlu1 %v1368_v37  ;;  %v3038_v23 = vperm.slane %v1741_v1, %v4604_v57  ;;  %v305_v37 = vld [vmem:[%s4255_s30 + $0x3c8] sm:$0x1]  ;;  %v510_v14 = vrot.slane %v4652_v56, 6  ;;  %v3043_v47 = vperm.slane %v1744_v13, %v4601_v22  ;;  %v3044_v63 = vperm.slane %v1745_v3, %v4604_v57  ;;  %v307_v3 = vld [vmem:[%s4255_s30 + $0x3d8] sm:$0x1] }
 0x151   : > { %v4756_v53 = vpop.xlane.xlu0 %1261  ;;  %v945_v1 = vmul.f32 %v628_v12, %v305_v37  ;;  %v2264_v11 = vsel %vm2239_vm1, %v2263_v40, %v2262_v54  ;;  %v2267_v29 = vsel %vm2239_vm1, %v2266_v48, %v2265_v38  ;;  %v2270_v37 = vsel %vm2239_vm1, %v2269_v4, %v2268_v21 }
 0x152   : > { %v3039_v24 = vsel %vm2239_vm1, %v3038_v23, %v3037_v55  ;;  %v1749_v13 = vsub.f32 0.0, %v4457_v36  ;;  %v3047_v40 = vperm.slane %v1747_v58, %v4604_v57  ;;  %v3046_v54 = vperm.slane %v1746_v46, %v4601_v22 }
 0x153   : > { %v4763_v31 = vpop.xlane.xlu2 %1266  ;;  %v4765_v30 = vpop.xlane.xlu1 %1264  ;;  %v1383_v23 = vsel %vm1082_vm0, %v945_v1, 0.0  ;;  %v630_v55 = vperm.slane %v510_v14, 0  ;;  %v2636_v38 = vsel %vm2622_vm2, %v2267_v29, %v2264_v11  ;;  %v1750_v21 = vsub.f32 0.0, %v4455_v34 }
 0x154   : > { %v1751_v4 = vsub.f32 0.0, %v4464_v52  ;;  %v947_v58 = vmul.f32 %v629_v17, %v307_v3  ;;  %v2637_v46 = vsel %vm2624_vm3, %v2270_v37, %v2636_v38  ;;  %v3050_v1 = vperm.slane %v1749_v13, %v4604_v57 }
 0x155   : > { %v3052_v29 = vperm.slane %v1750_v21, %v4601_v22  ;;  %v1755_v37 = vsub.f32 0.0, %v4481_v16  ;;  %v1754_v38 = vsub.f32 0.0, %v4475_v9 }
 0x156   : > { %1374 = vadd.xlane.f32.xlu0 %v1373_v49  ;;  %v944_v49 = vmul.f32 %v628_v12, %v304_v51  ;;  %v3589_v12 = vmul.f32 1.442695, %v3573_v26  ;;  %v1748_v51 = vsub.f32 0.0, %v4451_v28  ;;  %v2272_v26 = vperm.slane %v4444_v19, %v4604_v57 }
 0x158   : > { %1379 = vadd.xlane.f32.xlu2 %v1378_v25  ;;  %1376 = vadd.xlane.f32.xlu1 %v942_v39  ;;  %v3042_v39 = vsel %vm2239_vm1, %v3041_v62, %v3040_v5  ;;  %v3045_v62 = vsel %vm2239_vm1, %v3044_v63, %v3043_v47  ;;  %v309_v5 = vld [vmem:[%s4255_s30 + $0x3e8] sm:$0x1]  ;;  %4054 = vpow2.f32 %v3589_v12  ;;  %v3048_v47 = vsel %vm2239_vm1, %v3047_v40, %v3046_v54 }
 0x159   : > { %v4794_v0 = vpop.xlane.xlu0 %1269  ;;  %v3404_v48 = vsel %vm2622_vm2, %v3042_v39, %v3039_v24  ;;  %v949_v63 = vmul.f32 %v630_v55, %v309_v5  ;;  %v3049_v11 = vperm.slane %v1748_v51, %v4601_v22  ;;  %v1753_v24 = vsub.f32 0.0, %v4468_v60  ;;  %v4856_v51 = vld [vmem:[%s4250_s26 + $0x40] sm:$0xff] }
 0x15a   : > { %7028 = vst [vmem:[#allocation30_spill] sm:$0xff] %v4794_v0  ;;  %v946_v0 = vmul.f32 %v629_v17, %v306_v18  ;;  %v2271_v18 = vperm.slane %v4446_v20, %v4601_v22  ;;  %v3405_v14 = vsel %vm2624_vm3, %v3045_v62, %v3404_v48  ;;  %v511_v17 = vrot.slane %v4652_v56, 7 }
 0x15b   : > { %v4804_v43 = vpop.xlane.xlu2 %1274  ;;  %v4806_v25 = vpop.xlane.xlu1 %1271  ;;  %v2275_v20 = vperm.slane %v4457_v36, %v4604_v57  ;;  %v3053_v39 = vperm.slane %v1751_v4, %v4604_v57  ;;  %v1388_v56 = vsel %vm1082_vm0, %v947_v58, 0.0  ;;  %v2277_v36 = vperm.slane %v4455_v34, %v4601_v22 }
 0x15c   : > { %v3051_v12 = vsel %vm2239_vm1, %v3050_v1, %v3049_v11  ;;  %v2278_v40 = vperm.slane %v4464_v52, %v4604_v57  ;;  %v1393_v48 = vsel %vm1082_vm0, %v949_v63, 0.0  ;;  %v631_v62 = vperm.slane %v511_v17, 0 }
 0x15d   : > { %v2273_v34 = vsel %vm2239_vm1, %v2272_v26, %v2271_v18  ;;  %v3406_v21 = vsel %vm2626_vm4, %v3048_v47, %v3405_v14  ;;  %v3056_v52 = vperm.slane %v1753_v24, %v4604_v57  ;;  %v3054_v1 = vsel %vm2239_vm1, %v3053_v39, %v3052_v29  ;;  %v312_v24 = vld [vmem:[%s4255_s30 + $0x400] sm:$0xff] }
 0x15e   : > { %1381 = vadd.xlane.f32.xlu0 %v944_v49  ;;  %v308_v49 = vld [vmem:[%s4255_s30 + $0x3e0] sm:$0xff]  ;;  %v4858_v5 = vpop.eup %4054  ;;  %v3407_v58 = vsel %vm2628_vm5, %v3051_v12, %v3406_v21  ;;  %v3059_v63 = vperm.slane %v1755_v37, %v4604_v57  ;;  %v2279_v26 = vsel %vm2239_vm1, %v2278_v40, %v2277_v36  ;;  %v2281_v18 = vperm.slane %v4468_v60, %v4604_v57  ;;  %v315_v21 = vld [vmem:[%s4255_s30 + $0x418] sm:$0x1] }
 0x15f   : > { %v948_v54 = vmul.f32 %v630_v55, %v308_v49  ;;  %v310_v49 = vld [vmem:[%s4255_s30 + $0x3f0] sm:$0xff]  ;;  %v2280_v14 = vperm.slane %v4470_v61, %v4601_v22  ;;  %v632_v47 = vperm.slane %v4856_v51, 0  ;;  %v3058_v17 = vperm.slane %v1754_v38, %v4601_v22  ;;  %v313_v38 = vld [vmem:[%s4255_s30 + $0x408] sm:$0x1] }
 0x160   : > { %1386 = vadd.xlane.f32.xlu2 %v946_v0  ;;  %1384 = vadd.xlane.f32.xlu1 %v1383_v23  ;;  %v1752_v0 = vsub.f32 0.0, %v4470_v61  ;;  %v2274_v23 = vperm.slane %v4451_v28, %v4601_v22  ;;  %v311_v28 = vld [vmem:[%s4255_s30 + $0x3f8] sm:$0x1]  ;;  %v2284_v11 = vperm.slane %v4481_v16, %v4604_v57  ;;  %v512_v29 = vrot.slane %v4856_v51, 1 }
 0x161   : > { %v4829_v19 = vpop.xlane.xlu0 %1276  ;;  %v2638_v60 = vsel %vm2626_vm4, %v2273_v34, %v2637_v46  ;;  %v3408_v61 = vsel %vm2630_vm6, %v3054_v1, %v3407_v58  ;;  %v950_v37 = vmul.f32 %v631_v62, %v310_v49  ;;  %v2283_v16 = vperm.slane %v4475_v9, %v4601_v22 }
 0x162   : > { %v3055_v55 = vperm.slane %v1752_v0, %v4601_v22  ;;  %v2276_v4 = vsel %vm2239_vm1, %v2275_v20, %v2274_v23  ;;  %v951_v0 = vmul.f32 %v631_v62, %v311_v28  ;;  %v3060_v36 = vsel %vm2239_vm1, %v3059_v63, %v3058_v17  ;;  %v314_v63 = vld [vmem:[%s4255_s30 + $0x410] sm:$0xff] }
 0x163   : > { %v4841_v13 = vpop.xlane.xlu2 %1281  ;;  %v4843_v3 = vpop.xlane.xlu1 %1279  ;;  %v2282_v46 = vsel %vm2239_vm1, %v2281_v18, %v2280_v14  ;;  %v952_v23 = vmul.f32 %v632_v47, %v312_v24  ;;  %v633_v34 = vperm.slane %v512_v29, 0  ;;  %v953_v28 = vmul.f32 %v632_v47, %v313_v38 }
 0x164   : > { %v3057_v39 = vsel %vm2239_vm1, %v3056_v52, %v3055_v55  ;;  %v1398_v62 = vsel %vm1082_vm0, %v951_v0, 0.0  ;;  %v513_v49 = vrot.slane %v4856_v51, 2  ;;  %v3621_v18 = vadd.f32 1.0, %v4858_v5 }
 0x165   : > { %v3409_v9 = vsel %vm2632_vm7, %v3057_v39, %v3408_v61  ;;  %v955_v1 = vmul.f32 %v633_v34, %v315_v21  ;;  %v1403_v17 = vsel %vm1082_vm0, %v953_v28, 0.0  ;;  %v514_v24 = vrot.slane %v4856_v51, 3  ;;  %v317_v61 = vld [vmem:[%s4255_s30 + $0x428] sm:$0x1]  ;;  %v316_v39 = vld [vmem:[%s4255_s30 + $0x420] sm:$0xff] }
 0x166   : > { %1389 = vadd.xlane.f32.xlu0 %v1388_v56  ;;  %v2639_v56 = vsel %vm2628_vm5, %v2276_v4, %v2638_v60  ;;  %v3410_v52 = vsel %vm2634_vm8, %v3060_v36, %v3409_v9  ;;  %v634_v60 = vperm.slane %v513_v49, 0  ;;  %4056 = vlog2.f32 %v3621_v18  ;;  %v319_v21 = vld [vmem:[%s4255_s30 + $0x438] sm:$0x1] }
 0x167   : > { %v1408_v29 = vsel %vm1082_vm0, %v955_v1, 0.0  ;;  %v3627_v1 = vand.u32 2147483647, %v4858_v5  ;;  %v1756_v18 = vsub.f32 0.0, %v4479_v15 }
 0x168   : > { %1394 = vadd.xlane.f32.xlu2 %v1393_v48  ;;  %1391 = vadd.xlane.f32.xlu1 %v948_v54  ;;  %v2640_v54 = vsel %vm2630_vm6, %v2279_v26, %v2639_v56  ;;  %v2285_v48 = vsel %vm2239_vm1, %v2284_v11, %v2283_v16  ;;  %v954_v11 = vmul.f32 %v633_v34, %v314_v63  ;;  %v3624_v16 = vmul.f32 -0.5, %v4858_v5  ;;  %v321_v63 = vld [vmem:[%s4255_s30 + $0x448] sm:$0x1] }
 0x169   : > { %v4879_v20 = vpop.xlane.xlu0 %1284  ;;  %v2641_v55 = vsel %vm2632_vm7, %v2282_v46, %v2640_v54  ;;  %v318_v54 = vld [vmem:[%s4255_s30 + $0x430] sm:$0xff]  ;;  %v957_v46 = vmul.f32 %v634_v60, %v317_v61  ;;  %v956_v38 = vmul.f32 %v634_v60, %v316_v39  ;;  %v320_v60 = vld [vmem:[%s4255_s30 + $0x440] sm:$0xff]  ;;  %v516_v61 = vrot.slane %v4856_v51, 5 }
 0x16a   : > { %v2642_v4 = vsel %vm2634_vm8, %v2285_v48, %v2641_v55  ;;  %v3625_v55 = vadd.f32 1.0, %v3624_v16  ;;  %vm4948_vm10 = vcmp.lt.f32.partialorder %v3627_v1, 0.0004427343  ;;  %v1759_v16 = vsub.f32 0.0, %v4495_v44 }
 0x16b   : > { %v4890_v12 = vpop.xlane.xlu2 %1289  ;;  %v4892_v40 = vpop.xlane.xlu1 %1286  ;;  %v4910_v26 = vsel %vm1723_vm9, %v2642_v4, %v3410_v52  ;;  %v1413_v28 = vsel %vm1082_vm0, %v957_v46, 0.0  ;;  %v3061_v46 = vperm.slane %v1756_v18, %v4601_v22  ;;  %v1760_v1 = vsub.f32 0.0, %v4502_v59 }
 0x16c   : > { %v3558_v0 = vand.u32 2147483647, %v4910_v26  ;;  %v4057_v48 = vpop.eup %4056  ;;  %v637_v18 = vperm.slane %v516_v61, 0 }
 0x16d   : > { %v4936_v49 = vmul.f32 0.6931472, %v4057_v48 }
 0x16e   : > { %1396 = vadd.xlane.f32.xlu0 %v950_v37  ;;  %v635_v37 = vperm.slane %v514_v24, 0  ;;  %v3574_v56 = vsub.f32 0.0, %v3558_v0  ;;  %v4941_v24 = vmul.f32 %v4858_v5, %v3625_v55  ;;  %v1758_v5 = vsub.f32 0.0, %v4497_v45 }
 0x170   : > { %1401 = vadd.xlane.f32.xlu2 %v952_v23  ;;  %1399 = vadd.xlane.f32.xlu1 %v1398_v62  ;;  %v515_v23 = vrot.slane %v4856_v51, 4  ;;  %v958_v9 = vmul.f32 %v635_v37, %v318_v54  ;;  %v3591_v52 = vmul.f32 1.442695, %v3574_v56  ;;  %v322_v54 = vld [vmem:[%s4255_s30 + $0x450] sm:$0xff] }
 0x171   : > { %v4904_v58 = vpop.xlane.xlu0 %1291 }
 0x172   : > { %v636_v4 = vperm.slane %v515_v23, 0  ;;  %4058 = vpow2.f32 %v3591_v52  ;;  %v2287_v23 = vperm.slane %v4491_v32, %v4604_v57  ;;  %v2290_v52 = vperm.slane %v4495_v44, %v4604_v57 }
 0x173   : > { %v4913_v14 = vpop.xlane.xlu2 %1296  ;;  %v4915_v47 = vpop.xlane.xlu1 %1294  ;;  %v1762_v44 = vsub.f32 0.0, %v4506_v6 }
 0x174   : > { %v960_v55 = vmul.f32 %v636_v4, %v320_v60  ;;  %v323_v60 = vld [vmem:[%s4255_s30 + $0x458] sm:$0x1] }
 0x176   : > { %1404 = vadd.xlane.f32.xlu0 %v1403_v17  ;;  %v959_v17 = vmul.f32 %v635_v37, %v319_v21  ;;  %v2286_v37 = vperm.slane %v4479_v15, %v4601_v22 }
 0x178   : > { %1409 = vadd.xlane.f32.xlu2 %v1408_v29  ;;  %1406 = vadd.xlane.f32.xlu1 %v954_v11  ;;  %v1757_v11 = vsub.f32 0.0, %v4491_v32  ;;  %v961_v29 = vmul.f32 %v636_v4, %v321_v63  ;;  %v1418_v15 = vsel %vm1082_vm0, %v959_v17, 0.0  ;;  %v2289_v32 = vperm.slane %v4497_v45, %v4601_v22  ;;  %v4977_v39 = vpop.eup %4058 }
 0x179   : > { %v4924_v36 = vpop.xlane.xlu0 %1299  ;;  %v3065_v17 = vperm.slane %v1759_v16, %v4604_v57  ;;  %v1763_v4 = vsub.f32 0.0, %v4515_v27  ;;  %v2295_v45 = vperm.slane %v4506_v6, %v4601_v22  ;;  %v2296_v16 = vperm.slane %v4515_v27, %v4604_v57 }
 0x17a   : > { %v3062_v21 = vperm.slane %v1757_v11, %v4604_v57  ;;  %v1423_v63 = vsel %vm1082_vm0, %v961_v29, 0.0  ;;  %v3064_v11 = vperm.slane %v1758_v5, %v4601_v22  ;;  %v2293_v29 = vperm.slane %v4508_v7, %v4604_v57 }
 0x17b   : > { %v4928_v62 = vpop.xlane.xlu2 %1304  ;;  %v4930_v34 = vpop.xlane.xlu1 %1301  ;;  %v2288_v5 = vsel %vm2239_vm1, %v2287_v23, %v2286_v37  ;;  %v3067_v6 = vperm.slane %v1760_v1, %v4601_v22  ;;  %v3630_v27 = vadd.f32 1.0, %v4977_v39  ;;  %v2291_v37 = vsel %vm2239_vm1, %v2290_v52, %v2289_v32 }
 0x17c   : > { %7029 = vst [vmem:[#allocation31_spill] sm:$0xff] %v4930_v34  ;;  %v518_v34 = vrot.slane %v4856_v51, 7  ;;  %v962_v23 = vmul.f32 %v637_v18, %v322_v54  ;;  %v2297_v1 = vsel %vm2239_vm1, %v2296_v16, %v2295_v45 }
 0x17d   : > { %4060 = vlog2.f32 %v3630_v27 }
 0x17e   : > { %1411 = vadd.xlane.f32.xlu0 %v956_v38  ;;  %v1761_v38 = vsub.f32 0.0, %v4508_v7  ;;  %v324_v7 = vld [vmem:[%s4255_s30 + $0x460] sm:$0xff]  ;;  %v639_v45 = vperm.slane %v518_v34, 0 }
 0x180   : > { %1416 = vadd.xlane.f32.xlu2 %v958_v9  ;;  %1414 = vadd.xlane.f32.xlu1 %v1413_v28  ;;  %v517_v28 = vrot.slane %v4856_v51, 6  ;;  %v3068_v61 = vperm.slane %v1761_v38, %v4604_v57  ;;  %v963_v38 = vmul.f32 %v637_v18, %v323_v60  ;;  %v7036_v60 = vld [vmem:[#allocation5_spill] sm:$0xff] }
 0x181   : > { %v4943_v0 = vpop.xlane.xlu0 %1306  ;;  %v1765_v52 = vsub.f32 0.0, %v7036_v60  ;;  %v2299_v32 = vperm.slane %v7036_v60, %v4604_v57 }
 0x182   : > { %7030 = vst [vmem:[#allocation32_spill] sm:$0xff] %v4943_v0 }
 0x183   : > { %v4964_v48 = vpop.xlane.xlu2 %1311  ;;  %v4966_v9 = vpop.xlane.xlu1 %1309  ;;  %v3074_v56 = vperm.slane %v1765_v52, %v4604_v57 }
 0x184   : > { %7033 = vst [vmem:[#allocation33_spill] sm:$0xff] %v4964_v48  ;;  %v638_v48 = vperm.slane %v517_v28, 0  ;;  %v3069_v28 = vsel %vm2239_vm1, %v3068_v61, %v3067_v6  ;;  %v7038_v6 = vsel %vm4948_vm10, %v4941_v24, %v4936_v49  ;;  %v3633_v49 = vmul.f32 -0.5, %v4977_v39 }
 0x185   : > { %7034 = vst [vmem:[#allocation34_spill] sm:$0xff] %v4966_v9  ;;  %v3063_v9 = vsel %vm2239_vm1, %v3062_v21, %v3061_v46  ;;  %v3070_v46 = vperm.slane %v1762_v44, %v4601_v22  ;;  %v3066_v21 = vsel %vm2239_vm1, %v3065_v17, %v3064_v11  ;;  %v7037_v44 = vld [vmem:[#allocation6_spill] sm:$0xff]  ;;  %v325_v17 = vld [vmem:[%s4255_s30 + $0x468] sm:$0x1] }
 0x186   : > { %1419 = vadd.xlane.f32.xlu0 %v1418_v15  ;;  %v2292_v15 = vperm.slane %v4502_v59, %v4601_v22  ;;  %v3071_v59 = vperm.slane %v1763_v4, %v4604_v57  ;;  %v1764_v54 = vsub.f32 0.0, %v7037_v44  ;;  %v964_v18 = vmul.f32 %v638_v48, %v324_v7 }
 0x187   : > { %v2298_v11 = vperm.slane %v7037_v44, %v4601_v22  ;;  %v1428_v4 = vsel %vm1082_vm0, %v963_v38, 0.0  ;;  %v3411_v61 = vsel %vm2622_vm2, %v3066_v21, %v3063_v9  ;;  %v7039_v7 = vmin.f32 %v4754_v10, 0.0  ;;  %v5048_v21 = vld [vmem:[%s4250_s26 + $0x48] sm:$0xff] }
 0x188   : > { %1424 = vadd.xlane.f32.xlu2 %v1423_v63  ;;  %1421 = vadd.xlane.f32.xlu1 %v960_v55  ;;  %v2294_v55 = vsel %vm2239_vm1, %v2293_v29, %v2292_v15  ;;  %v2643_v29 = vsel %vm2622_vm2, %v2291_v37, %v2288_v5  ;;  %v3072_v16 = vsel %vm2239_vm1, %v3071_v59, %v3070_v46  ;;  %v327_v15 = vld [vmem:[%s4255_s30 + $0x478] sm:$0x1]  ;;  %v3636_v10 = vand.u32 2147483647, %v4977_v39 }
 0x189   : > { %v4997_v0 = vpop.xlane.xlu0 %1314  ;;  %v5032_v60 = vsub.f32 %v7039_v7, %v7038_v6  ;;  %v2644_v34 = vsel %vm2624_vm3, %v2294_v55, %v2643_v29  ;;  %v3412_v5 = vsel %vm2624_vm3, %v3069_v28, %v3411_v61  ;;  %v965_v9 = vmul.f32 %v638_v48, %v325_v17  ;;  %v7042_v55 = vld [vmem:[#allocation7_spill] sm:$0xff] }
 0x18a   : > { %v2645_v27 = vsel %vm2626_vm4, %v2297_v1, %v2644_v34  ;;  %v3413_v24 = vsel %vm2626_vm4, %v3072_v16, %v3412_v5  ;;  %v2300_v37 = vsel %vm2239_vm1, %v2299_v32, %v2298_v11  ;;  %v3073_v46 = vperm.slane %v1764_v54, %v4601_v22  ;;  %v7043_v1 = vld [vmem:[#allocation8_spill] sm:$0xff]  ;;  %v7045_v54 = vld [vmem:[#allocation10_spill] sm:$0xff] }
 0x18b   : > { %v5009_v51 = vpop.xlane.xlu2 %1319  ;;  %v5011_v63 = vpop.xlane.xlu1 %1316  ;;  %7040 = vst [vmem:[#allocation5_spill] sm:$0xff] %v5032_v60  ;;  %v967_v48 = vmul.f32 %v639_v45, %v327_v15  ;;  %v1766_v28 = vsub.f32 0.0, %v7042_v55  ;;  %v1768_v52 = vsub.f32 0.0, %v7043_v1  ;;  %v2304_v44 = vperm.slane %v7043_v1, %v4601_v22 }
 0x18c   : > { %7035 = vst [vmem:[#allocation35_spill] sm:$0xff] %v5011_v63  ;;  %v1769_v11 = vsub.f32 0.0, %v7045_v54  ;;  %v2305_v29 = vperm.slane %v7045_v54, %v4604_v57  ;;  %v1433_v15 = vsel %vm1082_vm0, %v965_v9, 0.0  ;;  %v2646_v6 = vsel %vm2628_vm5, %v2300_v37, %v2645_v27 }
 0x18d   : > { %v519_v34 = vrot.slane %v5048_v21, 1  ;;  %v3634_v5 = vadd.f32 1.0, %v3633_v49  ;;  %v3075_v1 = vsel %vm2239_vm1, %v3074_v56, %v3073_v46  ;;  %v1438_v54 = vsel %vm1082_vm0, %v967_v48, 0.0 }
 0x18e   : > { %1426 = vadd.xlane.f32.xlu0 %v962_v23  ;;  %v326_v23 = vld [vmem:[%s4255_s30 + $0x470] sm:$0xff]  ;;  %v640_v38 = vperm.slane %v5048_v21, 0  ;;  %v3076_v60 = vperm.slane %v1766_v28, %v4601_v22  ;;  %v3079_v9 = vperm.slane %v1768_v52, %v4601_v22  ;;  %v2306_v56 = vsel %vm2239_vm1, %v2305_v29, %v2304_v44 }
 0x18f   : > { %v966_v7 = vmul.f32 %v639_v45, %v326_v23  ;;  %v329_v45 = vld [vmem:[%s4255_s30 + $0x488] sm:$0x1]  ;;  %v3080_v46 = vperm.slane %v1769_v11, %v4604_v57  ;;  %v7048_v23 = vld [vmem:[#allocation11_spill] sm:$0xff]  ;;  %v520_v11 = vrot.slane %v5048_v21, 2  ;;  %v3635_v29 = vmul.f32 %v4977_v39, %v3634_v5 }
 0x190   : > { %1431 = vadd.xlane.f32.xlu2 %v964_v18  ;;  %1429 = vadd.xlane.f32.xlu1 %v1428_v4  ;;  %v7044_v18 = vld [vmem:[#allocation9_spill] sm:$0xff]  ;;  %v4061_v4 = vpop.eup %4060  ;;  %v1771_v48 = vsub.f32 0.0, %v7048_v23  ;;  %v2308_v28 = vperm.slane %v7048_v23, %v4604_v57  ;;  %v969_v44 = vmul.f32 %v640_v38, %v329_v45  ;;  %vm5091_vm11 = vcmp.lt.f32.partialorder %v3636_v10, 0.0004427343 }
 0x191   : > { %v5044_v59 = vpop.xlane.xlu0 %1321  ;;  %v1767_v17 = vsub.f32 0.0, %v7044_v18  ;;  %v2302_v32 = vperm.slane %v7044_v18, %v4604_v57  ;;  %v2301_v18 = vperm.slane %v7042_v55, %v4601_v22  ;;  %v3632_v37 = vmul.f32 0.6931472, %v4061_v4  ;;  %v328_v55 = vld [vmem:[%s4255_s30 + $0x480] sm:$0xff] }
 0x192   : > { %7041 = vst [vmem:[#allocation6_spill] sm:$0xff] %v5044_v59  ;;  %v641_v4 = vperm.slane %v519_v34, 0  ;;  %v3414_v23 = vsel %vm2628_vm5, %v3075_v1, %v3413_v24  ;;  %v968_v34 = vmul.f32 %v640_v38, %v328_v55  ;;  %v3081_v45 = vsel %vm2239_vm1, %v3080_v46, %v3079_v9  ;;  %v331_v1 = vld [vmem:[%s4255_s30 + $0x498] sm:$0x1] }
 0x193   : > { %v5060_v61 = vpop.xlane.xlu2 %1326  ;;  %v5062_v16 = vpop.xlane.xlu1 %1324  ;;  %v3077_v27 = vperm.slane %v1767_v17, %v4604_v57  ;;  %v2303_v49 = vsel %vm2239_vm1, %v2302_v32, %v2301_v18  ;;  %v330_v32 = vld [vmem:[%s4255_s30 + $0x490] sm:$0xff]  ;;  %v3638_v10 = vsel %vm5091_vm11, %v3635_v29, %v3632_v37  ;;  %v642_v46 = vperm.slane %v520_v11, 0  ;;  %v7058_v29 = vld [vmem:[#allocation16_spill] sm:$0xff] }
 0x194   : > { %7046 = vst [vmem:[#allocation7_spill] sm:$0xff] %v5060_v61  ;;  %v970_v5 = vmul.f32 %v641_v4, %v330_v32  ;;  %v971_v32 = vmul.f32 %v641_v4, %v331_v1  ;;  %v7059_v18 = vmin.f32 %v4910_v26, 0.0  ;;  %v7063_v1 = vld [vmem:[#allocation18_spill] sm:$0xff] }
 0x195   : > { %7047 = vst [vmem:[#allocation8_spill] sm:$0xff] %v5062_v16  ;;  %v7049_v16 = vld [vmem:[#allocation12_spill] sm:$0xff] }
 0x196   : > { %1434 = vadd.xlane.f32.xlu0 %v1433_v15  ;;  %v1770_v52 = vsub.f32 0.0, %v7049_v16  ;;  %v2307_v17 = vperm.slane %v7049_v16, %v4601_v22  ;;  %v2647_v16 = vsel %vm2630_vm6, %v2303_v49, %v2646_v6 }
 0x198   : > { %1439 = vadd.xlane.f32.xlu2 %v1438_v54  ;;  %1436 = vadd.xlane.f32.xlu1 %v966_v7  ;;  %v3078_v7 = vsel %vm2239_vm1, %v3077_v27, %v3076_v60  ;;  %v2648_v54 = vsel %vm2632_vm7, %v2306_v56, %v2647_v16  ;;  %v2309_v24 = vsel %vm2239_vm1, %v2308_v28, %v2307_v17  ;;  %v7055_v60 = vld [vmem:[#allocation13_spill] sm:$0xff]  ;;  %v7056_v27 = vld [vmem:[#allocation15_spill] sm:$0xff]  ;;  %v1443_v56 = vsel %vm1082_vm0, %v969_v44, 0.0 }
 0x199   : > { %v5086_v15 = vpop.xlane.xlu0 %1329  ;;  %v3082_v6 = vperm.slane %v1770_v52, %v4601_v22  ;;  %v1772_v38 = vsub.f32 0.0, %v7055_v60  ;;  %v3415_v9 = vsel %vm2630_vm6, %v3078_v7, %v3414_v23  ;;  %v1773_v49 = vsub.f32 0.0, %v7056_v27  ;;  %v333_v17 = vld [vmem:[%s4255_s30 + $0x4a8] sm:$0x1] }
 0x19a   : > { %7050 = vst [vmem:[#allocation9_spill] sm:$0xff] %v5086_v15  ;;  %v3083_v15 = vperm.slane %v1771_v48, %v4604_v57  ;;  %v7057_v48 = vld [vmem:[#allocation14_spill] sm:$0xff]  ;;  %v1775_v28 = vsub.f32 0.0, %v7058_v29  ;;  %v2314_v52 = vperm.slane %v7058_v29, %v4604_v57  ;;  %v5123_v23 = vsub.f32 %v7059_v18, %v3638_v10  ;;  %v332_v10 = vld [vmem:[%s4255_s30 + $0x4a0] sm:$0xff] }
 0x19b   : > { %v5101_v61 = vpop.xlane.xlu2 %1334  ;;  %v5103_v39 = vpop.xlane.xlu1 %1331  ;;  %v1774_v55 = vsub.f32 0.0, %v7057_v48  ;;  %v2313_v37 = vperm.slane %v7057_v48, %v4601_v22  ;;  %v5126_v44 = vsel %vm2634_vm8, %v2309_v24, %v2648_v54  ;;  %v3416_v11 = vsel %vm2632_vm7, %v3081_v45, %v3415_v9 }
 0x19c   : > { %7053 = vst [vmem:[#allocation10_spill] sm:$0xff] %v5101_v61  ;;  %v3084_v16 = vsel %vm2239_vm1, %v3083_v15, %v3082_v6  ;;  %v2310_v7 = vperm.slane %v7055_v60, %v4601_v22  ;;  %v3085_v48 = vperm.slane %v1772_v38, %v4601_v22  ;;  %v2311_v4 = vperm.slane %v7056_v27, %v4604_v57  ;;  %v7062_v60 = vld [vmem:[#allocation17_spill] sm:$0xff] }
 0x19d   : > { %7054 = vst [vmem:[#allocation11_spill] sm:$0xff] %v5103_v39  ;;  %v3086_v26 = vperm.slane %v1773_v49, %v4604_v57  ;;  %v973_v54 = vmul.f32 %v642_v46, %v333_v17  ;;  %v521_v45 = vrot.slane %v5048_v21, 3  ;;  %v3088_v15 = vperm.slane %v1774_v55, %v4601_v22 }
 0x19e   : > { %1441 = vadd.xlane.f32.xlu0 %v968_v34  ;;  %7060 = vst [vmem:[#allocation12_spill] sm:$0xff] %v5123_v23  ;;  %v2315_v24 = vsel %vm2239_vm1, %v2314_v52, %v2313_v37  ;;  %v3089_v6 = vperm.slane %v1775_v28, %v4604_v57  ;;  %v1777_v38 = vsub.f32 0.0, %v7062_v60  ;;  %v1776_v9 = vsub.f32 0.0, %v7063_v1  ;;  %v7066_v37 = vld [vmem:[#allocation21_spill] sm:$0xff] }
 0x19f   : > { %v2316_v27 = vperm.slane %v7063_v1, %v4601_v22  ;;  %v1448_v55 = vsel %vm1082_vm0, %v971_v32, 0.0  ;;  %v1779_v29 = vsub.f32 0.0, %v7066_v37  ;;  %v972_v28 = vmul.f32 %v642_v46, %v332_v10  ;;  %v7067_v46 = vld [vmem:[#allocation19_spill] sm:$0xff] }
 0x1a0   : > { %1446 = vadd.xlane.f32.xlu2 %v970_v5  ;;  %1444 = vadd.xlane.f32.xlu1 %v1443_v56  ;;  %v2317_v5 = vperm.slane %v7062_v60, %v4604_v57  ;;  %v522_v52 = vrot.slane %v5048_v21, 4  ;;  %v5157_v17 = vsel %vm2634_vm8, %v3084_v16, %v3416_v11  ;;  %v2312_v18 = vsel %vm2239_vm1, %v2311_v4, %v2310_v7  ;;  %v7068_v7 = vld [vmem:[#allocation20_spill] sm:$0xff]  ;;  %v7069_v4 = vld [vmem:[#allocation22_spill] sm:$0xff] }
 0x1a1   : > { %v5136_v34 = vpop.xlane.xlu0 %1336  ;;  %v3087_v60 = vsel %vm2239_vm1, %v3086_v26, %v3085_v48  ;;  %v1453_v1 = vsel %vm1082_vm0, %v973_v54, 0.0  ;;  %v643_v23 = vperm.slane %v521_v45, 0  ;;  %v3090_v32 = vsel %vm2239_vm1, %v3089_v6, %v3088_v15  ;;  %v334_v54 = vld [vmem:[%s4255_s30 + $0x4b0] sm:$0xff] }
 0x1a2   : > { %7061 = vst [vmem:[#allocation13_spill] sm:$0xff] %v5136_v34  ;;  %v1778_v10 = vsub.f32 0.0, %v7067_v46  ;;  %v335_v34 = vld [vmem:[%s4255_s30 + $0x4b8] sm:$0x1]  ;;  %v2318_v11 = vsel %vm2239_vm1, %v2317_v5, %v2316_v27  ;;  %v3091_v16 = vperm.slane %v1776_v9, %v4601_v22  ;;  %v1780_v48 = vsub.f32 0.0, %v7068_v7  ;;  %v336_v27 = vld [vmem:[%s4255_s30 + $0x4c0] sm:$0xff] }
 0x1a3   : > { %v5149_v49 = vpop.xlane.xlu2 %1341  ;;  %v5151_v56 = vpop.xlane.xlu1 %1339  ;;  %v1781_v26 = vsub.f32 0.0, %v7069_v4  ;;  %v2319_v45 = vperm.slane %v7067_v46, %v4601_v22  ;;  %v2320_v15 = vperm.slane %v7066_v37, %v4604_v57  ;;  %v644_v6 = vperm.slane %v522_v52, 0  ;;  %v7071_v46 = vld [vmem:[#allocation23_spill] sm:$0xff] }
 0x1a4   : > { %7064 = vst [vmem:[#allocation15_spill] sm:$0xff] %v5149_v49  ;;  %v2650_v49 = vsel %vm2622_vm2, %v2315_v24, %v2312_v18  ;;  %v3095_v24 = vperm.slane %v1779_v29, %v4604_v57  ;;  %v2323_v5 = vperm.slane %v7069_v4, %v4604_v57  ;;  %v523_v18 = vrot.slane %v5048_v21, 5 }
 0x1a5   : > { %7065 = vst [vmem:[#allocation14_spill] sm:$0xff] %v5151_v56  ;;  %v3092_v56 = vperm.slane %v1777_v38, %v4604_v57  ;;  %v2322_v38 = vperm.slane %v7068_v7, %v4601_v22  ;;  %v3094_v37 = vperm.slane %v1778_v10, %v4601_v22  ;;  %v1783_v29 = vsub.f32 0.0, %v7071_v46 }
 0x1a6   : > { %1449 = vadd.xlane.f32.xlu0 %v1448_v55  ;;  %v975_v55 = vmul.f32 %v643_v23, %v335_v34  ;;  %v974_v52 = vmul.f32 %v643_v23, %v334_v54  ;;  %v3418_v39 = vsel %vm2622_vm2, %v3090_v32, %v3087_v60  ;;  %v2651_v7 = vsel %vm2624_vm3, %v2318_v11, %v2650_v49  ;;  %v337_v54 = vld [vmem:[%s4255_s30 + $0x4c8] sm:$0x1]  ;;  %v7074_v49 = vld [vmem:[#allocation27_spill] sm:$0xff] }
 0x1a7   : > { %v3097_v4 = vperm.slane %v1780_v48, %v4601_v22  ;;  %v3093_v10 = vsel %vm2239_vm1, %v3092_v56, %v3091_v16  ;;  %v2321_v59 = vsel %vm2239_vm1, %v2320_v15, %v2319_v45  ;;  %v3096_v63 = vsel %vm2239_vm1, %v3095_v24, %v3094_v37  ;;  %v339_v45 = vld [vmem:[%s4255_s30 + $0x4d8] sm:$0x1] }
 0x1a8   : > { %1454 = vadd.xlane.f32.xlu2 %v1453_v1  ;;  %1451 = vadd.xlane.f32.xlu1 %v972_v28  ;;  %v7072_v1 = vld [vmem:[#allocation24_spill] sm:$0xff]  ;;  %v976_v23 = vmul.f32 %v644_v6, %v336_v27  ;;  %v2324_v60 = vsel %vm2239_vm1, %v2323_v5, %v2322_v38  ;;  %v1785_v32 = vsub.f32 0.0, %v7074_v49  ;;  %v1458_v11 = vsel %vm1082_vm0, %v975_v55, 0.0  ;;  %v7075_v38 = vld [vmem:[#allocation25_spill] sm:$0xff] }
 0x1a9   : > { %v5181_v9 = vpop.xlane.xlu0 %1344  ;;  %v1782_v28 = vsub.f32 0.0, %v7072_v1  ;;  %v645_v48 = vperm.slane %v523_v18, 0  ;;  %v2325_v56 = vperm.slane %v7072_v1, %v4601_v22  ;;  %v3419_v15 = vsel %vm2624_vm3, %v3093_v10, %v3418_v39 }
 0x1aa   : > { %7070 = vst [vmem:[#allocation16_spill] sm:$0xff] %v5181_v9  ;;  %v3098_v9 = vperm.slane %v1781_v26, %v4604_v57  ;;  %v2326_v26 = vperm.slane %v7071_v46, %v4604_v57  ;;  %v1784_v5 = vsub.f32 0.0, %v7075_v38  ;;  %v977_v27 = vmul.f32 %v644_v6, %v337_v54 }
 0x1ab   : > { %v5192_v61 = vpop.xlane.xlu2 %1349  ;;  %v5194_v34 = vpop.xlane.xlu1 %1346  ;;  %v3100_v16 = vperm.slane %v1782_v28, %v4601_v22  ;;  %v2652_v55 = vsel %vm2626_vm4, %v2321_v59, %v2651_v7  ;;  %v3420_v18 = vsel %vm2626_vm4, %v3096_v63, %v3419_v15  ;;  %v2329_v37 = vperm.slane %v7074_v49, %v4604_v57 }
 0x1ac   : > { %7073 = vst [vmem:[#allocation17_spill] sm:$0xff] %v5194_v34  ;;  %v3101_v34 = vperm.slane %v1783_v29, %v4604_v57  ;;  %v3099_v24 = vsel %vm2239_vm1, %v3098_v9, %v3097_v4  ;;  %v2653_v46 = vsel %vm2628_vm5, %v2324_v60, %v2652_v55  ;;  %v3104_v29 = vperm.slane %v1785_v32, %v4604_v57  ;;  %v338_v9 = vld [vmem:[%s4255_s30 + $0x4d0] sm:$0xff] }
 0x1ad   : > { %v979_v39 = vmul.f32 %v645_v48, %v339_v45  ;;  %v524_v28 = vrot.slane %v5048_v21, 6  ;;  %v3421_v6 = vsel %vm2628_vm5, %v3099_v24, %v3420_v18  ;;  %v2327_v59 = vsel %vm2239_vm1, %v2326_v26, %v2325_v56  ;;  %v7076_v4 = vld [vmem:[#allocation26_spill] sm:$0xff] }
 0x1ae   : > { %1456 = vadd.xlane.f32.xlu0 %v974_v52  ;;  %v3102_v63 = vsel %vm2239_vm1, %v3101_v34, %v3100_v16  ;;  %v2328_v52 = vperm.slane %v7075_v38, %v4601_v22  ;;  %v3103_v7 = vperm.slane %v1784_v5, %v4601_v22  ;;  %v1786_v10 = vsub.f32 0.0, %v7076_v4 }
 0x1af   : > { %v1463_v49 = vsel %vm1082_vm0, %v977_v27, 0.0  ;;  %v2331_v32 = vperm.slane %v7076_v4, %v4601_v22  ;;  %v525_v26 = vrot.slane %v5048_v21, 7  ;;  %v2332_v16 = vperm.slane %v4645_v42, %v4604_v57  ;;  %v341_v27 = vld [vmem:[%s4255_s30 + $0x4e8] sm:$0x1] }
 0x1b0   : > { %1461 = vadd.xlane.f32.xlu2 %v976_v23  ;;  %1459 = vadd.xlane.f32.xlu1 %v1458_v11  ;;  %v1787_v23 = vsub.f32 0.0, %v4645_v42  ;;  %v2330_v34 = vsel %vm2239_vm1, %v2329_v37, %v2328_v52  ;;  %v978_v11 = vmul.f32 %v645_v48, %v338_v9  ;;  %v3105_v56 = vsel %vm2239_vm1, %v3104_v29, %v3103_v7  ;;  %v340_v37 = vld [vmem:[%s4255_s30 + $0x4e0] sm:$0xff] }
 0x1b1   : > { %v5219_v1 = vpop.xlane.xlu0 %1351  ;;  %v1468_v45 = vsel %vm1082_vm0, %v979_v39, 0.0  ;;  %v646_v15 = vperm.slane %v524_v28, 0  ;;  %v2654_v24 = vsel %vm2630_vm6, %v2327_v59, %v2653_v46  ;;  %v3422_v38 = vsel %vm2630_vm6, %v3102_v63, %v3421_v6  ;;  %v7077_v29 = vld [vmem:[#allocation28_spill] sm:$0xff]  ;;  %v342_v63 = vld [vmem:[%s4255_s30 + $0x4f0] sm:$0xff]  ;;  %v7078_v7 = vld [vmem:[#allocation29_spill] sm:$0xff] }
 0x1b2   : > { %v1791_v5 = vsub.f32 0.0, %v4699_v50  ;;  %v5252_v21 = vsel %vm1723_vm9, %v5126_v44, %v5157_v17  ;;  %v3106_v42 = vperm.slane %v1786_v10, %v4601_v22  ;;  %v2655_v48 = vsel %vm2632_vm7, %v2330_v34, %v2654_v24  ;;  %v5274_v34 = vld [vmem:[%s4250_s26 + $0x50] sm:$0xff] }
 0x1b3   : > { %v5231_v54 = vpop.xlane.xlu2 %1356  ;;  %v5233_v60 = vpop.xlane.xlu1 %1354  ;;  %v3107_v55 = vperm.slane %v1787_v23, %v4604_v57  ;;  %v1789_v18 = vsub.f32 0.0, %v4659_v33  ;;  %v1788_v46 = vsub.f32 0.0, %v4661_v8  ;;  %v1790_v39 = vsub.f32 0.0, %v7077_v29 }
 0x1b4   : > { %v647_v9 = vperm.slane %v525_v26, 0  ;;  %v3423_v44 = vsel %vm2632_vm7, %v3105_v56, %v3422_v38  ;;  %v2333_v17 = vsel %vm2239_vm1, %v2332_v16, %v2331_v32  ;;  %v2335_v28 = vperm.slane %v4659_v33, %v4604_v57  ;;  %v343_v38 = vld [vmem:[%s4255_s30 + $0x4f8] sm:$0x1] }
 0x1b5   : > { %v2338_v6 = vperm.slane %v4699_v50, %v4604_v57  ;;  %v981_v52 = vmul.f32 %v646_v15, %v341_v27  ;;  %v1792_v4 = vsub.f32 0.0, %v7078_v7  ;;  %v3113_v10 = vperm.slane %v1791_v5, %v4604_v57 }
 0x1b6   : > { %1464 = vadd.xlane.f32.xlu0 %v1463_v49  ;;  %v1793_v23 = vsub.f32 0.0, %v4729_v2  ;;  %v980_v49 = vmul.f32 %v646_v15, %v340_v37  ;;  %v3108_v32 = vsel %vm2239_vm1, %v3107_v55, %v3106_v42  ;;  %v3110_v33 = vperm.slane %v1789_v18, %v4604_v57 }
 0x1b7   : > { %v2334_v50 = vperm.slane %v4661_v8, %v4601_v22  ;;  %v3109_v16 = vperm.slane %v1788_v46, %v4601_v22  ;;  %v2340_v15 = vperm.slane %v7078_v7, %v4601_v22  ;;  %v982_v24 = vmul.f32 %v647_v9, %v342_v63  ;;  %v345_v46 = vld [vmem:[%s4255_s30 + $0x508] sm:$0x1] }
 0x1b8   : > { %1469 = vadd.xlane.f32.xlu2 %v1468_v45  ;;  %1466 = vadd.xlane.f32.xlu1 %v978_v11  ;;  %v2337_v11 = vperm.slane %v7077_v29, %v4601_v22  ;;  %v3112_v45 = vperm.slane %v1790_v39, %v4601_v22  ;;  %v2341_v8 = vperm.slane %v4729_v2, %v4604_v57  ;;  %v1473_v27 = vsel %vm1082_vm0, %v981_v52, 0.0 }
 0x1b9   : > { %v5267_v59 = vpop.xlane.xlu0 %1359  ;;  %v648_v42 = vperm.slane %v5274_v34, 0  ;;  %v3115_v55 = vperm.slane %v1792_v4, %v4601_v22  ;;  %v3116_v37 = vperm.slane %v1793_v23, %v4604_v57  ;;  %v2656_v29 = vsel %vm2634_vm8, %v2333_v17, %v2655_v48 }
 0x1ba   : > { %v2339_v5 = vsel %vm2239_vm1, %v2338_v6, %v2337_v11  ;;  %v3114_v18 = vsel %vm2239_vm1, %v3113_v10, %v3112_v45  ;;  %v2336_v39 = vsel %vm2239_vm1, %v2335_v28, %v2334_v50  ;;  %v1795_v6 = vsub.f32 0.0, %v4738_v35  ;;  %v344_v28 = vld [vmem:[%s4255_s30 + $0x500] sm:$0xff] }
 0x1bb   : > { %v5282_v26 = vpop.xlane.xlu2 %1364  ;;  %v5284_v56 = vpop.xlane.xlu1 %1361  ;;  %v1794_v2 = vsub.f32 0.0, %v4740_v41  ;;  %v983_v63 = vmul.f32 %v647_v9, %v343_v38  ;;  %v3111_v52 = vsel %vm2239_vm1, %v3110_v33, %v3109_v16  ;;  %v2657_v7 = vsel %vm2622_vm2, %v2339_v5, %v2336_v39  ;;  %v7079_v38 = vld [vmem:[#allocation30_spill] sm:$0xff] }
 0x1bc   : > { %v3424_v4 = vsel %vm2634_vm8, %v3108_v32, %v3423_v44  ;;  %v3425_v10 = vsel %vm2622_vm2, %v3114_v18, %v3111_v52  ;;  %v2342_v23 = vsel %vm2239_vm1, %v2341_v8, %v2340_v15  ;;  %v985_v17 = vmul.f32 %v648_v42, %v345_v46 }
 0x1bd   : > { %v3117_v9 = vsel %vm2239_vm1, %v3116_v37, %v3115_v55  ;;  %v2344_v33 = vperm.slane %v4738_v35, %v4604_v57  ;;  %v2343_v50 = vperm.slane %v4740_v41, %v4601_v22  ;;  %v1797_v44 = vsub.f32 0.0, %v4765_v30 }
 0x1be   : > { %1471 = vadd.xlane.f32.xlu0 %v980_v49  ;;  %v526_v49 = vrot.slane %v5274_v34, 1  ;;  %v3119_v32 = vperm.slane %v1795_v6, %v4604_v57  ;;  %v3118_v11 = vperm.slane %v1794_v2, %v4601_v22  ;;  %v1796_v16 = vsub.f32 0.0, %v4756_v53  ;;  %v347_v2 = vld [vmem:[%s4255_s30 + $0x518] sm:$0x1] }
 0x1bf   : > { %v1798_v35 = vsub.f32 0.0, %v4763_v31  ;;  %v1799_v5 = vsub.f32 0.0, %v7079_v38  ;;  %v984_v41 = vmul.f32 %v648_v42, %v344_v28  ;;  %v527_v8 = vrot.slane %v5274_v34, 2 }
 0x1c0   : > { %1476 = vadd.xlane.f32.xlu2 %v982_v24  ;;  %1474 = vadd.xlane.f32.xlu1 %v1473_v27  ;;  %v1478_v24 = vsel %vm1082_vm0, %v983_v63, 0.0  ;;  %v2658_v27 = vsel %vm2624_vm3, %v2342_v23, %v2657_v7  ;;  %v2347_v55 = vperm.slane %v4765_v30, %v4604_v57  ;;  %v1483_v18 = vsel %vm1082_vm0, %v985_v17, 0.0 }
 0x1c1   : > { %v5309_v48 = vpop.xlane.xlu0 %1366  ;;  %v649_v37 = vperm.slane %v526_v49, 0  ;;  %v3426_v46 = vsel %vm2624_vm3, %v3117_v9, %v3425_v10  ;;  %v2345_v39 = vsel %vm2239_vm1, %v2344_v33, %v2343_v50  ;;  %v3122_v6 = vperm.slane %v1797_v44, %v4604_v57  ;;  %v346_v10 = vld [vmem:[%s4255_s30 + $0x510] sm:$0xff]  ;;  %v349_v44 = vld [vmem:[%s4255_s30 + $0x528] sm:$0x1] }
 0x1c2   : > { %v528_v42 = vrot.slane %v5274_v34, 3  ;;  %v3120_v63 = vsel %vm2239_vm1, %v3119_v32, %v3118_v11  ;;  %v2346_v30 = vperm.slane %v4756_v53, %v4601_v22  ;;  %v2349_v52 = vperm.slane %v4763_v31, %v4601_v22  ;;  %v348_v31 = vld [vmem:[%s4255_s30 + $0x520] sm:$0xff] }
 0x1c3   : > { %v5322_v45 = vpop.xlane.xlu2 %1371  ;;  %v5324_v15 = vpop.xlane.xlu1 %1369  ;;  %v2350_v7 = vperm.slane %v7079_v38, %v4604_v57  ;;  %v3121_v23 = vperm.slane %v1796_v16, %v4601_v22  ;;  %v3124_v17 = vperm.slane %v1798_v35, %v4601_v22  ;;  %v3125_v28 = vperm.slane %v1799_v5, %v4604_v57 }
 0x1c4   : > { %v650_v49 = vperm.slane %v527_v8, 0  ;;  %v2659_v9 = vsel %vm2626_vm4, %v2345_v39, %v2658_v27  ;;  %v2348_v53 = vsel %vm2239_vm1, %v2347_v55, %v2346_v30  ;;  %v987_v50 = vmul.f32 %v649_v37, %v347_v2 }
 0x1c5   : > { %v5358_v32 = vsel %vm1723_vm9, %v2656_v29, %v3424_v4  ;;  %v3123_v11 = vsel %vm2239_vm1, %v3122_v6, %v3121_v23  ;;  %v986_v16 = vmul.f32 %v649_v37, %v346_v10  ;;  %v529_v35 = vrot.slane %v5274_v34, 4  ;;  %v351_v4 = vld [vmem:[%s4255_s30 + $0x538] sm:$0x1] }
 0x1c6   : > { %1479 = vadd.xlane.f32.xlu0 %v1478_v24  ;;  %v651_v24 = vperm.slane %v528_v42, 0  ;;  %v3427_v38 = vsel %vm2626_vm4, %v3120_v63, %v3426_v46  ;;  %v2351_v5 = vsel %vm2239_vm1, %v2350_v7, %v2349_v52  ;;  %v2353_v8 = vperm.slane %v4804_v43, %v4604_v57 }
 0x1c7   : > { %v3126_v55 = vsel %vm2239_vm1, %v3125_v28, %v3124_v17  ;;  %v988_v37 = vmul.f32 %v650_v49, %v348_v31  ;;  %v989_v46 = vmul.f32 %v650_v49, %v349_v44  ;;  %v2660_v39 = vsel %vm2628_vm5, %v2348_v53, %v2659_v9  ;;  %v352_v49 = vld [vmem:[%s4255_s30 + $0x540] sm:$0xff]  ;;  %v353_v44 = vld [vmem:[%s4255_s30 + $0x548] sm:$0x1] }
 0x1c8   : > { %1484 = vadd.xlane.f32.xlu2 %v1483_v18  ;;  %1481 = vadd.xlane.f32.xlu1 %v984_v41  ;;  %v1801_v41 = vsub.f32 0.0, %v4804_v43  ;;  %v2352_v18 = vperm.slane %v4806_v25, %v4601_v22  ;;  %v3428_v6 = vsel %vm2628_vm5, %v3123_v11, %v3427_v38  ;;  %v1488_v2 = vsel %vm1082_vm0, %v987_v50, 0.0  ;;  %v350_v43 = vld [vmem:[%s4255_s30 + $0x530] sm:$0xff] }
 0x1c9   : > { %v5352_v33 = vpop.xlane.xlu0 %1374  ;;  %v530_v42 = vrot.slane %v5274_v34, 5  ;;  %v5381_v63 = vsel %vm2630_vm6, %v2351_v5, %v2660_v39  ;;  %v991_v52 = vmul.f32 %v651_v24, %v351_v4  ;;  %v652_v7 = vperm.slane %v529_v35, 0 }
 0x1ca   : > { %v5385_v10 = vsel %vm2630_vm6, %v3126_v55, %v3428_v6  ;;  %v5388_v23 = vperm.slane %v1801_v41, %v4604_v57  ;;  %v1837_v17 = vsub.f32 0.0, %v5282_v26  ;;  %v1836_v28 = vsub.f32 0.0, %v5284_v56  ;;  %v354_v55 = vld [vmem:[%s4255_s30 + $0x550] sm:$0xff] }
 0x1cb   : > { %v5367_v27 = vpop.xlane.xlu2 %1379  ;;  %v5369_v29 = vpop.xlane.xlu1 %1376  ;;  %v5394_v9 = vsel %vm2239_vm1, %v2353_v8, %v2352_v18  ;;  %v1839_v53 = vsub.f32 0.0, %v5324_v15  ;;  %v1493_v31 = vsel %vm1082_vm0, %v989_v46, 0.0  ;;  %v990_v50 = vmul.f32 %v651_v24, %v350_v43 }
 0x1cc   : > { %v2407_v11 = vperm.slane %v5282_v26, %v4604_v57  ;;  %v1838_v35 = vsub.f32 0.0, %v5309_v48  ;;  %v653_v5 = vperm.slane %v530_v42, 0  ;;  %v1840_v41 = vsub.f32 0.0, %v5322_v45 }
 0x1cd   : > { %v1841_v8 = vsub.f32 0.0, %v5352_v33  ;;  %v1498_v4 = vsel %vm1082_vm0, %v991_v52, 0.0  ;;  %v992_v24 = vmul.f32 %v652_v7, %v352_v49  ;;  %v3182_v18 = vperm.slane %v1837_v17, %v4604_v57  ;;  %v355_v52 = vld [vmem:[%s4255_s30 + $0x558] sm:$0x1] }
 0x1ce   : > { %1486 = vadd.xlane.f32.xlu0 %v986_v16  ;;  %v2406_v16 = vperm.slane %v5284_v56, %v4601_v22  ;;  %v3181_v26 = vperm.slane %v1836_v28, %v4601_v22  ;;  %v993_v46 = vmul.f32 %v652_v7, %v353_v44  ;;  %v531_v39 = vrot.slane %v5274_v34, 6 }
 0x1cf   : > { %v2412_v6 = vperm.slane %v5322_v45, %v4601_v22  ;;  %v3185_v43 = vperm.slane %v1839_v53, %v4604_v57  ;;  %v2413_v42 = vperm.slane %v5352_v33, %v4604_v57  ;;  %v2409_v28 = vperm.slane %v5309_v48, %v4601_v22 }
 0x1d0   : > { %1491 = vadd.xlane.f32.xlu2 %v988_v37  ;;  %1489 = vadd.xlane.f32.xlu1 %v1488_v2  ;;  %v2410_v2 = vperm.slane %v5324_v15, %v4604_v57  ;;  %v2408_v17 = vsel %vm2239_vm1, %v2407_v11, %v2406_v16  ;;  %v3184_v7 = vperm.slane %v1838_v35, %v4601_v22  ;;  %v1843_v15 = vsub.f32 0.0, %v5367_v27 }
 0x1d1   : > { %v5404_v38 = vpop.xlane.xlu0 %1381  ;;  %v994_v49 = vmul.f32 %v653_v5, %v354_v55  ;;  %v3187_v44 = vperm.slane %v1840_v41, %v4601_v22  ;;  %v3188_v45 = vperm.slane %v1841_v8, %v4604_v57  ;;  %v1842_v53 = vsub.f32 0.0, %v5369_v29 }
 0x1d2   : > { %v3183_v33 = vsel %vm2239_vm1, %v3182_v18, %v3181_v26  ;;  %v1503_v11 = vsel %vm1082_vm0, %v993_v46, 0.0  ;;  %v995_v16 = vmul.f32 %v653_v5, %v355_v52  ;;  %v2411_v48 = vsel %vm2239_vm1, %v2410_v2, %v2409_v28 }
 0x1d3   : > { %v1387_v37 = vpop.xlane.xlu2 %1386  ;;  %v1385_v56 = vpop.xlane.xlu1 %1384  ;;  %v3186_v35 = vsel %vm2239_vm1, %v3185_v43, %v3184_v7  ;;  %v2414_v55 = vsel %vm2239_vm1, %v2413_v42, %v2412_v6  ;;  %v654_v41 = vperm.slane %v531_v39, 0  ;;  %v2416_v8 = vperm.slane %v5367_v27, %v4604_v57 }
 0x1d4   : > { %v1845_v30 = vsub.f32 0.0, %v1385_v56  ;;  %v1844_v18 = vsub.f32 0.0, %v5404_v38  ;;  %v1846_v26 = vsub.f32 0.0, %v1387_v37  ;;  %v3189_v5 = vsel %vm2239_vm1, %v3188_v45, %v3187_v44 }
 0x1d5   : > { %v3191_v2 = vperm.slane %v1843_v15, %v4604_v57  ;;  %v3190_v43 = vperm.slane %v1842_v53, %v4601_v22  ;;  %v2678_v52 = vsel %vm2622_vm2, %v2411_v48, %v2408_v17  ;;  %v3446_v28 = vsel %vm2622_vm2, %v3186_v35, %v3183_v33  ;;  %v357_v48 = vld [vmem:[%s4255_s30 + $0x568] sm:$0x1] }
 0x1d6   : > { %1494 = vadd.xlane.f32.xlu0 %v1493_v31  ;;  %v2415_v31 = vperm.slane %v5369_v29, %v4601_v22  ;;  %v3194_v27 = vperm.slane %v1845_v30, %v4604_v57  ;;  %v2418_v7 = vperm.slane %v5404_v38, %v4601_v22  ;;  %v3193_v45 = vperm.slane %v1844_v18, %v4601_v22 }
 0x1d7   : > { %v2679_v15 = vsel %vm2624_vm3, %v2414_v55, %v2678_v52  ;;  %v3447_v53 = vsel %vm2624_vm3, %v3189_v5, %v3446_v28  ;;  %v3192_v33 = vsel %vm2239_vm1, %v3191_v2, %v3190_v43  ;;  %v997_v43 = vmul.f32 %v654_v41, %v357_v48  ;;  %v358_v48 = vld [vmem:[%s4255_s30 + $0x570] sm:$0xff] }
 0x1d8   : > { %1499 = vadd.xlane.f32.xlu2 %v1498_v4  ;;  %1496 = vadd.xlane.f32.xlu1 %v990_v50  ;;  %v2421_v50 = vperm.slane %v1387_v37, %v4601_v22  ;;  %v2419_v4 = vperm.slane %v1385_v56, %v4604_v57  ;;  %v3196_v37 = vperm.slane %v1846_v26, %v4601_v22  ;;  %v1508_v28 = vsel %vm1082_vm0, %v995_v16, 0.0 }
 0x1d9   : > { %v1390_v46 = vpop.xlane.xlu0 %1389  ;;  %v2417_v17 = vsel %vm2239_vm1, %v2416_v8, %v2415_v31  ;;  %v3195_v35 = vsel %vm2239_vm1, %v3194_v27, %v3193_v45  ;;  %v356_v8 = vld [vmem:[%s4255_s30 + $0x560] sm:$0xff]  ;;  %v3448_v27 = vsel %vm2626_vm4, %v3192_v33, %v3447_v53  ;;  %v5489_v16 = vsel %vm2632_vm7, %v5394_v9, %v5381_v63 }
 0x1da   : > { %v1847_v6 = vsub.f32 0.0, %v1390_v46  ;;  %v2422_v39 = vperm.slane %v1390_v46, %v4604_v57  ;;  %v2420_v38 = vsel %vm2239_vm1, %v2419_v4, %v2418_v7  ;;  %v996_v7 = vmul.f32 %v654_v41, %v356_v8 }
 0x1db   : > { %v1395_v29 = vpop.xlane.xlu2 %1394  ;;  %v1392_v42 = vpop.xlane.xlu1 %1391  ;;  %v3559_v8 = vand.u32 2147483647, %v5252_v21 }
 0x1dc   : > { %v1849_v44 = vsub.f32 0.0, %v1395_v29  ;;  %v3197_v56 = vperm.slane %v1847_v6, %v4604_v57  ;;  %v1848_v30 = vsub.f32 0.0, %v1392_v42  ;;  %v2423_v18 = vsel %vm2239_vm1, %v2422_v39, %v2421_v50 }
 0x1dd   : > { %v2425_v26 = vperm.slane %v1395_v29, %v4604_v57  ;;  %v2424_v55 = vperm.slane %v1392_v42, %v4601_v22  ;;  %v532_v6 = vrot.slane %v5274_v34, 7  ;;  %v7080_v50 = vsub.f32 0.0, %v4806_v25 }
 0x1de   : > { %1501 = vadd.xlane.f32.xlu0 %v992_v24  ;;  %v3200_v46 = vperm.slane %v1849_v44, %v4604_v57  ;;  %v3199_v5 = vperm.slane %v1848_v30, %v4601_v22  ;;  %v2680_v24 = vsel %vm2626_vm4, %v2417_v17, %v2679_v15  ;;  %v3198_v31 = vsel %vm2239_vm1, %v3197_v56, %v3196_v37  ;;  %v5481_v37 = vld [vmem:[%s4250_s26 + $0x58] sm:$0xff] }
 0x1df   : > { %v3127_v4 = vperm.slane %v7080_v50, %v4601_v22  ;;  %v2681_v39 = vsel %vm2628_vm5, %v2420_v38, %v2680_v24  ;;  %v2426_v25 = vsel %vm2239_vm1, %v2425_v26, %v2424_v55  ;;  %v1513_v15 = vsel %vm1082_vm0, %v997_v43, 0.0  ;;  %v359_v38 = vld [vmem:[%s4255_s30 + $0x578] sm:$0x1] }
 0x1e0   : > { %1506 = vadd.xlane.f32.xlu2 %v994_v49  ;;  %1504 = vadd.xlane.f32.xlu1 %v1503_v11  ;;  %v3449_v11 = vsel %vm2628_vm5, %v3195_v35, %v3448_v27  ;;  %v2682_v29 = vsel %vm2630_vm6, %v2423_v18, %v2681_v39  ;;  %v3201_v44 = vsel %vm2239_vm1, %v3200_v46, %v3199_v5  ;;  %v655_v53 = vperm.slane %v532_v6, 0  ;;  %v360_v5 = vld [vmem:[%s4255_s30 + $0x580] sm:$0xff] }
 0x1e1   : > { %v1397_v2 = vpop.xlane.xlu0 %1396  ;;  %v3450_v34 = vsel %vm2630_vm6, %v3198_v31, %v3449_v11  ;;  %v2683_v35 = vsel %vm2632_vm7, %v2426_v25, %v2682_v29  ;;  %v656_v26 = vperm.slane %v5481_v37, 0  ;;  %v533_v43 = vrot.slane %v5481_v37, 1 }
 0x1e2   : > { %v1850_v49 = vsub.f32 0.0, %v1397_v2  ;;  %v2427_v56 = vperm.slane %v1397_v2, %v4601_v22  ;;  %v3451_v46 = vsel %vm2632_vm7, %v3201_v44, %v3450_v34  ;;  %v998_v31 = vmul.f32 %v655_v53, %v358_v48 }
 0x1e3   : > { %v1402_v42 = vpop.xlane.xlu2 %1401  ;;  %v1400_v52 = vpop.xlane.xlu1 %1399  ;;  %v999_v2 = vmul.f32 %v655_v53, %v359_v38  ;;  %v3129_v11 = vsel %vm2239_vm1, %v5388_v23, %v3127_v4  ;;  %v1802_v29 = vsub.f32 0.0, %v4829_v19  ;;  %v1803_v53 = vsub.f32 0.0, %v4843_v3 }
 0x1e4   : > { %v1851_v45 = vsub.f32 0.0, %v1400_v52  ;;  %v2428_v30 = vperm.slane %v1400_v52, %v4604_v57  ;;  %v3202_v41 = vperm.slane %v1850_v49, %v4601_v22  ;;  %v1852_v17 = vsub.f32 0.0, %v1402_v42 }
 0x1e5   : > { %v2430_v63 = vperm.slane %v1402_v42, %v4601_v22  ;;  %v2355_v42 = vperm.slane %v4829_v19, %v4601_v22  ;;  %v1518_v4 = vsel %vm1082_vm0, %v999_v2, 0.0  ;;  %v1804_v19 = vsub.f32 0.0, %v4841_v13 }
 0x1e6   : > { %v3203_v33 = vperm.slane %v1851_v45, %v4604_v57  ;;  %1509 = vadd.xlane.f32.xlu0 %v1508_v28  ;;  %v2429_v18 = vsel %vm2239_vm1, %v2428_v30, %v2427_v56  ;;  %v3205_v50 = vperm.slane %v1852_v17, %v4601_v22  ;;  %v361_v56 = vld [vmem:[%s4255_s30 + $0x588] sm:$0x1] }
 0x1e7   : > { %v2684_v9 = vsel %vm2634_vm8, %v2429_v18, %v2683_v35  ;;  %v1001_v35 = vmul.f32 %v656_v26, %v361_v56  ;;  %v534_v18 = vrot.slane %v5481_v37, 2 }
 0x1e8   : > { %v3204_v55 = vsel %vm2239_vm1, %v3203_v33, %v3202_v41  ;;  %1514 = vadd.xlane.f32.xlu2 %v1513_v15  ;;  %1511 = vadd.xlane.f32.xlu1 %v996_v7  ;;  %v1000_v7 = vmul.f32 %v656_v26, %v360_v5  ;;  %v657_v15 = vperm.slane %v533_v43, 0  ;;  %v363_v33 = vld [vmem:[%s4255_s30 + $0x598] sm:$0x1]  ;;  %v5539_v5 = vperm.slane %v1802_v29, %v4601_v22 }
 0x1e9   : > { %v1405_v24 = vpop.xlane.xlu0 %1404  ;;  %v3452_v6 = vsel %vm2634_vm8, %v3204_v55, %v3451_v46  ;;  %v2356_v46 = vperm.slane %v4843_v3, %v4604_v57  ;;  %v5536_v55 = vsel %vm2632_vm7, %v3129_v11, %v5385_v10  ;;  %v362_v3 = vld [vmem:[%s4255_s30 + $0x590] sm:$0xff]  ;;  %v2358_v43 = vperm.slane %v4841_v13, %v4601_v22 }
 0x1ea   : > { %v1853_v27 = vsub.f32 0.0, %v1405_v24  ;;  %v2431_v39 = vperm.slane %v1405_v24, %v4604_v57  ;;  %v5510_v49 = vsel %vm1723_vm9, %v2684_v9, %v3452_v6  ;;  %v3575_v9 = vsub.f32 0.0, %v3559_v8 }
 0x1eb   : > { %v1410_v52 = vpop.xlane.xlu2 %1409  ;;  %v1407_v28 = vpop.xlane.xlu1 %1406  ;;  %v1805_v24 = vsub.f32 0.0, %v4879_v20  ;;  %v1003_v2 = vmul.f32 %v657_v15, %v363_v33  ;;  %v5547_v8 = vperm.slane %v1804_v19, %v4601_v22  ;;  %v1523_v11 = vsel %vm1082_vm0, %v1001_v35, 0.0 }
 0x1ec   : > { %v2432_v34 = vsel %vm2239_vm1, %v2431_v39, %v2430_v63  ;;  %v3206_v25 = vperm.slane %v1853_v27, %v4604_v57  ;;  %v1855_v44 = vsub.f32 0.0, %v1410_v52  ;;  %v2434_v45 = vperm.slane %v1410_v52, %v4604_v57 }
 0x1ed   : > { %v1854_v30 = vsub.f32 0.0, %v1407_v28  ;;  %v2433_v23 = vperm.slane %v1407_v28, %v4601_v22  ;;  %v658_v29 = vperm.slane %v534_v18, 0  ;;  %v535_v52 = vrot.slane %v5481_v37, 3 }
 0x1ee   : > { %v3207_v41 = vsel %vm2239_vm1, %v3206_v25, %v3205_v50  ;;  %v3209_v17 = vperm.slane %v1855_v44, %v4604_v57  ;;  %1516 = vadd.xlane.f32.xlu0 %v998_v31  ;;  %v5551_v50 = vperm.slane %v1803_v53, %v4604_v57  ;;  %v5556_v28 = vsel %vm2239_vm1, %v2356_v46, %v2355_v42  ;;  %v365_v44 = vld [vmem:[%s4255_s30 + $0x5a8] sm:$0x1]  ;;  %v366_v46 = vld [vmem:[%s4255_s30 + $0x5b0] sm:$0xff] }
 0x1ef   : > { %v2435_v48 = vsel %vm2239_vm1, %v2434_v45, %v2433_v23  ;;  %v3208_v38 = vperm.slane %v1854_v30, %v4601_v22  ;;  %v1002_v25 = vmul.f32 %v657_v15, %v362_v3  ;;  %v5562_v45 = vperm.slane %v1805_v24, %v4604_v57 }
 0x1f0   : > { %v2685_v63 = vsel %vm2622_vm2, %v2435_v48, %v2432_v34  ;;  %1521 = vadd.xlane.f32.xlu2 %v1000_v7  ;;  %1519 = vadd.xlane.f32.xlu1 %v1518_v4  ;;  %v2359_v7 = vperm.slane %v4879_v20, %v4604_v57  ;;  %v1528_v23 = vsel %vm1082_vm0, %v1003_v2, 0.0  ;;  %v1807_v42 = vsub.f32 0.0, %v4890_v12 }
 0x1f1   : > { %v3210_v26 = vsel %vm2239_vm1, %v3209_v17, %v3208_v38  ;;  %v1412_v31 = vpop.xlane.xlu0 %1411  ;;  %v1806_v15 = vsub.f32 0.0, %v4892_v40  ;;  %v364_v17 = vld [vmem:[%s4255_s30 + $0x5a0] sm:$0xff]  ;;  %v659_v33 = vperm.slane %v535_v52, 0  ;;  %v1005_v48 = vmul.f32 %v658_v29, %v365_v44 }
 0x1f2   : > { %v3453_v10 = vsel %vm2622_vm2, %v3210_v26, %v3207_v41  ;;  %v1856_v6 = vsub.f32 0.0, %v1412_v31  ;;  %v2436_v56 = vperm.slane %v1412_v31, %v4601_v22  ;;  %v3593_v24 = vmul.f32 1.442695, %v3575_v9 }
 0x1f3   : > { %v1417_v27 = vpop.xlane.xlu2 %1416  ;;  %v1415_v39 = vpop.xlane.xlu1 %1414  ;;  %v2362_v26 = vperm.slane %v4890_v12, %v4604_v57  ;;  %v2361_v31 = vperm.slane %v4892_v40, %v4601_v22  ;;  %v3137_v9 = vperm.slane %v1807_v42, %v4604_v57  ;;  %v3136_v52 = vperm.slane %v1806_v15, %v4601_v22 }
 0x1f4   : > { %v1857_v34 = vsub.f32 0.0, %v1415_v39  ;;  %v2437_v30 = vperm.slane %v1415_v39, %v4604_v57  ;;  %v3211_v4 = vperm.slane %v1856_v6, %v4601_v22  ;;  %v1858_v19 = vsub.f32 0.0, %v1417_v27 }
 0x1f5   : > { %v2439_v38 = vperm.slane %v1417_v27, %v4601_v22  ;;  %v536_v6 = vrot.slane %v5481_v37, 4  ;;  %v1533_v40 = vsel %vm1082_vm0, %v1005_v48, 0.0  ;;  %v369_v48 = vld [vmem:[%s4255_s30 + $0x5c8] sm:$0x1]  ;;  %4062 = vpow2.f32 %v3593_v24 }
 0x1f6   : > { %v3212_v53 = vperm.slane %v1857_v34, %v4604_v57  ;;  %1524 = vadd.xlane.f32.xlu0 %v1523_v11  ;;  %v2438_v41 = vsel %vm2239_vm1, %v2437_v30, %v2436_v56  ;;  %v1004_v11 = vmul.f32 %v658_v29, %v364_v17  ;;  %v3135_v13 = vsel %vm2239_vm1, %v5562_v45, %v5547_v8 }
 0x1f7   : > { %v2686_v35 = vsel %vm2624_vm3, %v2438_v41, %v2685_v63  ;;  %v3214_v63 = vperm.slane %v1858_v19, %v4601_v22  ;;  %v660_v19 = vperm.slane %v536_v6, 0  ;;  %v1809_v8 = vsub.f32 0.0, %v4915_v47 }
 0x1f8   : > { %v3213_v18 = vsel %vm2239_vm1, %v3212_v53, %v3211_v4  ;;  %1529 = vadd.xlane.f32.xlu2 %v1528_v23  ;;  %1526 = vadd.xlane.f32.xlu1 %v1002_v25  ;;  %v1006_v25 = vmul.f32 %v659_v33, %v366_v46  ;;  %v2363_v53 = vsel %vm2239_vm1, %v2362_v26, %v2361_v31  ;;  %v537_v46 = vrot.slane %v5481_v37, 5 }
 0x1f9   : > { %v3454_v2 = vsel %vm2624_vm3, %v3213_v18, %v3453_v10  ;;  %v1420_v3 = vpop.xlane.xlu0 %1419  ;;  %v367_v10 = vld [vmem:[%s4255_s30 + $0x5b8] sm:$0x1]  ;;  %v5605_v26 = vsel %vm2239_vm1, %v5551_v50, %v5539_v5  ;;  %v3138_v31 = vsel %vm2239_vm1, %v3137_v9, %v3136_v52  ;;  %v1009_v5 = vmul.f32 %v660_v19, %v369_v48  ;;  %v368_v50 = vld [vmem:[%s4255_s30 + $0x5c0] sm:$0xff] }
 0x1fa   : > { %v1859_v27 = vsub.f32 0.0, %v1420_v3  ;;  %v2440_v39 = vperm.slane %v1420_v3, %v4604_v57  ;;  %v1007_v17 = vmul.f32 %v659_v33, %v367_v10  ;;  %v2360_v33 = vsel %vm2239_vm1, %v2359_v7, %v2358_v43  ;;  %v372_v48 = vld [vmem:[%s4255_s30 + $0x5e0] sm:$0xff] }
 0x1fb   : > { %v1425_v34 = vpop.xlane.xlu2 %1424  ;;  %v1422_v12 = vpop.xlane.xlu1 %1421  ;;  %v5627_v24 = vsel %vm2622_vm2, %v2363_v53, %v2360_v33  ;;  %v5631_v7 = vsel %vm2622_vm2, %v3138_v31, %v3135_v13  ;;  %v661_v9 = vperm.slane %v537_v46, 0  ;;  %v1008_v52 = vmul.f32 %v660_v19, %v368_v50 }
 0x1fc   : > { %v2441_v44 = vsel %vm2239_vm1, %v2440_v39, %v2439_v38  ;;  %v3215_v56 = vperm.slane %v1859_v27, %v4604_v57  ;;  %v1861_v30 = vsub.f32 0.0, %v1425_v34  ;;  %v2443_v23 = vperm.slane %v1425_v34, %v4604_v57  ;;  %v371_v34 = vld [vmem:[%s4255_s30 + $0x5d8] sm:$0x1] }
 0x1fd   : > { %v2687_v29 = vsel %vm2626_vm4, %v2441_v44, %v2686_v35  ;;  %v1860_v4 = vsub.f32 0.0, %v1422_v12  ;;  %v2442_v42 = vperm.slane %v1422_v12, %v4601_v22  ;;  %v2365_v12 = vperm.slane %v4915_v47, %v4604_v57  ;;  %v5643_v44 = vpop.eup %4062 }
 0x1fe   : > { %v3216_v15 = vsel %vm2239_vm1, %v3215_v56, %v3214_v63  ;;  %v3218_v41 = vperm.slane %v1861_v30, %v4604_v57  ;;  %1531 = vadd.xlane.f32.xlu0 %v1004_v11  ;;  %v5621_v63 = vsel %vm2634_vm8, %v5556_v28, %v5489_v16  ;;  %v1538_v11 = vsel %vm1082_vm0, %v1007_v17, 0.0 }
 0x1ff   : > { %v3455_v38 = vsel %vm2626_vm4, %v3216_v15, %v3454_v2  ;;  %v2444_v18 = vsel %vm2239_vm1, %v2443_v23, %v2442_v42  ;;  %v3217_v35 = vperm.slane %v1860_v4, %v4601_v22  ;;  %v538_v16 = vrot.slane %v5481_v37, 6  ;;  %v370_v42 = vld [vmem:[%s4255_s30 + $0x5d0] sm:$0xff] }
 0x200   : > { %v2688_v3 = vsel %vm2628_vm5, %v2444_v18, %v2687_v29  ;;  %1536 = vadd.xlane.f32.xlu2 %v1006_v25  ;;  %1534 = vadd.xlane.f32.xlu1 %v1533_v40  ;;  %v1808_v28 = vsub.f32 0.0, %v4904_v58  ;;  %v1543_v10 = vsel %vm1082_vm0, %v1009_v5, 0.0  ;;  %v2364_v56 = vperm.slane %v4904_v58, %v4601_v22 }
 0x201   : > { %v3219_v2 = vsel %vm2239_vm1, %v3218_v41, %v3217_v35  ;;  %v1427_v6 = vpop.xlane.xlu0 %1426  ;;  %v2367_v47 = vperm.slane %v4913_v14, %v4601_v22  ;;  %v662_v19 = vperm.slane %v538_v16, 0  ;;  %v1011_v53 = vmul.f32 %v661_v9, %v371_v34  ;;  %v373_v16 = vld [vmem:[%s4255_s30 + $0x5e8] sm:$0x1] }
 0x202   : > { %v3456_v20 = vsel %vm2628_vm5, %v3219_v2, %v3455_v38  ;;  %v1862_v43 = vsub.f32 0.0, %v1427_v6  ;;  %v2445_v25 = vperm.slane %v1427_v6, %v4601_v22  ;;  %v1810_v15 = vsub.f32 0.0, %v4913_v14 }
 0x203   : > { %v1432_v27 = vpop.xlane.xlu2 %1431  ;;  %v1430_v39 = vpop.xlane.xlu1 %1429  ;;  %v2366_v38 = vsel %vm2239_vm1, %v2365_v12, %v2364_v56  ;;  %v3140_v18 = vperm.slane %v1809_v8, %v4604_v57  ;;  %v539_v31 = vrot.slane %v5481_v37, 7  ;;  %v1010_v2 = vmul.f32 %v661_v9, %v370_v42  ;;  %v5687_v42 = vld [vmem:[%s4250_s26 + $0x60] sm:$0xff] }
 0x204   : > { %v1863_v45 = vsub.f32 0.0, %v1430_v39  ;;  %v2446_v40 = vperm.slane %v1430_v39, %v4604_v57  ;;  %v3220_v30 = vperm.slane %v1862_v43, %v4601_v22  ;;  %v1864_v23 = vsub.f32 0.0, %v1432_v27 }
 0x205   : > { %v2448_v41 = vperm.slane %v1432_v27, %v4601_v22  ;;  %v1811_v6 = vsub.f32 0.0, %v4924_v36  ;;  %v2368_v5 = vperm.slane %v4924_v36, %v4604_v57  ;;  %v1012_v43 = vmul.f32 %v662_v19, %v372_v48 }
 0x206   : > { %v3221_v29 = vperm.slane %v1863_v45, %v4604_v57  ;;  %1539 = vadd.xlane.f32.xlu0 %v1538_v11  ;;  %v2447_v4 = vsel %vm2239_vm1, %v2446_v40, %v2445_v25  ;;  %v3223_v14 = vperm.slane %v1864_v23, %v4601_v22  ;;  %v663_v36 = vperm.slane %v539_v31, 0  ;;  %v375_v40 = vld [vmem:[%s4255_s30 + $0x5f8] sm:$0x1] }
 0x207   : > { %v2689_v58 = vsel %vm2630_vm6, %v2447_v4, %v2688_v3  ;;  %v3142_v34 = vperm.slane %v1810_v15, %v4601_v22  ;;  %v1013_v23 = vmul.f32 %v662_v19, %v373_v16  ;;  %v2369_v15 = vsel %vm2239_vm1, %v2368_v5, %v2367_v47 }
 0x208   : > { %v3222_v17 = vsel %vm2239_vm1, %v3221_v29, %v3220_v30  ;;  %1544 = vadd.xlane.f32.xlu2 %v1543_v10  ;;  %1541 = vadd.xlane.f32.xlu1 %v1008_v52  ;;  %v3139_v52 = vperm.slane %v1808_v28, %v4601_v22  ;;  %v2665_v29 = vsel %vm2624_vm3, %v2366_v38, %v5627_v24  ;;  %v374_v24 = vld [vmem:[%s4255_s30 + $0x5f0] sm:$0xff]  ;;  %v1813_v48 = vsub.f32 0.0, %v4928_v62 }
 0x209   : > { %v3457_v35 = vsel %vm2630_vm6, %v3222_v17, %v3456_v20  ;;  %v1435_v46 = vpop.xlane.xlu0 %1434  ;;  %v1548_v20 = vsel %vm1082_vm0, %v1011_v53, 0.0  ;;  %v3560_v53 = vand.u32 2147483647, %v5358_v32  ;;  %v1015_v17 = vmul.f32 %v663_v36, %v375_v40  ;;  %v7081_v38 = vld [vmem:[#allocation31_spill] sm:$0xff] }
 0x20a   : > { %v1865_v33 = vsub.f32 0.0, %v1435_v46  ;;  %v2449_v3 = vperm.slane %v1435_v46, %v4604_v57  ;;  %v3141_v28 = vsel %vm2239_vm1, %v3140_v18, %v3139_v52  ;;  %v1812_v18 = vsub.f32 0.0, %v7081_v38 }
 0x20b   : > { %v1440_v50 = vpop.xlane.xlu2 %1439  ;;  %v1437_v13 = vpop.xlane.xlu1 %1436  ;;  %v664_v47 = vperm.slane %v5687_v42, 0  ;;  %v2370_v5 = vperm.slane %v7081_v38, %v4601_v22 }
 0x20c   : > { %v2450_v27 = vsel %vm2239_vm1, %v2449_v3, %v2448_v41  ;;  %v3224_v37 = vperm.slane %v1865_v33, %v4604_v57  ;;  %v1867_v39 = vsub.f32 0.0, %v1440_v50  ;;  %v2452_v11 = vperm.slane %v1440_v50, %v4604_v57 }
 0x20d   : > { %v2690_v9 = vsel %vm2632_vm7, %v2450_v27, %v2689_v58  ;;  %v1866_v8 = vsub.f32 0.0, %v1437_v13  ;;  %v2451_v45 = vperm.slane %v1437_v13, %v4601_v22  ;;  %v3143_v41 = vperm.slane %v1811_v6, %v4604_v57 }
 0x20e   : > { %v3225_v12 = vsel %vm2239_vm1, %v3224_v37, %v3223_v14  ;;  %v3227_v25 = vperm.slane %v1867_v39, %v4604_v57  ;;  %1546 = vadd.xlane.f32.xlu0 %v1010_v2  ;;  %v1553_v33 = vsel %vm1082_vm0, %v1013_v23, 0.0  ;;  %v540_v3 = vrot.slane %v5687_v42, 1 }
 0x20f   : > { %v3458_v10 = vsel %vm2632_vm7, %v3225_v12, %v3457_v35  ;;  %v2453_v56 = vsel %vm2239_vm1, %v2452_v11, %v2451_v45  ;;  %v3226_v30 = vperm.slane %v1866_v8, %v4601_v22  ;;  %v2371_v6 = vperm.slane %v4928_v62, %v4604_v57 }
 0x210   : > { %v2691_v4 = vsel %vm2634_vm8, %v2453_v56, %v2690_v9  ;;  %1551 = vadd.xlane.f32.xlu2 %v1012_v43  ;;  %1549 = vadd.xlane.f32.xlu1 %v1548_v20  ;;  %v1014_v13 = vmul.f32 %v663_v36, %v374_v24  ;;  %v377_v43 = vld [vmem:[%s4255_s30 + $0x608] sm:$0x1]  ;;  %v3144_v20 = vsel %vm2239_vm1, %v3143_v41, %v3142_v34  ;;  %v1558_v39 = vsel %vm1082_vm0, %v1015_v17, 0.0  ;;  %v376_v36 = vld [vmem:[%s4255_s30 + $0x600] sm:$0xff] }
 0x211   : > { %v3228_v58 = vsel %vm2239_vm1, %v3227_v25, %v3226_v30  ;;  %v1442_v19 = vpop.xlane.xlu0 %1441  ;;  %v3146_v11 = vperm.slane %v1813_v48, %v4604_v57  ;;  %v3145_v8 = vperm.slane %v1812_v18, %v4601_v22  ;;  %v665_v52 = vperm.slane %v540_v3, 0  ;;  %v379_v18 = vld [vmem:[%s4255_s30 + $0x618] sm:$0x1]  ;;  %v7082_v3 = vld [vmem:[#allocation32_spill] sm:$0xff] }
 0x212   : > { %v1868_v35 = vsub.f32 0.0, %v1442_v19  ;;  %v3459_v46 = vsel %vm2634_vm8, %v3228_v58, %v3458_v10  ;;  %v2454_v27 = vperm.slane %v1442_v19, %v4601_v22  ;;  %v1017_v34 = vmul.f32 %v664_v47, %v377_v43  ;;  %v378_v10 = vld [vmem:[%s4255_s30 + $0x610] sm:$0xff]  ;;  %v381_v43 = vld [vmem:[%s4255_s30 + $0x628] sm:$0x1] }
 0x213   : > { %v1447_v31 = vpop.xlane.xlu2 %1446  ;;  %v1445_v14 = vpop.xlane.xlu1 %1444  ;;  %v5702_v2 = vsel %vm1723_vm9, %v2691_v4, %v3459_v46  ;;  %v3433_v12 = vsel %vm2624_vm3, %v3141_v28, %v5631_v7  ;;  %v3576_v56 = vsub.f32 0.0, %v3560_v53  ;;  %v2666_v30 = vsel %vm2626_vm4, %v2369_v15, %v2665_v29 }
 0x214   : > { %v1869_v50 = vsub.f32 0.0, %v1445_v14  ;;  %v2455_v37 = vperm.slane %v1445_v14, %v4604_v57  ;;  %v3229_v62 = vperm.slane %v1868_v35, %v4601_v22  ;;  %v1870_v16 = vsub.f32 0.0, %v1447_v31 }
 0x215   : > { %v2457_v25 = vperm.slane %v1447_v31, %v4601_v22  ;;  %v3434_v23 = vsel %vm2626_vm4, %v3144_v20, %v3433_v12  ;;  %v541_v41 = vrot.slane %v5687_v42, 2  ;;  %v3431_v7 = vsel %vm2634_vm8, %v5605_v26, %v5536_v55 }
 0x216   : > { %v3230_v9 = vperm.slane %v1869_v50, %v4604_v57  ;;  %1554 = vadd.xlane.f32.xlu0 %v1553_v33  ;;  %v2456_v45 = vsel %vm2239_vm1, %v2455_v37, %v2454_v27  ;;  %v3232_v28 = vperm.slane %v1870_v16, %v4601_v22  ;;  %v1016_v17 = vmul.f32 %v664_v47, %v376_v36 }
 0x217   : > { %v2372_v53 = vsel %vm2239_vm1, %v2371_v6, %v2370_v5  ;;  %v3147_v24 = vsel %vm2239_vm1, %v3146_v11, %v3145_v8  ;;  %v1018_v48 = vmul.f32 %v665_v52, %v378_v10  ;;  %v1563_v38 = vsel %vm1082_vm0, %v1017_v34, 0.0  ;;  %v7084_v10 = vld [vmem:[#allocation34_spill] sm:$0xff] }
 0x218   : > { %v3231_v40 = vsel %vm2239_vm1, %v3230_v9, %v3229_v62  ;;  %1559 = vadd.xlane.f32.xlu2 %v1558_v39  ;;  %1556 = vadd.xlane.f32.xlu1 %v1014_v13  ;;  %v666_v47 = vperm.slane %v541_v41, 0  ;;  %v1814_v6 = vsub.f32 0.0, %v7082_v3  ;;  %v1019_v13 = vmul.f32 %v665_v52, %v379_v18 }
 0x219   : > { %v1450_v4 = vpop.xlane.xlu0 %1449  ;;  %v542_v39 = vrot.slane %v5687_v42, 3  ;;  %v5750_v11 = vsel %vm2628_vm5, %v2372_v53, %v2666_v30  ;;  %v5756_v16 = vsel %vm1723_vm9, %v5621_v63, %v3431_v7  ;;  %v3595_v9 = vmul.f32 1.442695, %v3576_v56 }
 0x21a   : > { %v1871_v58 = vsub.f32 0.0, %v1450_v4  ;;  %v2458_v19 = vperm.slane %v1450_v4, %v4604_v57  ;;  %v5759_v8 = vsel %vm2628_vm5, %v3147_v24, %v3434_v23  ;;  %v1021_v12 = vmul.f32 %v666_v47, %v381_v43 }
 0x21b   : > { %v1455_v29 = vpop.xlane.xlu2 %1454  ;;  %v1452_v15 = vpop.xlane.xlu1 %1451  ;;  %v1815_v30 = vsub.f32 0.0, %v7084_v10  ;;  %v3148_v56 = vperm.slane %v1814_v6, %v4601_v22  ;;  %v1568_v7 = vsel %vm1082_vm0, %v1019_v13, 0.0  ;;  %v384_v13 = vld [vmem:[%s4255_s30 + $0x640] sm:$0xff]  ;;  %4064 = vpow2.f32 %v3595_v9 }
 0x21c   : > { %v2459_v35 = vsel %vm2239_vm1, %v2458_v19, %v2457_v25  ;;  %v3233_v55 = vperm.slane %v1871_v58, %v4604_v57  ;;  %v1873_v26 = vsub.f32 0.0, %v1455_v29  ;;  %v2461_v46 = vperm.slane %v1455_v29, %v4604_v57  ;;  %v380_v25 = vld [vmem:[%s4255_s30 + $0x620] sm:$0xff]  ;;  %v383_v29 = vld [vmem:[%s4255_s30 + $0x638] sm:$0x1] }
 0x21d   : > { %v2692_v31 = vsel %vm2622_vm2, %v2459_v35, %v2456_v45  ;;  %v1872_v14 = vsub.f32 0.0, %v1452_v15  ;;  %v2460_v33 = vperm.slane %v1452_v15, %v4601_v22  ;;  %v7083_v45 = vld [vmem:[#allocation33_spill] sm:$0xff]  ;;  %v543_v58 = vrot.slane %v5687_v42, 4 }
 0x21e   : > { %v3234_v5 = vsel %vm2239_vm1, %v3233_v55, %v3232_v28  ;;  %v3236_v50 = vperm.slane %v1873_v26, %v4604_v57  ;;  %1561 = vadd.xlane.f32.xlu0 %v1016_v17  ;;  %v1816_v36 = vsub.f32 0.0, %v7083_v45  ;;  %v667_v28 = vperm.slane %v542_v39, 0 }
 0x21f   : > { %v3460_v20 = vsel %vm2622_vm2, %v3234_v5, %v3231_v40  ;;  %v2462_v27 = vsel %vm2239_vm1, %v2461_v46, %v2460_v33  ;;  %v3235_v37 = vperm.slane %v1872_v14, %v4601_v22  ;;  %v2373_v40 = vperm.slane %v7082_v3, %v4601_v22  ;;  %v382_v33 = vld [vmem:[%s4255_s30 + $0x630] sm:$0xff] }
 0x220   : > { %v2693_v62 = vsel %vm2624_vm3, %v2462_v27, %v2692_v31  ;;  %1566 = vadd.xlane.f32.xlu2 %v1018_v48  ;;  %1564 = vadd.xlane.f32.xlu1 %v1563_v38  ;;  %v2376_v19 = vperm.slane %v7083_v45, %v4601_v22  ;;  %v2374_v17 = vperm.slane %v7084_v10, %v4604_v57  ;;  %v1573_v18 = vsel %vm1082_vm0, %v1021_v12, 0.0  ;;  %v385_v10 = vld [vmem:[%s4255_s30 + $0x648] sm:$0x1] }
 0x221   : > { %v3237_v52 = vsel %vm2239_vm1, %v3236_v50, %v3235_v37  ;;  %v1457_v34 = vpop.xlane.xlu0 %1456  ;;  %v1020_v24 = vmul.f32 %v666_v47, %v380_v25  ;;  %v5777_v15 = vperm.slane %v1816_v36, %v4601_v22  ;;  %v3149_v35 = vperm.slane %v1815_v30, %v4604_v57 }
 0x222   : > { %v3461_v63 = vsel %vm2624_vm3, %v3237_v52, %v3460_v20  ;;  %v1874_v4 = vsub.f32 0.0, %v1457_v34  ;;  %v2463_v48 = vperm.slane %v1457_v34, %v4601_v22  ;;  %v2377_v31 = vperm.slane %v4997_v0, %v4604_v57 }
 0x223   : > { %v1462_v23 = vpop.xlane.xlu2 %1461  ;;  %v1460_v41 = vpop.xlane.xlu1 %1459  ;;  %v668_v47 = vperm.slane %v543_v58, 0  ;;  %v1023_v3 = vmul.f32 %v667_v28, %v383_v29  ;;  %v2375_v43 = vsel %vm2239_vm1, %v2374_v17, %v2373_v40  ;;  %v1817_v20 = vsub.f32 0.0, %v4997_v0  ;;  %v387_v29 = vld [vmem:[%s4255_s30 + $0x658] sm:$0x1] }
 0x224   : > { %v1875_v53 = vsub.f32 0.0, %v1460_v41  ;;  %v2464_v38 = vperm.slane %v1460_v41, %v4604_v57  ;;  %v3238_v55 = vperm.slane %v1874_v4, %v4601_v22  ;;  %v1876_v26 = vsub.f32 0.0, %v1462_v23  ;;  %v5808_v58 = vpop.eup %4064 }
 0x225   : > { %v2466_v6 = vperm.slane %v1462_v23, %v4601_v22  ;;  %v544_v39 = vrot.slane %v5687_v42, 5  ;;  %v1022_v52 = vmul.f32 %v667_v28, %v382_v33  ;;  %v3150_v34 = vsel %vm2239_vm1, %v3149_v35, %v3148_v56 }
 0x226   : > { %v3239_v46 = vperm.slane %v1875_v53, %v4604_v57  ;;  %1569 = vadd.xlane.f32.xlu0 %v1568_v7  ;;  %v2465_v14 = vsel %vm2239_vm1, %v2464_v38, %v2463_v48  ;;  %v3241_v45 = vperm.slane %v1876_v26, %v4601_v22  ;;  %v2378_v9 = vsel %vm2239_vm1, %v2377_v31, %v2376_v19 }
 0x227   : > { %v2694_v5 = vsel %vm2626_vm4, %v2465_v14, %v2693_v62  ;;  %v1024_v40 = vmul.f32 %v668_v47, %v384_v13  ;;  %v1578_v0 = vsel %vm1082_vm0, %v1023_v3, 0.0  ;;  %v669_v28 = vperm.slane %v544_v39, 0 }
 0x228   : > { %v3240_v50 = vsel %vm2239_vm1, %v3239_v46, %v3238_v55  ;;  %1574 = vadd.xlane.f32.xlu2 %v1573_v18  ;;  %1571 = vadd.xlane.f32.xlu1 %v1020_v24  ;;  %v3152_v19 = vperm.slane %v1817_v20, %v4604_v57  ;;  %v1025_v24 = vmul.f32 %v668_v47, %v385_v10  ;;  %v545_v35 = vrot.slane %v5687_v42, 6  ;;  %v7085_v46 = vld [vmem:[#allocation35_spill] sm:$0xff] }
 0x229   : > { %v3462_v27 = vsel %vm2626_vm4, %v3240_v50, %v3461_v63  ;;  %v1465_v37 = vpop.xlane.xlu0 %1464  ;;  %v1819_v55 = vsub.f32 0.0, %v5009_v51  ;;  %v2380_v26 = vperm.slane %v5009_v51, %v4604_v57  ;;  %v2379_v31 = vperm.slane %v7085_v46, %v4601_v22  ;;  %v386_v50 = vld [vmem:[%s4255_s30 + $0x650] sm:$0xff] }
 0x22a   : > { %v1877_v36 = vsub.f32 0.0, %v1465_v37  ;;  %v2467_v62 = vperm.slane %v1465_v37, %v4604_v57  ;;  %v2668_v33 = vsel %vm2630_vm6, %v2375_v43, %v5750_v11  ;;  %v1818_v47 = vsub.f32 0.0, %v7085_v46 }
 0x22b   : > { %v1470_v12 = vpop.xlane.xlu2 %1469  ;;  %v1467_v25 = vpop.xlane.xlu1 %1466  ;;  %v3436_v51 = vsel %vm2630_vm6, %v3150_v34, %v5759_v8  ;;  %v2669_v13 = vsel %vm2632_vm7, %v2378_v9, %v2668_v33  ;;  %v3153_v37 = vsel %vm2239_vm1, %v3152_v19, %v5777_v15  ;;  %v1583_v39 = vsel %vm1082_vm0, %v1025_v24, 0.0  ;;  %v389_v9 = vld [vmem:[%s4255_s30 + $0x668] sm:$0x1] }
 0x22c   : > { %v2468_v30 = vsel %vm2239_vm1, %v2467_v62, %v2466_v6  ;;  %v3242_v63 = vperm.slane %v1877_v36, %v4604_v57  ;;  %v1879_v4 = vsub.f32 0.0, %v1470_v12  ;;  %v2470_v23 = vperm.slane %v1470_v12, %v4604_v57  ;;  %v5868_v33 = vld [vmem:[%s4250_s26 + $0x68] sm:$0xff] }
 0x22d   : > { %v2695_v41 = vsel %vm2628_vm5, %v2468_v30, %v2694_v5  ;;  %v1878_v7 = vsub.f32 0.0, %v1467_v25  ;;  %v2469_v56 = vperm.slane %v1467_v25, %v4601_v22  ;;  %v1027_v5 = vmul.f32 %v669_v28, %v387_v29  ;;  %v7086_v29 = vld [vmem:[#allocation6_spill] sm:$0xff] }
 0x22e   : > { %v3243_v17 = vsel %vm2239_vm1, %v3242_v63, %v3241_v45  ;;  %v3245_v53 = vperm.slane %v1879_v4, %v4604_v57  ;;  %1576 = vadd.xlane.f32.xlu0 %v1022_v52  ;;  %v670_v45 = vperm.slane %v545_v35, 0  ;;  %v546_v36 = vrot.slane %v5687_v42, 7  ;;  %v388_v4 = vld [vmem:[%s4255_s30 + $0x660] sm:$0xff] }
 0x22f   : > { %v3463_v48 = vsel %vm2628_vm5, %v3243_v17, %v3462_v27  ;;  %v2471_v38 = vsel %vm2239_vm1, %v2470_v23, %v2469_v56  ;;  %v3244_v18 = vperm.slane %v1878_v7, %v4601_v22  ;;  %v3155_v62 = vperm.slane %v1819_v55, %v4604_v57  ;;  %v390_v17 = vld [vmem:[%s4255_s30 + $0x670] sm:$0xff] }
 0x230   : > { %v2696_v14 = vsel %vm2630_vm6, %v2471_v38, %v2695_v41  ;;  %1581 = vadd.xlane.f32.xlu2 %v1024_v40  ;;  %1579 = vadd.xlane.f32.xlu1 %v1578_v0  ;;  %v2381_v8 = vsel %vm2239_vm1, %v2380_v26, %v2379_v31  ;;  %v1026_v34 = vmul.f32 %v669_v28, %v386_v50  ;;  %v1588_v40 = vsel %vm1082_vm0, %v1027_v5, 0.0  ;;  %v7087_v38 = vld [vmem:[#allocation7_spill] sm:$0xff] }
 0x231   : > { %v3246_v3 = vsel %vm2239_vm1, %v3245_v53, %v3244_v18  ;;  %v1472_v6 = vpop.xlane.xlu0 %1471  ;;  %v3154_v12 = vperm.slane %v1818_v47, %v4601_v22  ;;  %v5847_v30 = vsel %vm2632_vm7, %v3153_v37, %v3436_v51  ;;  %v671_v23 = vperm.slane %v546_v36, 0 }
 0x232   : > { %v3464_v20 = vsel %vm2630_vm6, %v3246_v3, %v3463_v48  ;;  %v1880_v27 = vsub.f32 0.0, %v1472_v6  ;;  %v2472_v25 = vperm.slane %v1472_v6, %v4601_v22  ;;  %v1029_v41 = vmul.f32 %v670_v45, %v389_v9  ;;  %v7088_v3 = vld [vmem:[#allocation8_spill] sm:$0xff] }
 0x233   : > { %v1477_v11 = vpop.xlane.xlu2 %1476  ;;  %v1475_v43 = vpop.xlane.xlu1 %1474  ;;  %v5852_v7 = vsel %vm2634_vm8, %v2381_v8, %v2669_v13  ;;  %v5859_v53 = vadd.f32 1.0, %v5643_v44  ;;  %v3156_v24 = vsel %vm2239_vm1, %v3155_v62, %v3154_v12  ;;  %v1820_v48 = vsub.f32 0.0, %v7086_v29  ;;  %v393_v12 = vld [vmem:[%s4255_s30 + $0x688] sm:$0x1] }
 0x234   : > { %v1881_v52 = vsub.f32 0.0, %v1475_v43  ;;  %v2473_v15 = vperm.slane %v1475_v43, %v4604_v57  ;;  %v3247_v0 = vperm.slane %v1880_v27, %v4601_v22  ;;  %v1882_v42 = vsub.f32 0.0, %v1477_v11 }
 0x235   : > { %v2475_v56 = vperm.slane %v1477_v11, %v4601_v22  ;;  %v1822_v18 = vsub.f32 0.0, %v7087_v38  ;;  %v2385_v47 = vperm.slane %v7087_v38, %v4601_v22  ;;  %v1821_v6 = vsub.f32 0.0, %v7088_v3  ;;  %v392_v38 = vld [vmem:[%s4255_s30 + $0x680] sm:$0xff] }
 0x236   : > { %v3248_v10 = vperm.slane %v1881_v52, %v4604_v57  ;;  %1584 = vadd.xlane.f32.xlu0 %v1583_v39  ;;  %v2474_v63 = vsel %vm2239_vm1, %v2473_v15, %v2472_v25  ;;  %v3250_v26 = vperm.slane %v1882_v42, %v4601_v22  ;;  %v1030_v51 = vmul.f32 %v671_v23, %v390_v17 }
 0x237   : > { %v2697_v28 = vsel %vm2632_vm7, %v2474_v63, %v2696_v14  ;;  %v1028_v14 = vmul.f32 %v670_v45, %v388_v4  ;;  %v1593_v13 = vsel %vm1082_vm0, %v1029_v41, 0.0  ;;  %v672_v62 = vperm.slane %v5868_v33, 0 }
 0x238   : > { %v3249_v19 = vsel %vm2239_vm1, %v3248_v10, %v3247_v0  ;;  %1589 = vadd.xlane.f32.xlu2 %v1588_v40  ;;  %1586 = vadd.xlane.f32.xlu1 %v1026_v34  ;;  %v2383_v8 = vperm.slane %v7088_v3, %v4604_v57  ;;  %v547_v40 = vrot.slane %v5868_v33, 1  ;;  %v3158_v42 = vperm.slane %v1821_v6, %v4604_v57  ;;  %v7089_v10 = vld [vmem:[#allocation9_spill] sm:$0xff] }
 0x239   : > { %v3465_v35 = vsel %vm2632_vm7, %v3249_v19, %v3464_v20  ;;  %v1480_v55 = vpop.xlane.xlu0 %1479  ;;  %v391_v20 = vld [vmem:[%s4255_s30 + $0x678] sm:$0x1]  ;;  %v2386_v63 = vperm.slane %v7089_v10, %v4604_v57  ;;  %v5894_v4 = vadd.f32 1.0, %v5808_v58  ;;  %v2382_v41 = vperm.slane %v7086_v29, %v4601_v22 }
 0x23a   : > { %v1883_v46 = vsub.f32 0.0, %v1480_v55  ;;  %v2476_v31 = vperm.slane %v1480_v55, %v4604_v57  ;;  %v1031_v9 = vmul.f32 %v671_v23, %v391_v20  ;;  %v1033_v17 = vmul.f32 %v672_v62, %v393_v12 }
 0x23b   : > { %v1485_v5 = vpop.xlane.xlu2 %1484  ;;  %v1482_v50 = vpop.xlane.xlu1 %1481  ;;  %v3160_v55 = vperm.slane %v1822_v18, %v4601_v22  ;;  %v673_v6 = vperm.slane %v547_v40, 0  ;;  %v396_v40 = vld [vmem:[%s4255_s30 + $0x6a0] sm:$0xff] }
 0x23c   : > { %v2477_v27 = vsel %vm2239_vm1, %v2476_v31, %v2475_v56  ;;  %v3251_v37 = vperm.slane %v1883_v46, %v4604_v57  ;;  %v1885_v11 = vsub.f32 0.0, %v1485_v5  ;;  %v2479_v43 = vperm.slane %v1485_v5, %v4604_v57 }
 0x23d   : > { %v2698_v39 = vsel %vm2634_vm8, %v2477_v27, %v2697_v28  ;;  %v1884_v45 = vsub.f32 0.0, %v1482_v50  ;;  %v2478_v36 = vperm.slane %v1482_v50, %v4601_v22  ;;  %v1823_v56 = vsub.f32 0.0, %v7089_v10 }
 0x23e   : > { %v3252_v52 = vsel %vm2239_vm1, %v3251_v37, %v3250_v26  ;;  %v3254_v34 = vperm.slane %v1885_v11, %v4604_v57  ;;  %1591 = vadd.xlane.f32.xlu0 %v1028_v14  ;;  %v5909_v46 = vsel %vm2634_vm8, %v3156_v24, %v5847_v30  ;;  %v5912_v31 = vsel %vm2239_vm1, %v2383_v8, %v2382_v41  ;;  %v395_v30 = vld [vmem:[%s4255_s30 + $0x698] sm:$0x1]  ;;  %v7090_v37 = vld [vmem:[#allocation10_spill] sm:$0xff] }
 0x23f   : > { %v2480_v25 = vsel %vm2239_vm1, %v2479_v43, %v2478_v36  ;;  %v3253_v15 = vperm.slane %v1884_v45, %v4601_v22  ;;  %v3466_v0 = vsel %vm2634_vm8, %v3252_v52, %v3465_v35  ;;  %v3157_v35 = vperm.slane %v1820_v48, %v4601_v22  ;;  %v394_v8 = vld [vmem:[%s4255_s30 + $0x690] sm:$0xff] }
 0x240   : > { %1596 = vadd.xlane.f32.xlu2 %v1030_v51  ;;  %1594 = vadd.xlane.f32.xlu1 %v1593_v13  ;;  %v5898_v23 = vsel %vm1723_vm9, %v2698_v39, %v3466_v0  ;;  %v1598_v3 = vsel %vm1082_vm0, %v1031_v9, 0.0  ;;  %v548_v5 = vrot.slane %v5868_v33, 2  ;;  %v2387_v48 = vsel %vm2239_vm1, %v2386_v63, %v2385_v47  ;;  %v7091_v47 = vld [vmem:[#allocation11_spill] sm:$0xff] }
 0x241   : > { %v3255_v28 = vsel %vm2239_vm1, %v3254_v34, %v3253_v15  ;;  %v1487_v19 = vpop.xlane.xlu0 %1486  ;;  %v5917_v50 = vsel %vm2239_vm1, %v3158_v42, %v3157_v35  ;;  %v1032_v51 = vmul.f32 %v672_v62, %v392_v38  ;;  %v3161_v24 = vperm.slane %v1823_v56, %v4604_v57 }
 0x242   : > { %v1886_v26 = vsub.f32 0.0, %v1487_v19  ;;  %v2481_v13 = vperm.slane %v1487_v19, %v4601_v22  ;;  %v1603_v27 = vsel %vm1082_vm0, %v1033_v17, 0.0  ;;  %v1825_v11 = vsub.f32 0.0, %v7090_v37 }
 0x243   : > { %v1492_v29 = vpop.xlane.xlu2 %1491  ;;  %v1490_v14 = vpop.xlane.xlu1 %1489  ;;  %v1824_v36 = vsub.f32 0.0, %v7091_v47  ;;  %v674_v52 = vperm.slane %v548_v5, 0  ;;  %v1035_v34 = vmul.f32 %v673_v6, %v395_v30  ;;  %v3561_v0 = vand.u32 2147483647, %v5756_v16 }
 0x244   : > { %v1887_v18 = vsub.f32 0.0, %v1490_v14  ;;  %v2482_v20 = vperm.slane %v1490_v14, %v4604_v57  ;;  %v3256_v43 = vperm.slane %v1886_v26, %v4601_v22  ;;  %v1888_v39 = vsub.f32 0.0, %v1492_v29 }
 0x245   : > { %v2484_v9 = vperm.slane %v1492_v29, %v4601_v22  ;;  %v2389_v42 = vperm.slane %v7090_v37, %v4604_v57  ;;  %v2388_v10 = vperm.slane %v7091_v47, %v4601_v22  ;;  %v549_v56 = vrot.slane %v5868_v33, 3  ;;  %v399_v47 = vld [vmem:[%s4255_s30 + $0x6b8] sm:$0x1] }
 0x246   : > { %v3257_v45 = vperm.slane %v1887_v18, %v4604_v57  ;;  %1599 = vadd.xlane.f32.xlu0 %v1598_v3  ;;  %v2483_v62 = vsel %vm2239_vm1, %v2482_v20, %v2481_v13  ;;  %v1034_v38 = vmul.f32 %v673_v6, %v394_v8  ;;  %v3164_v35 = vperm.slane %v1825_v11, %v4604_v57 }
 0x247   : > { %v2699_v12 = vsel %vm2622_vm2, %v2483_v62, %v2480_v25  ;;  %v3259_v25 = vperm.slane %v1888_v39, %v4601_v22  ;;  %v3163_v26 = vperm.slane %v1824_v36, %v4601_v22  ;;  %v1036_v3 = vmul.f32 %v674_v52, %v396_v40 }
 0x248   : > { %v3258_v15 = vsel %vm2239_vm1, %v3257_v45, %v3256_v43  ;;  %1604 = vadd.xlane.f32.xlu2 %v1603_v27  ;;  %1601 = vadd.xlane.f32.xlu1 %v1032_v51  ;;  %v1608_v5 = vsel %vm1082_vm0, %v1035_v34, 0.0  ;;  %v675_v37 = vperm.slane %v549_v56, 0  ;;  %v3162_v11 = vsel %vm2239_vm1, %v3161_v24, %v3160_v55  ;;  %v398_v56 = vld [vmem:[%s4255_s30 + $0x6b0] sm:$0xff] }
 0x249   : > { %v3467_v63 = vsel %vm2622_vm2, %v3258_v15, %v3255_v28  ;;  %v1495_v41 = vpop.xlane.xlu0 %1494  ;;  %v397_v28 = vld [vmem:[%s4255_s30 + $0x6a8] sm:$0x1]  ;;  %v550_v34 = vrot.slane %v5868_v33, 4  ;;  %v2390_v55 = vsel %vm2239_vm1, %v2389_v42, %v2388_v10  ;;  %v3165_v15 = vsel %vm2239_vm1, %v3164_v35, %v3163_v26 }
 0x24a   : > { %v1889_v19 = vsub.f32 0.0, %v1495_v41  ;;  %v2485_v17 = vperm.slane %v1495_v41, %v4604_v57  ;;  %v1037_v45 = vmul.f32 %v674_v52, %v397_v28  ;;  %v5965_v52 = vsub.f32 0.0, %v3561_v0 }
 0x24b   : > { %v1500_v29 = vpop.xlane.xlu2 %1499  ;;  %v1497_v14 = vpop.xlane.xlu1 %1496  ;;  %v1039_v41 = vmul.f32 %v675_v37, %v399_v47  ;;  %v5978_v0 = vsel %vm1723_vm9, %v5852_v7, %v5909_v46  ;;  %v551_v35 = vrot.slane %v5868_v33, 5  ;;  %v1038_v7 = vmul.f32 %v675_v37, %v398_v56  ;;  %v401_v46 = vld [vmem:[%s4255_s30 + $0x6c8] sm:$0x1] }
 0x24c   : > { %v2486_v18 = vsel %vm2239_vm1, %v2485_v17, %v2484_v9  ;;  %v3260_v51 = vperm.slane %v1889_v19, %v4604_v57  ;;  %v1891_v30 = vsub.f32 0.0, %v1500_v29  ;;  %v2488_v13 = vperm.slane %v1500_v29, %v4604_v57 }
 0x24d   : > { %v2700_v6 = vsel %vm2624_vm3, %v2486_v18, %v2699_v12  ;;  %v1890_v20 = vsub.f32 0.0, %v1497_v14  ;;  %v2487_v27 = vperm.slane %v1497_v14, %v4601_v22  ;;  %v2671_v9 = vsel %vm2622_vm2, %v2387_v48, %v5912_v31  ;;  %v7092_v31 = vld [vmem:[#allocation13_spill] sm:$0xff] }
 0x24e   : > { %v3261_v43 = vsel %vm2239_vm1, %v3260_v51, %v3259_v25  ;;  %v3263_v39 = vperm.slane %v1891_v30, %v4604_v57  ;;  %1606 = vadd.xlane.f32.xlu0 %v1034_v38  ;;  %v3439_v12 = vsel %vm2622_vm2, %v3162_v11, %v5917_v50  ;;  %v1826_v48 = vsub.f32 0.0, %v7092_v31  ;;  %v400_v11 = vld [vmem:[%s4255_s30 + $0x6c0] sm:$0xff] }
 0x24f   : > { %v3468_v36 = vsel %vm2624_vm3, %v3261_v43, %v3467_v63  ;;  %v2489_v62 = vsel %vm2239_vm1, %v2488_v13, %v2487_v27  ;;  %v3262_v8 = vperm.slane %v1890_v20, %v4601_v22  ;;  %v5981_v50 = vsel %vm2624_vm3, %v2390_v55, %v2671_v9 }
 0x250   : > { %v2701_v24 = vsel %vm2626_vm4, %v2489_v62, %v2700_v6  ;;  %1611 = vadd.xlane.f32.xlu2 %v1036_v3  ;;  %1609 = vadd.xlane.f32.xlu1 %v1608_v5  ;;  %v1613_v17 = vsel %vm1082_vm0, %v1037_v45, 0.0  ;;  %v676_v38 = vperm.slane %v550_v34, 0  ;;  %v5986_v26 = vsel %vm2624_vm3, %v3165_v15, %v3439_v12  ;;  %v7093_v3 = vld [vmem:[#allocation14_spill] sm:$0xff]  ;;  %v7094_v45 = vld [vmem:[#allocation15_spill] sm:$0xff] }
 0x251   : > { %v3264_v40 = vsel %vm2239_vm1, %v3263_v39, %v3262_v8  ;;  %v1502_v63 = vpop.xlane.xlu0 %1501  ;;  %v2391_v29 = vperm.slane %v7092_v31, %v4601_v22  ;;  %v1827_v5 = vsub.f32 0.0, %v7093_v3  ;;  %v1618_v51 = vsel %vm1082_vm0, %v1039_v41, 0.0  ;;  %v402_v34 = vld [vmem:[%s4255_s30 + $0x6d0] sm:$0xff] }
 0x252   : > { %v3469_v42 = vsel %vm2626_vm4, %v3264_v40, %v3468_v36  ;;  %v1892_v10 = vsub.f32 0.0, %v1502_v63  ;;  %v2490_v28 = vperm.slane %v1502_v63, %v4601_v22  ;;  %v3166_v30 = vperm.slane %v1826_v48, %v4601_v22  ;;  %v7095_v48 = vld [vmem:[#allocation16_spill] sm:$0xff] }
 0x253   : > { %v1507_v25 = vpop.xlane.xlu2 %1506  ;;  %v1505_v19 = vpop.xlane.xlu1 %1504  ;;  %v2392_v27 = vperm.slane %v7093_v3, %v4604_v57  ;;  %v677_v43 = vperm.slane %v551_v35, 0  ;;  %v1041_v39 = vmul.f32 %v676_v38, %v401_v46  ;;  %v1828_v47 = vsub.f32 0.0, %v7094_v45  ;;  %v403_v3 = vld [vmem:[%s4255_s30 + $0x6d8] sm:$0x1] }
 0x254   : > { %v1893_v14 = vsub.f32 0.0, %v1505_v19  ;;  %v2491_v18 = vperm.slane %v1505_v19, %v4604_v57  ;;  %v3265_v13 = vperm.slane %v1892_v10, %v4601_v22  ;;  %v1894_v6 = vsub.f32 0.0, %v1507_v25 }
 0x255   : > { %v2493_v36 = vperm.slane %v1507_v25, %v4601_v22  ;;  %v2394_v9 = vperm.slane %v7094_v45, %v4601_v22  ;;  %v3167_v55 = vperm.slane %v1827_v5, %v4604_v57  ;;  %v552_v40 = vrot.slane %v5868_v33, 6 }
 0x256   : > { %v3266_v20 = vperm.slane %v1893_v14, %v4604_v57  ;;  %1614 = vadd.xlane.f32.xlu0 %v1613_v17  ;;  %v2492_v37 = vsel %vm2239_vm1, %v2491_v18, %v2490_v28  ;;  %v3268_v63 = vperm.slane %v1894_v6, %v4601_v22  ;;  %v1040_v56 = vmul.f32 %v676_v38, %v400_v11 }
 0x257   : > { %v2702_v62 = vsel %vm2628_vm5, %v2492_v37, %v2701_v24  ;;  %v2393_v31 = vsel %vm2239_vm1, %v2392_v27, %v2391_v29  ;;  %v2395_v10 = vperm.slane %v7095_v48, %v4604_v57  ;;  %v1042_v17 = vmul.f32 %v677_v43, %v402_v34 }
 0x258   : > { %v3267_v8 = vsel %vm2239_vm1, %v3266_v20, %v3265_v13  ;;  %1619 = vadd.xlane.f32.xlu2 %v1618_v51  ;;  %1616 = vadd.xlane.f32.xlu1 %v1038_v7  ;;  %v678_v28 = vperm.slane %v552_v40, 0  ;;  %v3168_v18 = vsel %vm2239_vm1, %v3167_v55, %v3166_v30  ;;  %v1829_v51 = vsub.f32 0.0, %v7095_v48  ;;  %v405_v20 = vld [vmem:[%s4255_s30 + $0x6e8] sm:$0x1] }
 0x259   : > { %v3470_v12 = vsel %vm2628_vm5, %v3267_v8, %v3469_v42  ;;  %v1510_v15 = vpop.xlane.xlu0 %1509  ;;  %v1623_v42 = vsel %vm1082_vm0, %v1041_v39, 0.0  ;;  %v1043_v39 = vmul.f32 %v677_v43, %v403_v3  ;;  %v3169_v45 = vperm.slane %v1828_v47, %v4601_v22 }
 0x25a   : > { %v1895_v41 = vsub.f32 0.0, %v1510_v15  ;;  %v2494_v24 = vperm.slane %v1510_v15, %v4604_v57  ;;  %v2673_v30 = vsel %vm2626_vm4, %v2393_v31, %v5981_v50  ;;  %v2396_v8 = vsel %vm2239_vm1, %v2395_v10, %v2394_v9  ;;  %v404_v15 = vld [vmem:[%s4255_s30 + $0x6e0] sm:$0xff] }
 0x25b   : > { %v1515_v25 = vpop.xlane.xlu2 %1514  ;;  %v1512_v19 = vpop.xlane.xlu1 %1511  ;;  %v553_v43 = vrot.slane %v5868_v33, 7  ;;  %v3441_v47 = vsel %vm2626_vm4, %v3168_v18, %v5986_v26  ;;  %v3170_v50 = vperm.slane %v1829_v51, %v4604_v57  ;;  %v2398_v9 = vperm.slane %v5192_v61, %v4604_v57 }
 0x25c   : > { %v2495_v35 = vsel %vm2239_vm1, %v2494_v24, %v2493_v36  ;;  %v3269_v14 = vperm.slane %v1895_v41, %v4604_v57  ;;  %v1897_v7 = vsub.f32 0.0, %v1515_v25  ;;  %v2497_v46 = vperm.slane %v1515_v25, %v4604_v57  ;;  %v7096_v41 = vld [vmem:[#allocation17_spill] sm:$0xff] }
 0x25d   : > { %v2703_v38 = vsel %vm2630_vm6, %v2495_v35, %v2702_v62  ;;  %v1896_v29 = vsub.f32 0.0, %v1512_v19  ;;  %v2496_v5 = vperm.slane %v1512_v19, %v4601_v22  ;;  %v3597_v62 = vmul.f32 1.442695, %v5965_v52  ;;  %v6056_v19 = vld [vmem:[%s4250_s26 + $0x70] sm:$0xff] }
 0x25e   : > { %v3270_v13 = vsel %vm2239_vm1, %v3269_v14, %v3268_v63  ;;  %v3272_v6 = vperm.slane %v1897_v7, %v4604_v57  ;;  %1621 = vadd.xlane.f32.xlu0 %v1040_v56  ;;  %v1831_v52 = vsub.f32 0.0, %v5192_v61  ;;  %v1830_v24 = vsub.f32 0.0, %v7096_v41 }
 0x25f   : > { %v3471_v27 = vsel %vm2630_vm6, %v3270_v13, %v3470_v12  ;;  %v2498_v37 = vsel %vm2239_vm1, %v2497_v46, %v2496_v5  ;;  %v3271_v11 = vperm.slane %v1896_v29, %v4601_v22  ;;  %v1045_v12 = vmul.f32 %v678_v28, %v405_v20  ;;  %v407_v29 = vld [vmem:[%s4255_s30 + $0x6f8] sm:$0x1] }
 0x260   : > { %v2704_v36 = vsel %vm2632_vm7, %v2498_v37, %v2703_v38  ;;  %1626 = vadd.xlane.f32.xlu2 %v1042_v17  ;;  %1624 = vadd.xlane.f32.xlu1 %v1623_v42  ;;  %v1628_v33 = vsel %vm1082_vm0, %v1043_v39, 0.0  ;;  %v6051_v26 = vsel %vm2628_vm5, %v2396_v8, %v2673_v30  ;;  %v2397_v48 = vperm.slane %v7096_v41, %v4601_v22  ;;  %v406_v38 = vld [vmem:[%s4255_s30 + $0x6f0] sm:$0xff] }
 0x261   : > { %v3273_v34 = vsel %vm2239_vm1, %v3272_v6, %v3271_v11  ;;  %v1517_v55 = vpop.xlane.xlu0 %1516  ;;  %v1044_v25 = vmul.f32 %v678_v28, %v404_v15  ;;  %v1633_v42 = vsel %vm1082_vm0, %v1045_v12, 0.0  ;;  %v679_v35 = vperm.slane %v553_v43, 0 }
 0x262   : > { %v3472_v40 = vsel %vm2632_vm7, %v3273_v34, %v3471_v27  ;;  %v1898_v63 = vsub.f32 0.0, %v1517_v55  ;;  %v2499_v61 = vperm.slane %v1517_v55, %v4601_v22  ;;  %v3171_v14 = vsel %vm2239_vm1, %v3170_v50, %v3169_v45  ;;  %v408_v27 = vld [vmem:[%s4255_s30 + $0x700] sm:$0xff] }
 0x263   : > { %v1522_v56 = vpop.xlane.xlu2 %1521  ;;  %v1520_v31 = vpop.xlane.xlu1 %1519  ;;  %v3173_v5 = vperm.slane %v1831_v52, %v4604_v57  ;;  %v3172_v28 = vperm.slane %v1830_v24, %v4601_v22  ;;  %v680_v51 = vperm.slane %v6056_v19, 0  ;;  %4066 = vpow2.f32 %v3597_v62 }
 0x264   : > { %v1899_v10 = vsub.f32 0.0, %v1520_v31  ;;  %v2500_v17 = vperm.slane %v1520_v31, %v4604_v57  ;;  %v3274_v7 = vperm.slane %v1898_v63, %v4601_v22  ;;  %v1900_v46 = vsub.f32 0.0, %v1522_v56 }
 0x265   : > { %v2502_v13 = vperm.slane %v1522_v56, %v4601_v22  ;;  %v1046_v11 = vmul.f32 %v679_v35, %v406_v38  ;;  %v1047_v39 = vmul.f32 %v679_v35, %v407_v29  ;;  %v554_v45 = vrot.slane %v6056_v19, 1  ;;  %v409_v56 = vld [vmem:[%s4255_s30 + $0x708] sm:$0x1] }
 0x266   : > { %v3275_v3 = vperm.slane %v1899_v10, %v4604_v57  ;;  %1629 = vadd.xlane.f32.xlu0 %v1628_v33  ;;  %v2501_v18 = vsel %vm2239_vm1, %v2500_v17, %v2499_v61  ;;  %v3277_v8 = vperm.slane %v1900_v46, %v4601_v22  ;;  %v3442_v12 = vsel %vm2628_vm5, %v3171_v14, %v3441_v47 }
 0x267   : > { %v2705_v6 = vsel %vm2634_vm8, %v2501_v18, %v2704_v36  ;;  %v2399_v62 = vsel %vm2239_vm1, %v2398_v9, %v2397_v48  ;;  %v1833_v15 = vsub.f32 0.0, %v5233_v60  ;;  %v1048_v63 = vmul.f32 %v680_v51, %v408_v27 }
 0x268   : > { %v3276_v20 = vsel %vm2239_vm1, %v3275_v3, %v3274_v7  ;;  %1634 = vadd.xlane.f32.xlu2 %v1633_v42  ;;  %1631 = vadd.xlane.f32.xlu1 %v1044_v25  ;;  %v1638_v47 = vsel %vm1082_vm0, %v1047_v39, 0.0  ;;  %v681_v9 = vperm.slane %v554_v45, 0  ;;  %v3174_v10 = vsel %vm2239_vm1, %v3173_v5, %v3172_v28  ;;  %v411_v42 = vld [vmem:[%s4255_s30 + $0x718] sm:$0x1] }
 0x269   : > { %v1525_v37 = vpop.xlane.xlu0 %1524  ;;  %v3473_v30 = vsel %vm2634_vm8, %v3276_v20, %v3472_v40  ;;  %v6091_v48 = vpop.eup %4066  ;;  %v1832_v25 = vsub.f32 0.0, %v5219_v1  ;;  %v1049_v7 = vmul.f32 %v680_v51, %v409_v56  ;;  %v3562_v46 = vand.u32 2147483647, %v5978_v0  ;;  %v413_v56 = vld [vmem:[%s4255_s30 + $0x728] sm:$0x1] }
 0x26a   : > { %v1901_v34 = vsub.f32 0.0, %v1525_v37  ;;  %v2503_v55 = vperm.slane %v1525_v37, %v4604_v57  ;;  %v6080_v36 = vsel %vm1723_vm9, %v2705_v6, %v3473_v30  ;;  %v6103_v3 = vsel %vm2630_vm6, %v2399_v62, %v6051_v26  ;;  %v410_v6 = vld [vmem:[%s4255_s30 + $0x710] sm:$0xff] }
 0x26b   : > { %7097 = vst [vmem:[#allocation18_spill] sm:$0xff] %v6080_v36  ;;  %v1530_v43 = vpop.xlane.xlu2 %1529  ;;  %v1527_v50 = vpop.xlane.xlu1 %1526  ;;  %v1834_v38 = vsub.f32 0.0, %v5231_v54  ;;  %v3176_v29 = vperm.slane %v1833_v15, %v4604_v57  ;;  %v3443_v28 = vsel %vm2630_vm6, %v3174_v10, %v3442_v12  ;;  %v1051_v51 = vmul.f32 %v681_v9, %v411_v42 }
 0x26c   : > { %v2504_v40 = vsel %vm2239_vm1, %v2503_v55, %v2502_v13  ;;  %v3278_v52 = vperm.slane %v1901_v34, %v4604_v57  ;;  %v1903_v41 = vsub.f32 0.0, %v1530_v43  ;;  %v2506_v24 = vperm.slane %v1530_v43, %v4604_v57  ;;  %v6125_v43 = vld [vmem:[%s4250_s26 + $0x78] sm:$0xff] }
 0x26d   : > { %v1902_v31 = vsub.f32 0.0, %v1527_v50  ;;  %v2505_v33 = vperm.slane %v1527_v50, %v4601_v22  ;;  %v555_v20 = vrot.slane %v6056_v19, 2  ;;  %v2400_v26 = vperm.slane %v5219_v1, %v4601_v22 }
 0x26e   : > { %v3279_v61 = vsel %vm2239_vm1, %v3278_v52, %v3277_v8  ;;  %v3281_v17 = vperm.slane %v1903_v41, %v4604_v57  ;;  %1636 = vadd.xlane.f32.xlu0 %v1046_v11  ;;  %v3175_v27 = vperm.slane %v1832_v25, %v4601_v22  ;;  %v2403_v39 = vperm.slane %v5231_v54, %v4601_v22 }
 0x26f   : > { %v2507_v35 = vsel %vm2239_vm1, %v2506_v24, %v2505_v33  ;;  %v3280_v14 = vperm.slane %v1902_v31, %v4601_v22  ;;  %v2401_v45 = vperm.slane %v5233_v60, %v4604_v57  ;;  %v1835_v30 = vsub.f32 0.0, %v5267_v59 }
 0x270   : > { %v2706_v5 = vsel %vm2622_vm2, %v2507_v35, %v2504_v40  ;;  %1641 = vadd.xlane.f32.xlu2 %v1048_v63  ;;  %1639 = vadd.xlane.f32.xlu1 %v1638_v47  ;;  %v1643_v55 = vsel %vm1082_vm0, %v1049_v7, 0.0  ;;  %v3178_v1 = vperm.slane %v1834_v38, %v4601_v22  ;;  %v3177_v12 = vsel %vm2239_vm1, %v3176_v29, %v3175_v27  ;;  %v412_v47 = vld [vmem:[%s4255_s30 + $0x720] sm:$0xff] }
 0x271   : > { %v3282_v18 = vsel %vm2239_vm1, %v3281_v17, %v3280_v14  ;;  %v1532_v13 = vpop.xlane.xlu0 %1531  ;;  %v1050_v15 = vmul.f32 %v681_v9, %v410_v6  ;;  %v1648_v50 = vsel %vm1082_vm0, %v1051_v51, 0.0  ;;  %v682_v63 = vperm.slane %v555_v20, 0  ;;  %v424_v17 = vld [vmem:[%s4255_s30 + $0x780] sm:$0xff] }
 0x272   : > { %v3474_v37 = vsel %vm2622_vm2, %v3282_v18, %v3279_v61  ;;  %v1904_v11 = vsub.f32 0.0, %v1532_v13  ;;  %v2508_v54 = vperm.slane %v1532_v13, %v4601_v22  ;;  %v2404_v40 = vperm.slane %v5267_v59, %v4604_v57 }
 0x273   : > { %v1537_v8 = vpop.xlane.xlu2 %1536  ;;  %v1535_v34 = vpop.xlane.xlu1 %1534  ;;  %v3179_v31 = vperm.slane %v1835_v30, %v4604_v57  ;;  %v688_v9 = vperm.slane %v6125_v43, 0  ;;  %v561_v10 = vrot.slane %v6125_v43, 1  ;;  %v3578_v42 = vsub.f32 0.0, %v3562_v46 }
 0x274   : > { %v1905_v62 = vsub.f32 0.0, %v1535_v34  ;;  %v2509_v60 = vperm.slane %v1535_v34, %v4604_v57  ;;  %v3283_v52 = vperm.slane %v1904_v11, %v4601_v22  ;;  %v1906_v41 = vsub.f32 0.0, %v1537_v8 }
 0x275   : > { %v2511_v25 = vperm.slane %v1537_v8, %v4601_v22  ;;  %v2402_v35 = vsel %vm2239_vm1, %v2401_v45, %v2400_v26  ;;  %v1053_v38 = vmul.f32 %v682_v63, %v413_v56  ;;  %v3444_v29 = vsel %vm2632_vm7, %v3177_v12, %v3443_v28  ;;  %v425_v8 = vld [vmem:[%s4255_s30 + $0x788] sm:$0x1] }
 0x276   : > { %v3284_v24 = vperm.slane %v1905_v62, %v4604_v57  ;;  %1644 = vadd.xlane.f32.xlu0 %v1643_v55  ;;  %v2510_v33 = vsel %vm2239_vm1, %v2509_v60, %v2508_v54  ;;  %v3286_v18 = vperm.slane %v1906_v41, %v4601_v22  ;;  %v1052_v51 = vmul.f32 %v682_v63, %v412_v47 }
 0x277   : > { %v2707_v59 = vsel %vm2624_vm3, %v2510_v33, %v2706_v5  ;;  %v2405_v6 = vsel %vm2239_vm1, %v2404_v40, %v2403_v39  ;;  %v3180_v46 = vsel %vm2239_vm1, %v3179_v31, %v3178_v1  ;;  %v1064_v27 = vmul.f32 %v688_v9, %v424_v17  ;;  %v427_v1 = vld [vmem:[%s4255_s30 + $0x798] sm:$0x1] }
 0x278   : > { %v3285_v61 = vsel %vm2239_vm1, %v3284_v24, %v3283_v52  ;;  %1649 = vadd.xlane.f32.xlu2 %v1648_v50  ;;  %1646 = vadd.xlane.f32.xlu1 %v1050_v15  ;;  %v1653_v39 = vsel %vm1082_vm0, %v1053_v38, 0.0  ;;  %v2676_v62 = vsel %vm2632_vm7, %v2402_v35, %v6103_v3  ;;  %v3445_v60 = vsel %vm2634_vm8, %v3180_v46, %v3444_v29  ;;  %v7098_v24 = vld [vmem:[#allocation5_spill] sm:$0xff] }
 0x279   : > { %v3475_v14 = vsel %vm2624_vm3, %v3285_v61, %v3474_v37  ;;  %v1540_v7 = vpop.xlane.xlu0 %1539  ;;  %v689_v37 = vperm.slane %v561_v10, 0  ;;  %v1065_v52 = vmul.f32 %v688_v9, %v425_v8  ;;  %v6170_v56 = vsel %vm3781_vm12, %v7098_v24, 0.0  ;;  %v426_v10 = vld [vmem:[%s4255_s30 + $0x790] sm:$0xff] }
 0x27a   : > { %v1907_v13 = vsub.f32 0.0, %v1540_v7  ;;  %v2512_v5 = vperm.slane %v1540_v7, %v4604_v57  ;;  %v2677_v31 = vsel %vm2634_vm8, %v2405_v6, %v2676_v62  ;;  %4068 = vlog2.f32 %v5859_v53 }
 0x27b   : > { %v1545_v20 = vpop.xlane.xlu2 %1544  ;;  %v1542_v26 = vpop.xlane.xlu1 %1541  ;;  %v1067_v3 = vmul.f32 %v689_v37, %v427_v1  ;;  %v6182_v61 = vsel %vm1723_vm9, %v2677_v31, %v3445_v60  ;;  %v3642_v35 = vmul.f32 -0.5, %v5643_v44  ;;  %v1683_v29 = vsel %vm1082_vm0, %v1065_v52, 0.0  ;;  %v428_v1 = vld [vmem:[%s4255_s30 + $0x7a0] sm:$0xff] }
 0x27c   : > { %v2513_v11 = vsel %vm2239_vm1, %v2512_v5, %v2511_v25  ;;  %v3287_v45 = vperm.slane %v1907_v13, %v4604_v57  ;;  %v1909_v28 = vsub.f32 0.0, %v1545_v20  ;;  %v2515_v30 = vperm.slane %v1545_v20, %v4604_v57 }
 0x27d   : > { %v2708_v34 = vsel %vm2626_vm4, %v2513_v11, %v2707_v59  ;;  %v1908_v55 = vsub.f32 0.0, %v1542_v26  ;;  %v2514_v12 = vperm.slane %v1542_v26, %v4601_v22  ;;  %v556_v25 = vrot.slane %v6056_v19, 3  ;;  %v7099_v59 = vld [vmem:[#allocation12_spill] sm:$0xff] }
 0x27e   : > { %v3288_v15 = vsel %vm2239_vm1, %v3287_v45, %v3286_v18  ;;  %v3290_v54 = vperm.slane %v1909_v28, %v4604_v57  ;;  %1651 = vadd.xlane.f32.xlu0 %v1052_v51  ;;  %v6178_v9 = vsel %vm3781_vm12, %v7099_v59, 0.0  ;;  %v562_v18 = vrot.slane %v6125_v43, 2  ;;  %v415_v45 = vld [vmem:[%s4255_s30 + $0x738] sm:$0x1] }
 0x27f   : > { %v3476_v50 = vsel %vm2626_vm4, %v3288_v15, %v3475_v14  ;;  %v2516_v63 = vsel %vm2239_vm1, %v2515_v30, %v2514_v12  ;;  %v3289_v40 = vperm.slane %v1908_v55, %v4601_v22  ;;  %v3657_v14 = vadd.f32 1.0, %v6091_v48  ;;  %v414_v30 = vld [vmem:[%s4255_s30 + $0x730] sm:$0xff] }
 0x280   : > { %v2709_v41 = vsel %vm2628_vm5, %v2516_v63, %v2708_v34  ;;  %1681 = vadd.xlane.f32.xlu2 %v1064_v27  ;;  %1654 = vadd.xlane.f32.xlu1 %v1653_v39  ;;  %4070 = vlog2.f32 %v5894_v4  ;;  %v3599_v13 = vmul.f32 1.442695, %v3578_v42  ;;  %v1688_v51 = vsel %vm1082_vm0, %v1067_v3, 0.0  ;;  %v6203_v55 = vpop.eup %4068 }
 0x281   : > { %v3291_v33 = vsel %vm2239_vm1, %v3290_v54, %v3289_v40  ;;  %v1547_v47 = vpop.xlane.xlu0 %1546  ;;  %v1066_v6 = vmul.f32 %v689_v37, %v426_v10  ;;  %v3563_v53 = vand.u32 2147483647, %v6182_v61  ;;  %v683_v27 = vperm.slane %v556_v25, 0  ;;  %v429_v25 = vld [vmem:[%s4255_s30 + $0x7a8] sm:$0x1] }
 0x282   : > { %v6185_v17 = vsel %vm2628_vm5, %v3291_v33, %v3476_v50  ;;  %v1910_v46 = vsub.f32 0.0, %v1547_v47  ;;  %v2517_v20 = vperm.slane %v1547_v47, %v4601_v22  ;;  %v3643_v28 = vadd.f32 1.0, %v3642_v35 }
 0x283   : > { %v1552_v7 = vpop.xlane.xlu2 %1551  ;;  %v1550_v38 = vpop.xlane.xlu1 %1549  ;;  %4072 = vlog2.f32 %v3657_v14  ;;  %v3564_v4 = vand.u32 2147483647, %v5510_v49  ;;  %v690_v8 = vperm.slane %v562_v18, 0  ;;  %v3565_v34 = vand.u32 2147483647, %v5702_v2 }
 0x284   : > { %v1911_v5 = vsub.f32 0.0, %v1550_v38  ;;  %v2518_v26 = vperm.slane %v1550_v38, %v4604_v57  ;;  %v1912_v11 = vsub.f32 0.0, %v1552_v7  ;;  %v2520_v12 = vperm.slane %v1552_v7, %v4601_v22 }
 0x285   : > { %v3645_v62 = vand.u32 2147483647, %v5643_v44  ;;  %4074 = vpow2.f32 %v3599_v13  ;;  %v3292_v54 = vperm.slane %v1910_v46, %v4601_v22  ;;  %v1055_v50 = vmul.f32 %v683_v27, %v415_v45 }
 0x286   : > { %1684 = vadd.xlane.f32.xlu0 %v1683_v29  ;;  %v2519_v42 = vsel %vm2239_vm1, %v2518_v26, %v2517_v20  ;;  %v3293_v37 = vperm.slane %v1911_v5, %v4604_v57  ;;  %v6209_v15 = vpop.eup %4070  ;;  %v557_v63 = vrot.slane %v6056_v19, 4  ;;  %v3579_v40 = vsub.f32 0.0, %v3563_v53 }
 0x287   : > { %v2710_v39 = vsel %vm2630_vm6, %v2519_v42, %v2709_v41  ;;  %v3295_v52 = vperm.slane %v1912_v11, %v4601_v22  ;;  %v1054_v24 = vmul.f32 %v683_v27, %v414_v30  ;;  %v1068_v10 = vmul.f32 %v690_v8, %v428_v1  ;;  %v417_v11 = vld [vmem:[%s4255_s30 + $0x748] sm:$0x1] }
 0x288   : > { %1689 = vadd.xlane.f32.xlu2 %v1688_v51  ;;  %1686 = vadd.xlane.f32.xlu1 %v1066_v6  ;;  %v3294_v31 = vsel %vm2239_vm1, %v3293_v37, %v3292_v54  ;;  %v3580_v59 = vsub.f32 0.0, %v3564_v4  ;;  %v3581_v35 = vsub.f32 0.0, %v3565_v34  ;;  %v1658_v51 = vsel %vm1082_vm0, %v1055_v50, 0.0  ;;  %v416_v54 = vld [vmem:[%s4255_s30 + $0x740] sm:$0xff] }
 0x289   : > { %v1555_v60 = vpop.xlane.xlu0 %1554  ;;  %v6217_v14 = vpop.eup %4072  ;;  %v684_v6 = vperm.slane %v557_v63, 0  ;;  %v3478_v46 = vsel %vm2630_vm6, %v3294_v31, %v6185_v17  ;;  %v1069_v27 = vmul.f32 %v690_v8, %v429_v25  ;;  %v6236_v17 = vmul.f32 %v5643_v44, %v3643_v28 }
 0x28a   : > { %v1913_v3 = vsub.f32 0.0, %v1555_v60  ;;  %v2521_v41 = vperm.slane %v1555_v60, %v4604_v57  ;;  %v3660_v30 = vmul.f32 -0.5, %v6091_v48  ;;  %v3651_v34 = vmul.f32 -0.5, %v5808_v58 }
 0x28b   : > { %v1560_v33 = vpop.xlane.xlu2 %1559  ;;  %v1557_v47 = vpop.xlane.xlu1 %1556  ;;  %v563_v60 = vrot.slane %v6125_v43, 3  ;;  %v3603_v50 = vmul.f32 1.442695, %v3580_v59  ;;  %v3566_v44 = vand.u32 2147483647, %v5898_v23 }
 0x28c   : > { %v2522_v7 = vsel %vm2239_vm1, %v2521_v41, %v2520_v12  ;;  %v3296_v38 = vperm.slane %v1913_v3, %v4604_v57  ;;  %v1915_v29 = vsub.f32 0.0, %v1560_v33  ;;  %v2524_v18 = vperm.slane %v1560_v33, %v4604_v57  ;;  %v6224_v53 = vpop.eup %4074 }
 0x28d   : > { %v1914_v13 = vsub.f32 0.0, %v1557_v47  ;;  %v2523_v5 = vperm.slane %v1557_v47, %v4601_v22  ;;  %v2711_v45 = vsel %vm2632_vm7, %v2522_v7, %v2710_v39  ;;  %v3601_v12 = vmul.f32 1.442695, %v3579_v40 }
 0x28e   : > { %v3297_v20 = vsel %vm2239_vm1, %v3296_v38, %v3295_v52  ;;  %v3299_v26 = vperm.slane %v1915_v29, %v4604_v57  ;;  %1656 = vadd.xlane.f32.xlu0 %v1054_v24  ;;  %v1057_v39 = vmul.f32 %v684_v6, %v417_v11  ;;  %v3605_v52 = vmul.f32 1.442695, %v3581_v35  ;;  %v418_v11 = vld [vmem:[%s4255_s30 + $0x750] sm:$0xff] }
 0x28f   : > { %v3479_v4 = vsel %vm2632_vm7, %v3297_v20, %v3478_v46  ;;  %v2525_v42 = vsel %vm2239_vm1, %v2524_v18, %v2523_v5  ;;  %v3298_v37 = vperm.slane %v1914_v13, %v4601_v22  ;;  %v1693_v41 = vsel %vm1082_vm0, %v1069_v27, 0.0  ;;  %v430_v18 = vld [vmem:[%s4255_s30 + $0x7b0] sm:$0xff] }
 0x290   : > { %1691 = vadd.xlane.f32.xlu2 %v1068_v10  ;;  %1659 = vadd.xlane.f32.xlu1 %v1658_v51  ;;  %v2712_v63 = vsel %vm2634_vm8, %v2525_v42, %v2711_v45  ;;  %v3641_v24 = vmul.f32 0.6931472, %v6203_v55  ;;  %vm6254_vm13 = vcmp.lt.f32.partialorder %v3645_v62, 0.0004427343  ;;  %v1056_v47 = vmul.f32 %v684_v6, %v416_v54  ;;  %v431_v55 = vld [vmem:[%s4255_s30 + $0x7b8] sm:$0x1] }
 0x291   : > { %v3300_v8 = vsel %vm2239_vm1, %v3299_v26, %v3298_v37  ;;  %v6241_v1 = vpop.xlane.xlu0 %1561  ;;  %v558_v10 = vrot.slane %v6056_v19, 5  ;;  %v3652_v25 = vadd.f32 1.0, %v3651_v34  ;;  %4076 = vpow2.f32 %v3601_v12 }
 0x292   : > { %v3480_v28 = vsel %vm2634_vm8, %v3300_v8, %v3479_v4  ;;  %v1663_v59 = vsel %vm1082_vm0, %v1057_v39, 0.0  ;;  %v691_v35 = vperm.slane %v563_v60, 0  ;;  %v3666_v7 = vadd.f32 1.0, %v6224_v53 }
 0x293   : > { %v6248_v3 = vpop.xlane.xlu2 %1566  ;;  %v6250_v40 = vpop.xlane.xlu1 %1564  ;;  %v6260_v33 = vsel %vm1723_vm9, %v2712_v63, %v3480_v28  ;;  %4078 = vpow2.f32 %v3603_v50  ;;  %v3661_v62 = vadd.f32 1.0, %v3660_v30  ;;  %v3654_v38 = vand.u32 2147483647, %v5808_v58  ;;  %v419_v50 = vld [vmem:[%s4255_s30 + $0x758] sm:$0x1] }
 0x294   : > { %7102 = vst [vmem:[#allocation21_spill] sm:$0xff] %v6260_v33  ;;  %4080 = vpow2.f32 %v3605_v52  ;;  %v3582_v29 = vsub.f32 0.0, %v3566_v44  ;;  %v3543_v13 = vmin.f32 %v5252_v21, 0.0  ;;  %v3663_v5 = vand.u32 2147483647, %v6091_v48 }
 0x295   : > { %v3650_v51 = vmul.f32 0.6931472, %v6209_v15  ;;  %v685_v6 = vperm.slane %v558_v10, 0  ;;  %v564_v46 = vrot.slane %v6125_v43, 4  ;;  %v3647_v20 = vsel %vm6254_vm13, %v6236_v17, %v3641_v24 }
 0x296   : > { %1694 = vadd.xlane.f32.xlu0 %v1693_v41  ;;  %v3659_v26 = vmul.f32 0.6931472, %v6217_v14  ;;  %v1071_v45 = vmul.f32 %v691_v35, %v431_v55  ;;  %v3653_v21 = vmul.f32 %v5808_v58, %v3652_v25  ;;  %4082 = vlog2.f32 %v3666_v7  ;;  %v433_v41 = vld [vmem:[%s4255_s30 + $0x7c8] sm:$0x1] }
 0x297   : > { %v3669_v15 = vmul.f32 -0.5, %v6224_v53  ;;  %v6281_v4 = vpop.eup %4076  ;;  %v1070_v42 = vmul.f32 %v691_v35, %v430_v18  ;;  %v3662_v37 = vmul.f32 %v6091_v48, %v3661_v62  ;;  %vm6284_vm14 = vcmp.lt.f32.partialorder %v3654_v38, 0.0004427343 }
 0x298   : > { %1664 = vadd.xlane.f32.xlu2 %v1663_v59  ;;  %1661 = vadd.xlane.f32.xlu1 %v1056_v47  ;;  %v3607_v14 = vmul.f32 1.442695, %v3582_v29  ;;  %vm6294_vm15 = vcmp.lt.f32.partialorder %v3663_v5, 0.0004427343  ;;  %v3544_v8 = vmin.f32 %v5358_v32, 0.0  ;;  %v3656_v48 = vsel %vm6284_vm14, %v3653_v21, %v3650_v51  ;;  %v432_v5 = vld [vmem:[%s4255_s30 + $0x7c0] sm:$0xff] }
 0x299   : > { %v6276_v27 = vpop.xlane.xlu0 %1569  ;;  %v6288_v17 = vpop.eup %4078  ;;  %v3567_v39 = vand.u32 2147483647, %v6080_v36  ;;  %v1058_v60 = vmul.f32 %v685_v6, %v418_v11  ;;  %v692_v63 = vperm.slane %v564_v46, 0  ;;  %v559_v52 = vrot.slane %v6056_v19, 6  ;;  %v421_v51 = vld [vmem:[%s4255_s30 + $0x768] sm:$0x1] }
 0x29a   : > { %v6302_v54 = vpop.eup %4080  ;;  %v3665_v44 = vsel %vm6294_vm15, %v3662_v37, %v3659_v26  ;;  %v1698_v28 = vsel %vm1082_vm0, %v1071_v45, 0.0  ;;  %v3545_v32 = vmin.f32 %v5756_v16, 0.0  ;;  %v3670_v24 = vadd.f32 1.0, %v3669_v15 }
 0x29b   : > { %v6290_v34 = vpop.xlane.xlu2 %1574  ;;  %v6292_v58 = vpop.xlane.xlu1 %1571  ;;  %v3675_v31 = vadd.f32 1.0, %v6281_v4  ;;  %v6312_v47 = vsub.f32 %v3543_v13, %v3647_v20  ;;  %v6314_v10 = vsub.f32 %v3544_v8, %v3656_v48  ;;  %v3684_v25 = vadd.f32 1.0, %v6288_v17  ;;  %v420_v8 = vld [vmem:[%s4255_s30 + $0x760] sm:$0xff]  ;;  %v434_v48 = vld [vmem:[%s4255_s30 + $0x7d0] sm:$0xff] }
 0x29c   : > { %4084 = vpow2.f32 %v3607_v14  ;;  %v4083_v59 = vpop.eup %4082  ;;  %v1059_v35 = vmul.f32 %v685_v6, %v419_v50  ;;  %v6317_v7 = vsub.f32 %v3545_v32, %v3665_v44  ;;  %v3693_v55 = vadd.f32 1.0, %v6302_v54 }
 0x29d   : > { %v3583_v16 = vsub.f32 0.0, %v3567_v39  ;;  %v1073_v62 = vmul.f32 %v692_v63, %v433_v41  ;;  %v686_v38 = vperm.slane %v559_v52, 0  ;;  %v565_v29 = vrot.slane %v6125_v43, 5 }
 0x29e   : > { %1696 = vadd.xlane.f32.xlu0 %v1070_v42  ;;  %v560_v46 = vrot.slane %v6056_v19, 7  ;;  %v6328_v6 = vmul.f32 %v6224_v53, %v3670_v24  ;;  %4086 = vlog2.f32 %v3675_v31  ;;  %v6331_v26 = vmul.f32 0.6931472, %v4083_v59  ;;  %v423_v31 = vld [vmem:[%s4255_s30 + $0x778] sm:$0x1] }
 0x29f   : > { %v6335_v45 = vmul.f32 -0.5, %v6281_v4  ;;  %4088 = vlog2.f32 %v3684_v25  ;;  %v1668_v15 = vsel %vm1082_vm0, %v1059_v35, 0.0  ;;  %v3609_v37 = vmul.f32 1.442695, %v3583_v16 }
 0x2a0   : > { %1666 = vadd.xlane.f32.xlu2 %v1058_v60  ;;  %1699 = vadd.xlane.f32.xlu1 %v1698_v28  ;;  %4090 = vlog2.f32 %v3693_v55  ;;  %v1703_v14 = vsel %vm1082_vm0, %v1073_v62, 0.0  ;;  %v1072_v12 = vmul.f32 %v692_v63, %v432_v5  ;;  %v693_v39 = vperm.slane %v565_v29, 0  ;;  %v435_v28 = vld [vmem:[%s4255_s30 + $0x7d8] sm:$0x1] }
 0x2a1   : > { %v6322_v13 = vpop.xlane.xlu0 %1576  ;;  %v1061_v60 = vmul.f32 %v686_v38, %v421_v51  ;;  %v1916_v50 = vsub.f32 0.0, %v6241_v1  ;;  %v1918_v52 = vsub.f32 0.0, %v6248_v3  ;;  %v1917_v44 = vsub.f32 0.0, %v6250_v40 }
 0x2a2   : > { %v6343_v30 = vpop.eup %4084  ;;  %v687_v41 = vperm.slane %v560_v46, 0  ;;  %v2529_v32 = vperm.slane %v6248_v3, %v4601_v22  ;;  %v2527_v24 = vperm.slane %v6250_v40, %v4604_v57  ;;  %v2530_v63 = vperm.slane %v6276_v27, %v4604_v57 }
 0x2a3   : > { %v6337_v21 = vpop.xlane.xlu2 %1581  ;;  %v6339_v19 = vpop.xlane.xlu1 %1579  ;;  %v566_v25 = vrot.slane %v6125_v43, 6  ;;  %v1919_v35 = vsub.f32 0.0, %v6276_v27  ;;  %v1060_v55 = vmul.f32 %v686_v38, %v420_v8  ;;  %v6364_v16 = vadd.f32 1.0, %v6343_v30 }
 0x2a4   : > { %v6360_v59 = vpop.eup %4086  ;;  %4092 = vpow2.f32 %v3609_v37  ;;  %v2526_v40 = vperm.slane %v6241_v1, %v4601_v22  ;;  %v1074_v62 = vmul.f32 %v693_v39, %v434_v48  ;;  %v1075_v29 = vmul.f32 %v693_v39, %v435_v28 }
 0x2a5   : > { %v6366_v3 = vpop.eup %4088  ;;  %v3568_v5 = vand.u32 2147483647, %v6260_v33  ;;  %v3301_v27 = vperm.slane %v1916_v50, %v4601_v22  ;;  %v3302_v38 = vperm.slane %v1917_v44, %v4604_v57  ;;  %v1063_v37 = vmul.f32 %v687_v41, %v423_v31 }
 0x2a6   : > { %1669 = vadd.xlane.f32.xlu0 %v1668_v15  ;;  %v6371_v51 = vpop.eup %4090  ;;  %v1673_v15 = vsel %vm1082_vm0, %v1061_v60, 0.0  ;;  %v3304_v8 = vperm.slane %v1918_v52, %v4601_v22  ;;  %v2528_v1 = vsel %vm2239_vm1, %v2527_v24, %v2526_v40  ;;  %v694_v48 = vperm.slane %v566_v25, 0 }
 0x2a7   : > { %v3305_v39 = vperm.slane %v1919_v35, %v4604_v57  ;;  %v1921_v28 = vsub.f32 0.0, %v6290_v34  ;;  %v2533_v50 = vperm.slane %v6290_v34, %v4604_v57  ;;  %v2532_v60 = vperm.slane %v6292_v58, %v4601_v22 }
 0x2a8   : > { %1704 = vadd.xlane.f32.xlu2 %v1703_v14  ;;  %1701 = vadd.xlane.f32.xlu1 %v1072_v12  ;;  %v2531_v14 = vsel %vm2239_vm1, %v2530_v63, %v2529_v32  ;;  %v422_v12 = vld [vmem:[%s4255_s30 + $0x770] sm:$0xff]  ;;  %v1920_v52 = vsub.f32 0.0, %v6292_v58  ;;  %v1923_v32 = vsub.f32 0.0, %v6339_v19  ;;  %v1708_v24 = vsel %vm1082_vm0, %v1075_v29, 0.0  ;;  %v436_v63 = vld [vmem:[%s4255_s30 + $0x7e0] sm:$0xff] }
 0x2a9   : > { %v1585_v46 = vpop.xlane.xlu0 %1584  ;;  %v3584_v25 = vsub.f32 0.0, %v3568_v5  ;;  %v3303_v40 = vsel %vm2239_vm1, %v3302_v38, %v3301_v27  ;;  %v1922_v34 = vsub.f32 0.0, %v6322_v13  ;;  %v1678_v11 = vsel %vm1082_vm0, %v1063_v37, 0.0 }
 0x2aa   : > { %v6394_v35 = vpop.eup %4092  ;;  %v1062_v18 = vmul.f32 %v687_v41, %v422_v12  ;;  %v2713_v42 = vsel %vm2622_vm2, %v2531_v14, %v2528_v1  ;;  %v1924_v58 = vsub.f32 0.0, %v6337_v21  ;;  %v1925_v20 = vsub.f32 0.0, %v1585_v46 }
 0x2ab   : > { %v6386_v44 = vpop.xlane.xlu2 %1589  ;;  %v6388_v31 = vpop.xlane.xlu1 %1586  ;;  %v567_v29 = vrot.slane %v6125_v43, 7  ;;  %v3306_v5 = vsel %vm2239_vm1, %v3305_v39, %v3304_v8  ;;  %v3308_v33 = vperm.slane %v1921_v28, %v4604_v57  ;;  %v2534_v27 = vsel %vm2239_vm1, %v2533_v50, %v2532_v60 }
 0x2ac   : > { %v6405_v38 = vmul.f32 %v694_v48, %v436_v63  ;;  %v3307_v37 = vperm.slane %v1920_v52, %v4601_v22  ;;  %v2536_v41 = vperm.slane %v6339_v19, %v4604_v57  ;;  %v3311_v1 = vperm.slane %v1923_v32, %v4604_v57 }
 0x2ad   : > { %v3611_v14 = vmul.f32 1.442695, %v3584_v25  ;;  %v2535_v43 = vperm.slane %v6322_v13, %v4601_v22  ;;  %v3310_v8 = vperm.slane %v1922_v34, %v4601_v22  ;;  %v2538_v12 = vperm.slane %v6337_v21, %v4601_v22 }
 0x2ae   : > { %1671 = vadd.xlane.f32.xlu0 %v1060_v55  ;;  %v437_v55 = vld [vmem:[%s4255_s30 + $0x7e8] sm:$0x1]  ;;  %v2539_v39 = vperm.slane %v1585_v46, %v4604_v57  ;;  %v3313_v50 = vperm.slane %v1924_v58, %v4601_v22  ;;  %v3314_v19 = vperm.slane %v1925_v20, %v4604_v57  ;;  %v3481_v60 = vsel %vm2622_vm2, %v3306_v5, %v3303_v40 }
 0x2af   : > { %v2714_v13 = vsel %vm2624_vm3, %v2534_v27, %v2713_v42  ;;  %v695_v63 = vperm.slane %v567_v29, 0  ;;  %v1077_v25 = vmul.f32 %v694_v48, %v437_v55  ;;  %v3309_v21 = vsel %vm2239_vm1, %v3308_v33, %v3307_v37 }
 0x2b0   : > { %1706 = vadd.xlane.f32.xlu2 %v1074_v62  ;;  %1674 = vadd.xlane.f32.xlu1 %v1673_v15  ;;  %v1927_v62 = vsub.f32 0.0, %v6386_v44  ;;  %v1926_v15 = vsub.f32 0.0, %v6388_v31  ;;  %v2537_v46 = vsel %vm2239_vm1, %v2536_v41, %v2535_v43  ;;  %v3312_v34 = vsel %vm2239_vm1, %v3311_v1, %v3310_v8 }
 0x2b1   : > { %v1592_v28 = vpop.xlane.xlu0 %1591  ;;  %v2540_v20 = vsel %vm2239_vm1, %v2539_v39, %v2538_v12  ;;  %v2542_v36 = vperm.slane %v6386_v44, %v4604_v57  ;;  %v2541_v40 = vperm.slane %v6388_v31, %v4601_v22  ;;  %v3315_v5 = vsel %vm2239_vm1, %v3314_v19, %v3313_v50 }
 0x2b2   : > { %v1928_v42 = vsub.f32 0.0, %v1592_v28  ;;  %v3317_v48 = vperm.slane %v1927_v62, %v4604_v57  ;;  %v3316_v33 = vperm.slane %v1926_v15, %v4601_v22  ;;  %v3482_v27 = vsel %vm2624_vm3, %v3309_v21, %v3481_v60  ;;  %v438_v62 = vld [vmem:[%s4255_s30 + $0x7f0] sm:$0xff] }
 0x2b3   : > { %v1597_v52 = vpop.xlane.xlu2 %1596  ;;  %v1595_v32 = vpop.xlane.xlu1 %1594  ;;  %v2715_v37 = vsel %vm2626_vm4, %v2537_v46, %v2714_v13  ;;  %v3483_v31 = vsel %vm2626_vm4, %v3312_v34, %v3482_v27  ;;  %v7107_v43 = vand.u32 2147483647, %v6224_v53  ;;  %4094 = vpow2.f32 %v3611_v14  ;;  %v439_v46 = vld [vmem:[%s4255_s30 + $0x7f8] sm:$0x1] }
 0x2b4   : > { %v1929_v58 = vsub.f32 0.0, %v1595_v32  ;;  %v1930_v29 = vsub.f32 0.0, %v1597_v52  ;;  %v2545_v41 = vperm.slane %v1595_v32, %v4604_v57  ;;  %v2716_v1 = vsel %vm2628_vm5, %v2540_v20, %v2715_v37 }
 0x2b5   : > { %v2547_v55 = vperm.slane %v1597_v52, %v4601_v22  ;;  %vm6444_vm10 = vcmp.lt.f32.partialorder %v7107_v43, 0.0004427343  ;;  %v3484_v8 = vsel %vm2628_vm5, %v3315_v5, %v3483_v31  ;;  %v2543_v12 = vsel %vm2239_vm1, %v2542_v36, %v2541_v40 }
 0x2b6   : > { %1709 = vadd.xlane.f32.xlu0 %v1708_v24  ;;  %v3320_v44 = vperm.slane %v1929_v58, %v4604_v57  ;;  %v2544_v39 = vperm.slane %v1592_v28, %v4601_v22  ;;  %v3319_v50 = vperm.slane %v1928_v42, %v4601_v22  ;;  %v3322_v53 = vperm.slane %v1930_v29, %v4601_v22 }
 0x2b7   : > { %v3687_v28 = vmul.f32 -0.5, %v6288_v17  ;;  %4096 = vlog2.f32 %v6364_v16  ;;  %v1078_v21 = vmul.f32 %v695_v63, %v438_v62  ;;  %v3711_v34 = vadd.f32 1.0, %v6394_v35 }
 0x2b8   : > { %1679 = vadd.xlane.f32.xlu2 %v1678_v11  ;;  %1676 = vadd.xlane.f32.xlu1 %v1062_v18  ;;  %v3318_v18 = vsel %vm2239_vm1, %v3317_v48, %v3316_v33  ;;  %v2546_v14 = vsel %vm2239_vm1, %v2545_v41, %v2544_v39  ;;  %v3321_v60 = vsel %vm2239_vm1, %v3320_v44, %v3319_v50  ;;  %v1713_v40 = vsel %vm1082_vm0, %v1077_v25, 0.0 }
 0x2b9   : > { %v1600_v19 = vpop.xlane.xlu0 %1599  ;;  %v2717_v58 = vsel %vm2630_vm6, %v2543_v12, %v2716_v1  ;;  %v3485_v20 = vsel %vm2630_vm6, %v3318_v18, %v3484_v8  ;;  %v3679_v42 = vadd.f32 1.0, %v6335_v45  ;;  %v6472_v5 = vpop.eup %4094  ;;  %v3696_v29 = vmul.f32 -0.5, %v6302_v54 }
 0x2ba   : > { %v1931_v11 = vsub.f32 0.0, %v1600_v19  ;;  %v2548_v15 = vperm.slane %v1600_v19, %v4604_v57  ;;  %v2718_v16 = vsel %vm2632_vm7, %v2546_v14, %v2717_v58  ;;  %v3486_v48 = vsel %vm2632_vm7, %v3321_v60, %v3485_v20 }
 0x2bb   : > { %v6458_v13 = vpop.xlane.xlu2 %1604  ;;  %v6460_v36 = vpop.xlane.xlu1 %1601  ;;  %v1079_v37 = vmul.f32 %v695_v63, %v439_v46  ;;  %v3705_v41 = vmul.f32 -0.5, %v6343_v30  ;;  %v7110_v45 = vand.u32 2147483647, %v6281_v4  ;;  %v3688_v31 = vadd.f32 1.0, %v3687_v28 }
 0x2bc   : > { %v2549_v52 = vsel %vm2239_vm1, %v2548_v15, %v2547_v55  ;;  %v3323_v32 = vperm.slane %v1931_v11, %v4604_v57  ;;  %4098 = vlog2.f32 %v3711_v34  ;;  %v3674_v55 = vsel %vm6444_vm10, %v6328_v6, %v6331_v26 }
 0x2bd   : > { %v2719_v27 = vsel %vm2634_vm8, %v2549_v52, %v2718_v16  ;;  %vm6484_vm11 = vcmp.lt.f32.partialorder %v7110_v45, 0.0004427343  ;;  %v4097_v1 = vpop.eup %4096  ;;  %v3677_v43 = vmul.f32 0.6931472, %v6360_v59  ;;  %v3690_v8 = vand.u32 2147483647, %v6288_v17 }
 0x2be   : > { %v3324_v33 = vsel %vm2239_vm1, %v3323_v32, %v3322_v53  ;;  %1711 = vadd.xlane.f32.xlu0 %v6405_v38  ;;  %v3686_v39 = vmul.f32 0.6931472, %v6366_v3  ;;  %v3697_v50 = vadd.f32 1.0, %v3696_v29  ;;  %v3699_v19 = vand.u32 2147483647, %v6302_v54 }
 0x2bf   : > { %v3487_v25 = vsel %vm2634_vm8, %v3324_v33, %v3486_v48  ;;  %v3720_v62 = vadd.f32 1.0, %v6472_v5  ;;  %v1718_v24 = vsel %vm1082_vm0, %v1079_v37, 0.0  ;;  %v3706_v6 = vadd.f32 1.0, %v3705_v41 }
 0x2c0   : > { %1716 = vadd.xlane.f32.xlu2 %v1078_v21  ;;  %1714 = vadd.xlane.f32.xlu1 %v1713_v40  ;;  %v6490_v38 = vsel %vm1723_vm9, %v2719_v27, %v3487_v25  ;;  %v3714_v26 = vmul.f32 -0.5, %v6394_v35  ;;  %v3680_v11 = vmul.f32 %v6281_v4, %v3679_v42  ;;  %v3689_v15 = vmul.f32 %v6288_v17, %v3688_v31 }
 0x2c1   : > { %v6492_v63 = vpop.xlane.xlu0 %1606  ;;  %v3569_v12 = vand.u32 2147483647, %v6490_v38  ;;  %v3695_v3 = vmul.f32 0.6931472, %v6371_v51  ;;  %v3708_v14 = vand.u32 2147483647, %v6343_v30  ;;  %v3698_v51 = vmul.f32 %v6302_v54, %v3697_v50 }
 0x2c2   : > { %v7113_v60 = vmin.f32 %v5978_v0, 0.0  ;;  %vm6516_vm13 = vcmp.lt.f32.partialorder %v3690_v8, 0.0004427343  ;;  %v3704_v32 = vmul.f32 0.6931472, %v4097_v1  ;;  %v4099_v46 = vpop.eup %4098  ;;  %v3683_v4 = vsel %vm6484_vm11, %v3680_v11, %v3677_v43 }
 0x2c3   : > { %v6504_v18 = vpop.xlane.xlu2 %1611  ;;  %v6506_v53 = vpop.xlane.xlu1 %1609  ;;  %v3585_v59 = vsub.f32 0.0, %v3569_v12  ;;  %v3692_v17 = vsel %vm6516_vm13, %v3689_v15, %v3686_v39  ;;  %4100 = vlog2.f32 %v3720_v62  ;;  %vm6525_vm0 = vcmp.lt.f32.partialorder %v3699_v19, 0.0004427343  ;;  %v7123_v39 = vld [vmem:[#allocation18_spill] sm:$0xff] }
 0x2c4   : > { %v3770_v28 = vsub.f32 %v7113_v60, %v3674_v55  ;;  %v3707_v34 = vmul.f32 %v6343_v30, %v3706_v6  ;;  %v3715_v58 = vadd.f32 1.0, %v3714_v26  ;;  %v3548_v20 = vmin.f32 %v5510_v49, 0.0 }
 0x2c5   : > { %v3613_v21 = vmul.f32 1.442695, %v3585_v59  ;;  %v3701_v40 = vsel %vm6525_vm0, %v3698_v51, %v3695_v3  ;;  %vm6535_vm14 = vcmp.lt.f32.partialorder %v3708_v14, 0.0004427343  ;;  %v3717_v42 = vand.u32 2147483647, %v6394_v35 }
 0x2c6   : > { %1719 = vadd.xlane.f32.xlu0 %v1718_v24  ;;  %v7120_v30 = vmin.f32 %v6182_v61, 0.0  ;;  %v3713_v49 = vmul.f32 0.6931472, %v4099_v46  ;;  %v3772_v33 = vsub.f32 %v3548_v20, %v3692_v17  ;;  %v3550_v29 = vmin.f32 %v5898_v23, 0.0 }
 0x2c7   : > { %4102 = vpow2.f32 %v3613_v21  ;;  %v3723_v27 = vmul.f32 -0.5, %v6472_v5  ;;  %v3788_v25 = vsel %vm3781_vm12, %v6312_v47, 0.0  ;;  %v3791_v61 = vsel %vm3781_vm12, %v6314_v10, 0.0 }
 0x2c8   : > { %3786 = vadd.xlane.f32.xlu2 %v6178_v9  ;;  %3783 = vadd.xlane.f32.xlu1 %v6170_v56  ;;  %v3771_v48 = vsub.f32 %v7120_v30, %v3683_v4  ;;  %v3549_v9 = vmin.f32 %v5702_v2, 0.0  ;;  %v3710_v56 = vsel %vm6535_vm14, %v3707_v34, %v3704_v32  ;;  %v3716_v45 = vmul.f32 %v6394_v35, %v3715_v58 }
 0x2c9   : > { %v6540_v16 = vpop.xlane.xlu0 %1614  ;;  %v4101_v44 = vpop.eup %4100  ;;  %v3794_v31 = vsel %vm3781_vm12, %v6317_v7, 0.0  ;;  %v3774_v23 = vsub.f32 %v3550_v29, %v3710_v56  ;;  %vm6560_vm15 = vcmp.lt.f32.partialorder %v3717_v42, 0.0004427343  ;;  %v3726_v55 = vand.u32 2147483647, %v6472_v5 }
 0x2ca   : > { %v3773_v2 = vsub.f32 %v3549_v9, %v3701_v40  ;;  %v1935_v47 = vsub.f32 0.0, %v6506_v53  ;;  %v3797_v10 = vsel %vm3781_vm12, %v3770_v28, 0.0  ;;  %v3800_v8 = vsel %vm3781_vm12, %v3771_v48, 0.0  ;;  %v7126_v40 = vld [vmem:[#allocation21_spill] sm:$0xff] }
 0x2cb   : > { %v6549_v37 = vpop.xlane.xlu2 %1619  ;;  %v6551_v41 = vpop.xlane.xlu1 %1616  ;;  %v3719_v35 = vsel %vm6560_vm15, %v3716_v45, %v3713_v49  ;;  %v1933_v7 = vsub.f32 0.0, %v6458_v13  ;;  %v3803_v12 = vsel %vm3781_vm12, %v3772_v33, 0.0  ;;  %v3551_v50 = vmin.f32 %v7123_v39, 0.0 }
 0x2cc   : > { %v3724_v19 = vadd.f32 1.0, %v3723_v27  ;;  %v1932_v62 = vsub.f32 0.0, %v6460_v36  ;;  %v1934_v24 = vsub.f32 0.0, %v6492_v63  ;;  %v6578_v6 = vsel %vm3781_vm12, %v3773_v2, 0.0 }
 0x2cd   : > { %v6565_v43 = vpop.eup %4102  ;;  %v6582_v59 = vsel %vm3781_vm12, %v3774_v23, 0.0  ;;  %v3775_v11 = vsub.f32 %v3551_v50, %v3719_v35  ;;  %v3722_v15 = vmul.f32 0.6931472, %v4101_v44  ;;  %vm6584_vm10 = vcmp.lt.f32.partialorder %v3726_v55, 0.0004427343 }
 0x2ce   : > { %3789 = vadd.xlane.f32.xlu0 %v3788_v25  ;;  %v3729_v26 = vadd.f32 1.0, %v6565_v43  ;;  %v1936_v14 = vsub.f32 0.0, %v6504_v18  ;;  %v2554_v60 = vperm.slane %v6506_v53, %v4604_v57  ;;  %v3329_v28 = vperm.slane %v1935_v47, %v4604_v57 }
 0x2cf   : > { %v1937_v52 = vsub.f32 0.0, %v6540_v16  ;;  %v2551_v21 = vperm.slane %v6458_v13, %v4604_v57  ;;  %v3326_v46 = vperm.slane %v1933_v7, %v4604_v57  ;;  %v2550_v4 = vperm.slane %v6460_v36, %v4601_v22 }
 0x2d0   : > { %3795 = vadd.xlane.f32.xlu2 %v3794_v31  ;;  %3792 = vadd.xlane.f32.xlu1 %v3791_v61  ;;  %v3725_v17 = vmul.f32 %v6472_v5, %v3724_v19  ;;  %v3325_v51 = vperm.slane %v1932_v62, %v4601_v22  ;;  %v2553_v53 = vperm.slane %v6492_v63, %v4601_v22  ;;  %4104 = vlog2.f32 %v3729_v26 }
 0x2d1   : > { %v6593_v32 = vpop.xlane.xlu0 %1621  ;;  %v3328_v0 = vperm.slane %v1934_v24, %v4601_v22  ;;  %v2556_v13 = vperm.slane %v6504_v18, %v4601_v22  ;;  %v2557_v20 = vperm.slane %v6540_v16, %v4604_v57  ;;  %v3552_v36 = vmin.f32 %v7126_v40, 0.0 }
 0x2d2   : > { %v3728_v5 = vsel %vm6584_vm10, %v3725_v17, %v3722_v15  ;;  %v3331_v54 = vperm.slane %v1936_v14, %v4601_v22  ;;  %v2555_v63 = vsel %vm2239_vm1, %v2554_v60, %v2553_v53  ;;  %v3332_v30 = vperm.slane %v1937_v52, %v4604_v57 }
 0x2d3   : > { %v1627_v34 = vpop.xlane.xlu2 %1626  ;;  %v1625_v58 = vpop.xlane.xlu1 %1624  ;;  %v3330_v42 = vsel %vm2239_vm1, %v3329_v28, %v3328_v0  ;;  %v1939_v48 = vsub.f32 0.0, %v6549_v37  ;;  %v1938_v18 = vsub.f32 0.0, %v6551_v41  ;;  %v3812_v16 = vsel %vm3781_vm12, %v3775_v11, 0.0 }
 0x2d4   : > { %v3732_v9 = vmul.f32 -0.5, %v6565_v43  ;;  %v2552_v56 = vsel %vm2239_vm1, %v2551_v21, %v2550_v4  ;;  %v3327_v49 = vsel %vm2239_vm1, %v3326_v46, %v3325_v51  ;;  %v1941_v33 = vsub.f32 0.0, %v1625_v58 }
 0x2d5   : > { %v3776_v29 = vsub.f32 %v3552_v36, %v3728_v5  ;;  %v2720_v27 = vsel %vm2622_vm2, %v2555_v63, %v2552_v56  ;;  %v3488_v25 = vsel %vm2622_vm2, %v3330_v42, %v3327_v49  ;;  %v2558_v61 = vsel %vm2239_vm1, %v2557_v20, %v2556_v13 }
 0x2d6   : > { %3798 = vadd.xlane.f32.xlu0 %v3797_v10  ;;  %v1940_v2 = vsub.f32 0.0, %v6593_v32  ;;  %v4105_v45 = vpop.eup %4104  ;;  %v3333_v44 = vsel %vm2239_vm1, %v3332_v30, %v3331_v54  ;;  %v2560_v31 = vperm.slane %v6549_v37, %v4604_v57  ;;  %v2559_v23 = vperm.slane %v6551_v41, %v4601_v22 }
 0x2d7   : > { %v1942_v1 = vsub.f32 0.0, %v1627_v34  ;;  %v3335_v47 = vperm.slane %v1939_v48, %v4604_v57  ;;  %v3334_v10 = vperm.slane %v1938_v18, %v4601_v22  ;;  %v3733_v7 = vadd.f32 1.0, %v3732_v9 }
 0x2d8   : > { %3801 = vadd.xlane.f32.xlu1 %v3800_v8  ;;  %3804 = vadd.xlane.f32.xlu2 %v3803_v12  ;;  %v2562_v8 = vperm.slane %v6593_v32, %v4601_v22  ;;  %v2563_v12 = vperm.slane %v1625_v58, %v4604_v57  ;;  %v3338_v39 = vperm.slane %v1941_v33, %v4604_v57  ;;  %v3735_v19 = vand.u32 2147483647, %v6565_v43 }
 0x2d9   : > { %v1630_v55 = vpop.xlane.xlu0 %1629  ;;  %v3337_v41 = vperm.slane %v1940_v2, %v4601_v22  ;;  %v2565_v62 = vperm.slane %v1627_v34, %v4601_v22  ;;  %v3731_v26 = vmul.f32 0.6931472, %v4105_v45  ;;  %v3340_v11 = vperm.slane %v1942_v1, %v4601_v22 }
 0x2da   : > { %v1943_v35 = vsub.f32 0.0, %v1630_v55  ;;  %v2566_v24 = vperm.slane %v1630_v55, %v4604_v57  ;;  %v2721_v60 = vsel %vm2624_vm3, %v2558_v61, %v2720_v27  ;;  %v3489_v28 = vsel %vm2624_vm3, %v3333_v44, %v3488_v25 }
 0x2db   : > { %v1635_v50 = vpop.xlane.xlu2 %1634  ;;  %v1632_v37 = vpop.xlane.xlu1 %1631  ;;  %v2561_v52 = vsel %vm2239_vm1, %v2560_v31, %v2559_v23  ;;  %v3734_v32 = vmul.f32 %v6565_v43, %v3733_v7  ;;  %v3336_v21 = vsel %vm2239_vm1, %v3335_v47, %v3334_v10  ;;  %v2564_v46 = vsel %vm2239_vm1, %v2563_v12, %v2562_v8 }
 0x2dc   : > { %v3341_v15 = vperm.slane %v1943_v35, %v4604_v57  ;;  %v1945_v3 = vsub.f32 0.0, %v1635_v50  ;;  %v1944_v14 = vsub.f32 0.0, %v1632_v37  ;;  %v3339_v4 = vsel %vm2239_vm1, %v3338_v39, %v3337_v41 }
 0x2dd   : > { %vm6651_vm11 = vcmp.lt.f32.partialorder %v3735_v19, 0.0004427343  ;;  %v2567_v51 = vsel %vm2239_vm1, %v2566_v24, %v2565_v62  ;;  %v2569_v53 = vperm.slane %v1635_v50, %v4604_v57  ;;  %v2568_v58 = vperm.slane %v1632_v37, %v4601_v22 }
 0x2de   : > { %3807 = vadd.xlane.f32.xlu0 %v6578_v6  ;;  %v3553_v6 = vmin.f32 %v6490_v38, 0.0  ;;  %v3737_v43 = vsel %vm6651_vm11, %v3734_v32, %v3731_v26  ;;  %v3342_v0 = vsel %vm2239_vm1, %v3341_v15, %v3340_v11  ;;  %v3344_v34 = vperm.slane %v1945_v3, %v4604_v57 }
 0x2df   : > { %v3343_v13 = vperm.slane %v1944_v14, %v4601_v22  ;;  %v2722_v40 = vsel %vm2626_vm4, %v2561_v52, %v2721_v60  ;;  %v3490_v36 = vsel %vm2626_vm4, %v3336_v21, %v3489_v28  ;;  %v2570_v9 = vsel %vm2239_vm1, %v2569_v53, %v2568_v58 }
 0x2e0   : > { %3810 = vadd.xlane.f32.xlu1 %v6582_v59  ;;  %3813 = vadd.xlane.f32.xlu2 %v3812_v16  ;;  %v2723_v5 = vsel %vm2628_vm5, %v2564_v46, %v2722_v40  ;;  %v3491_v38 = vsel %vm2628_vm5, %v3339_v4, %v3490_v36  ;;  %v3777_v42 = vsub.f32 %v3553_v6, %v3737_v43  ;;  %v3815_v16 = vsel %vm3781_vm12, %v3776_v29, 0.0 }
 0x2e1   : > { %v1637_v20 = vpop.xlane.xlu0 %1636  ;;  %v2724_v30 = vsel %vm2630_vm6, %v2567_v51, %v2723_v5  ;;  %v3492_v48 = vsel %vm2630_vm6, %v3342_v0, %v3491_v38  ;;  %v3345_v56 = vsel %vm2239_vm1, %v3344_v34, %v3343_v13  ;;  %vm3899_vm0 = vcmask 720512  }
 0x2e2   : > { %v1946_v59 = vsub.f32 0.0, %v1637_v20  ;;  %v2571_v49 = vperm.slane %v1637_v20, %v4601_v22  ;;  %v3818_v2 = vsel %vm3781_vm12, %v3777_v42, 0.0  ;;  %v2725_v45 = vsel %vm2632_vm7, %v2570_v9, %v2724_v30 }
 0x2e3   : > { %v6669_v54 = vpop.xlane.xlu2 %1641  ;;  %v1640_v63 = vpop.xlane.xlu1 %1639  ;;  %v3493_v29 = vsel %vm2632_vm7, %v3345_v56, %v3492_v48  ;;  %vm3903_vm14 = vcmask 786112   ;;  %vm3907_vm15 = vcmask 851712   ;;  %vm3911_vm10 = vcmask 917312  }
 0x2e4   : > { %v1947_v18 = vsub.f32 0.0, %v1640_v63  ;;  %v2572_v33 = vperm.slane %v1640_v63, %v4604_v57  ;;  %v3346_v27 = vperm.slane %v1946_v59, %v4601_v22  ;;  %v1948_v58 = vsub.f32 0.0, %v6669_v54 }
 0x2e5   : > { %v2574_v63 = vperm.slane %v6669_v54, %v4601_v22  ;;  %vm3915_vm11 = vcmask 982912  }
 0x2e6   : > { %v3347_v25 = vperm.slane %v1947_v18, %v4604_v57  ;;  %3816 = vadd.xlane.f32.xlu0 %v3815_v16  ;;  %v2573_v61 = vsel %vm2239_vm1, %v2572_v33, %v2571_v49  ;;  %v3349_v42 = vperm.slane %v1948_v58, %v4601_v22 }
 0x2e7   : > { %v2726_v31 = vsel %vm2634_vm8, %v2573_v61, %v2725_v45 }
 0x2e8   : > { %v3348_v44 = vsel %vm2239_vm1, %v3347_v25, %v3346_v27  ;;  %3819 = vadd.xlane.f32.xlu1 %v3818_v2 }
 0x2e9   : > { %v1645_v23 = vpop.xlane.xlu0 %1644  ;;  %v3494_v1 = vsel %vm2634_vm8, %v3348_v44, %v3493_v29 }
 0x2ea   : > { %v3538_v55 = vsel %vm1723_vm9, %v2726_v31, %v3494_v1  ;;  %v1949_v13 = vsub.f32 0.0, %v1645_v23  ;;  %v2575_v30 = vperm.slane %v1645_v23, %v4604_v57 }
 0x2eb   : > { %v1650_v47 = vpop.xlane.xlu2 %1649  ;;  %v1647_v10 = vpop.xlane.xlu1 %1646  ;;  %v3570_v35 = vand.u32 2147483647, %v3538_v55  ;;  %v3554_v21 = vmin.f32 %v3538_v55, 0.0 }
 0x2ec   : > { %v1951_v43 = vsub.f32 0.0, %v1650_v47  ;;  %v1950_v0 = vsub.f32 0.0, %v1647_v10  ;;  %v2578_v36 = vperm.slane %v1650_v47, %v4604_v57  ;;  %v2577_v5 = vperm.slane %v1647_v10, %v4601_v22 }
 0x2ed   : > { %v3586_v7 = vsub.f32 0.0, %v3570_v35  ;;  %v3350_v48 = vperm.slane %v1949_v13, %v4604_v57  ;;  %v2576_v54 = vsel %vm2239_vm1, %v2575_v30, %v2574_v63 }
 0x2ee   : > { %v3353_v59 = vperm.slane %v1951_v43, %v4604_v57  ;;  %v3352_v38 = vperm.slane %v1950_v0, %v4601_v22  ;;  %v2579_v18 = vsel %vm2239_vm1, %v2578_v36, %v2577_v5 }
 0x2ef   : > { %v3615_v8 = vmul.f32 1.442695, %v3586_v7  ;;  %v3351_v25 = vsel %vm2239_vm1, %v3350_v48, %v3349_v42  ;;  %v2727_v44 = vsel %vm2622_vm2, %v2579_v18, %v2576_v54 }
 0x2f0   : > { %v3354_v16 = vsel %vm2239_vm1, %v3353_v59, %v3352_v38 }
 0x2f1   : > { %v6689_v12 = vpop.xlane.xlu0 %1651  ;;  %4106 = vpow2.f32 %v3615_v8  ;;  %v3495_v31 = vsel %vm2622_vm2, %v3354_v16, %v3351_v25 }
 0x2f2   : > { %v1952_v61 = vsub.f32 0.0, %v6689_v12  ;;  %v2580_v2 = vperm.slane %v6689_v12, %v4601_v22 }
 0x2f3   : > { %v6691_v39 = vpop.xlane.xlu2 %1681  ;;  %v1655_v50 = vpop.xlane.xlu1 %1654 }
 0x2f4   : > { %v1953_v9 = vsub.f32 0.0, %v1655_v50  ;;  %v2581_v56 = vperm.slane %v1655_v50, %v4604_v57  ;;  %v1964_v23 = vsub.f32 0.0, %v6691_v39  ;;  %v2598_v1 = vperm.slane %v6691_v39, %v4601_v22 }
 0x2f5   : > { %v3355_v39 = vperm.slane %v1952_v61, %v4601_v22 }
 0x2f6   : > { %v2582_v55 = vsel %vm2239_vm1, %v2581_v56, %v2580_v2  ;;  %v3356_v47 = vperm.slane %v1953_v9, %v4604_v57 }
 0x2f7   : > { %v4107_v37 = vpop.eup %4106 }
 0x2f8   : > { %v3738_v19 = vadd.f32 1.0, %v4107_v37  ;;  %v3741_v62 = vmul.f32 -0.5, %v4107_v37  ;;  %v3744_v15 = vand.u32 2147483647, %v4107_v37 }
 0x2f9   : > { %v6693_v41 = vpop.xlane.xlu0 %1684 }
 0x2fa   : > { %4108 = vlog2.f32 %v3738_v19  ;;  %v3742_v11 = vadd.f32 1.0, %v3741_v62  ;;  %vm3745_vm13 = vcmp.lt.f32.partialorder %v3744_v15, 0.0004427343  ;;  %v1965_v10 = vsub.f32 0.0, %v6693_v41 }
 0x2fb   : > { %v6695_v24 = vpop.xlane.xlu2 %1689  ;;  %v6697_v26 = vpop.xlane.xlu1 %1686  ;;  %v2599_v35 = vperm.slane %v6693_v41, %v4604_v57  ;;  %v3373_v41 = vperm.slane %v1964_v23, %v4601_v22 }
 0x2fc   : > { %v3743_v28 = vmul.f32 %v4107_v37, %v3742_v11  ;;  %v1967_v33 = vsub.f32 0.0, %v6695_v24  ;;  %v1966_v27 = vsub.f32 0.0, %v6697_v26  ;;  %v2602_v7 = vperm.slane %v6695_v24, %v4604_v57 }
 0x2fd   : > { %v2601_v12 = vperm.slane %v6697_v26, %v4601_v22  ;;  %v2728_v11 = vsel %vm2624_vm3, %v2582_v55, %v2727_v44  ;;  %v3357_v26 = vsel %vm2239_vm1, %v3356_v47, %v3355_v39 }
 0x2fe   : > { %v3377_v8 = vperm.slane %v1967_v33, %v4604_v57  ;;  %v3376_v50 = vperm.slane %v1966_v27, %v4601_v22  ;;  %v3496_v18 = vsel %vm2624_vm3, %v3357_v26, %v3495_v31 }
 0x300   : > { %v4109_v3 = vpop.eup %4108 }
 0x301   : > { %v6699_v14 = vpop.xlane.xlu0 %1656  ;;  %v3740_v60 = vmul.f32 0.6931472, %v4109_v3  ;;  %v2600_v3 = vsel %vm2239_vm1, %v2599_v35, %v2598_v1 }
 0x302   : > { %v2583_v42 = vperm.slane %v6699_v14, %v4601_v22 }
 0x303   : > { %v6701_v52 = vpop.xlane.xlu2 %1691  ;;  %v6703_v32 = vpop.xlane.xlu1 %1659  ;;  %v3746_v46 = vsel %vm3745_vm13, %v3743_v28, %v3740_v60  ;;  %v3374_v60 = vperm.slane %v1965_v10, %v4604_v57  ;;  %v1954_v28 = vsub.f32 0.0, %v6699_v14  ;;  %vm3919_vm13 = vcmask 1048512  }
 0x304   : > { %v3778_v4 = vsub.f32 %v3554_v21, %v3746_v46  ;;  %v1968_v37 = vsub.f32 0.0, %v6701_v52  ;;  %v1955_v19 = vsub.f32 0.0, %v6703_v32  ;;  %v2603_v46 = vsel %vm2239_vm1, %v2602_v7, %v2601_v12 }
 0x305   : > { %v2584_v43 = vperm.slane %v6703_v32, %v4604_v57  ;;  %v2734_v16 = vsel %vm2622_vm2, %v2603_v46, %v2600_v3 }
 0x306   : > { %v3821_v17 = vsel %vm3781_vm12, %v3778_v4, 0.0  ;;  %v3378_v4 = vsel %vm2239_vm1, %v3377_v8, %v3376_v50  ;;  %v3379_v0 = vperm.slane %v1968_v37, %v4601_v22  ;;  %v3359_v58 = vperm.slane %v1955_v19, %v4604_v57 }
 0x307   : > { %3822 = vadd.xlane.f32.xlu2 %v3821_v17  ;;  %v2604_v17 = vperm.slane %v6701_v52, %v4601_v22  ;;  %v2585_v56 = vsel %vm2239_vm1, %v2584_v43, %v2583_v42 }
 0x308   : > { %v2729_v55 = vsel %vm2626_vm4, %v2585_v56, %v2728_v11 }
 0x309   : > { %v6706_v51 = vpop.xlane.xlu0 %1694 }
 0x30a   : > { %v1969_v62 = vsub.f32 0.0, %v6706_v51  ;;  %v2605_v13 = vperm.slane %v6706_v51, %v4604_v57  ;;  %v3358_v51 = vperm.slane %v1954_v28, %v4601_v22 }
 0x30b   : > { %v6708_v53 = vpop.xlane.xlu2 %1664  ;;  %v6710_v6 = vpop.xlane.xlu1 %1661 }
 0x30c   : > { %v1957_v24 = vsub.f32 0.0, %v6708_v53  ;;  %v1956_v15 = vsub.f32 0.0, %v6710_v6  ;;  %v3380_v36 = vperm.slane %v1969_v62, %v4604_v57  ;;  %v2587_v38 = vperm.slane %v6708_v53, %v4604_v57 }
 0x30d   : > { %v2586_v32 = vperm.slane %v6710_v6, %v4601_v22  ;;  %v3375_v53 = vsel %vm2239_vm1, %v3374_v60, %v3373_v41  ;;  %v3360_v33 = vsel %vm2239_vm1, %v3359_v58, %v3358_v51  ;;  %v2606_v14 = vsel %vm2239_vm1, %v2605_v13, %v2604_v17 }
 0x30e   : > { %v3362_v52 = vperm.slane %v1957_v24, %v4604_v57  ;;  %v3361_v63 = vperm.slane %v1956_v15, %v4601_v22  ;;  %v3502_v6 = vsel %vm2622_vm2, %v3378_v4, %v3375_v53  ;;  %v3381_v27 = vsel %vm2239_vm1, %v3380_v36, %v3379_v0 }
 0x30f   : > { %v2588_v54 = vsel %vm2239_vm1, %v2587_v38, %v2586_v32  ;;  %v3497_v47 = vsel %vm2626_vm4, %v3360_v33, %v3496_v18  ;;  %v2735_v7 = vsel %vm2624_vm3, %v2606_v14, %v2734_v16 }
 0x310   : > { %v3363_v25 = vsel %vm2239_vm1, %v3362_v52, %v3361_v63  ;;  %v2730_v8 = vsel %vm2628_vm5, %v2588_v54, %v2729_v55 }
 0x311   : > { %v6712_v34 = vpop.xlane.xlu0 %1696 }
 0x312   : > { %v1970_v26 = vsub.f32 0.0, %v6712_v34  ;;  %v2607_v36 = vperm.slane %v6712_v34, %v4601_v22 }
 0x313   : > { %v6715_v20 = vpop.xlane.xlu2 %1666  ;;  %v6717_v40 = vpop.xlane.xlu1 %1699 }
 0x314   : > { %v1958_v30 = vsub.f32 0.0, %v6715_v20  ;;  %v2589_v2 = vperm.slane %v6715_v20, %v4601_v22  ;;  %v6820_v20 = vsel %vm2624_vm3, %v3381_v27, %v3502_v6  ;;  %v2608_v46 = vperm.slane %v6717_v40, %v4604_v57 }
 0x316   : > { %v3364_v44 = vperm.slane %v1958_v30, %v4601_v22  ;;  %v2609_v30 = vsel %vm2239_vm1, %v2608_v46, %v2607_v36 }
 0x319   : > { %v6731_v49 = vpop.xlane.xlu0 %1669 }
 0x31a   : > { %v1959_v48 = vsub.f32 0.0, %v6731_v49  ;;  %v2590_v31 = vperm.slane %v6731_v49, %v4604_v57  ;;  %v3498_v49 = vsel %vm2628_vm5, %v3363_v25, %v3497_v47  ;;  %v3382_v25 = vperm.slane %v1970_v26, %v4601_v22 }
 0x31b   : > { %v6740_v45 = vpop.xlane.xlu2 %1704  ;;  %v6742_v29 = vpop.xlane.xlu1 %1701 }
 0x31c   : > { %v3365_v23 = vperm.slane %v1959_v48, %v4604_v57  ;;  %v2591_v41 = vsel %vm2239_vm1, %v2590_v31, %v2589_v2  ;;  %v1973_v58 = vsub.f32 0.0, %v6740_v45  ;;  %v1972_v13 = vsub.f32 0.0, %v6742_v29 }
 0x31d   : > { %v2731_v43 = vsel %vm2630_vm6, %v2591_v41, %v2730_v8  ;;  %v2611_v34 = vperm.slane %v6740_v45, %v4604_v57 }
 0x31e   : > { %v3366_v11 = vsel %vm2239_vm1, %v3365_v23, %v3364_v44  ;;  %v3386_v16 = vperm.slane %v1973_v58, %v4604_v57  ;;  %v3385_v6 = vperm.slane %v1972_v13, %v4601_v22  ;;  %v2736_v44 = vsel %vm2626_vm4, %v2609_v30, %v2735_v7 }
 0x31f   : > { %v3499_v0 = vsel %vm2630_vm6, %v3366_v11, %v3498_v49 }
 0x320   : > { %v3387_v47 = vsel %vm2239_vm1, %v3386_v16, %v3385_v6 }
 0x321   : > { %v1672_v21 = vpop.xlane.xlu0 %1671 }
 0x322   : > { %v1960_v61 = vsub.f32 0.0, %v1672_v21  ;;  %v2592_v39 = vperm.slane %v1672_v21, %v4601_v22  ;;  %v1971_v21 = vsub.f32 0.0, %v6717_v40 }
 0x323   : > { %v6783_v59 = vpop.xlane.xlu2 %1706  ;;  %v1675_v5 = vpop.xlane.xlu1 %1674 }
 0x324   : > { %v1961_v9 = vsub.f32 0.0, %v1675_v5  ;;  %v2593_v10 = vperm.slane %v1675_v5, %v4604_v57  ;;  %v3367_v37 = vperm.slane %v1960_v61, %v4601_v22  ;;  %v1974_v32 = vsub.f32 0.0, %v6783_v59 }
 0x325   : > { %v3383_v48 = vperm.slane %v1971_v21, %v4604_v57  ;;  %v2613_v33 = vperm.slane %v6783_v59, %v4601_v22 }
 0x326   : > { %v3368_v35 = vperm.slane %v1961_v9, %v4604_v57  ;;  %v2594_v3 = vsel %vm2239_vm1, %v2593_v10, %v2592_v39  ;;  %v2610_v9 = vperm.slane %v6742_v29, %v4601_v22  ;;  %v3388_v61 = vperm.slane %v1974_v32, %v4601_v22 }
 0x327   : > { %v2732_v5 = vsel %vm2632_vm7, %v2594_v3, %v2731_v43 }
 0x328   : > { %v3369_v60 = vsel %vm2239_vm1, %v3368_v35, %v3367_v37  ;;  %v2612_v55 = vsel %vm2239_vm1, %v2611_v34, %v2610_v9 }
 0x329   : > { %v6812_v1 = vpop.xlane.xlu0 %1709  ;;  %v3500_v38 = vsel %vm2632_vm7, %v3369_v60, %v3499_v0 }
 0x32a   : > { %v1975_v63 = vsub.f32 0.0, %v6812_v1  ;;  %v2614_v14 = vperm.slane %v6812_v1, %v4604_v57  ;;  %v3384_v1 = vsel %vm2239_vm1, %v3383_v48, %v3382_v25 }
 0x32b   : > { %v1680_v12 = vpop.xlane.xlu2 %1679  ;;  %v1677_v50 = vpop.xlane.xlu1 %1676 }
 0x32c   : > { %v1963_v19 = vsub.f32 0.0, %v1680_v12  ;;  %v2596_v62 = vperm.slane %v1680_v12, %v4604_v57  ;;  %v1962_v24 = vsub.f32 0.0, %v1677_v50  ;;  %v2595_v15 = vperm.slane %v1677_v50, %v4601_v22 }
 0x32d   : > { %v3389_v2 = vperm.slane %v1975_v63, %v4604_v57  ;;  %v2615_v35 = vsel %vm2239_vm1, %v2614_v14, %v2613_v33 }
 0x32e   : > { %v3371_v28 = vperm.slane %v1963_v19, %v4604_v57  ;;  %v2597_v4 = vsel %vm2239_vm1, %v2596_v62, %v2595_v15  ;;  %v3370_v17 = vperm.slane %v1962_v24, %v4601_v22  ;;  %v3504_v62 = vsel %vm2626_vm4, %v3384_v1, %v6820_v20 }
 0x32f   : > { %v2733_v42 = vsel %vm2634_vm8, %v2597_v4, %v2732_v5  ;;  %v3390_v50 = vsel %vm2239_vm1, %v3389_v2, %v3388_v61  ;;  %v2737_v24 = vsel %vm2628_vm5, %v2612_v55, %v2736_v44  ;;  %v3505_v15 = vsel %vm2628_vm5, %v3387_v47, %v3504_v62 }
 0x330   : > { %v3372_v40 = vsel %vm2239_vm1, %v3371_v28, %v3370_v17  ;;  %v2738_v60 = vsel %vm2630_vm6, %v2615_v35, %v2737_v24  ;;  %v3506_v28 = vsel %vm2630_vm6, %v3390_v50, %v3505_v15  ;;  %v3865_v55 = vadd.s32 4294967280, %v4601_v22 }
 0x331   : > { %v1712_v52 = vpop.xlane.xlu0 %1711  ;;  %v3501_v51 = vsel %vm2634_vm8, %v3372_v40, %v3500_v38  ;;  %vm3867_vm4 = vcmask 195712   ;;  %vm3871_vm5 = vcmask 261312   ;;  %vm3875_vm6 = vcmask 326912  }
 0x332   : > { %v6858_v53 = vsel %vm1723_vm9, %v2733_v42, %v3501_v51  ;;  %v1976_v45 = vsub.f32 0.0, %v1712_v52  ;;  %v2616_v8 = vperm.slane %v1712_v52, %v4601_v22 }
 0x333   : > { %v1715_v18 = vpop.xlane.xlu1 %1714  ;;  %v1717_v27 = vpop.xlane.xlu2 %1716  ;;  %v3571_v54 = vand.u32 2147483647, %v6858_v53  ;;  %v3555_v51 = vmin.f32 %v6858_v53, 0.0 }
 0x334   : > { %v1977_v56 = vsub.f32 0.0, %v1715_v18  ;;  %v1978_v29 = vsub.f32 0.0, %v1717_v27  ;;  %v2617_v31 = vperm.slane %v1715_v18, %v4604_v57  ;;  %v2619_v10 = vperm.slane %v1717_v27, %v4601_v22 }
 0x335   : > { %v3587_v23 = vsub.f32 0.0, %v3571_v54  ;;  %v3391_v49 = vperm.slane %v1976_v45, %v4601_v22 }
 0x336   : > { %v3392_v59 = vperm.slane %v1977_v56, %v4604_v57  ;;  %v3394_v39 = vperm.slane %v1978_v29, %v4601_v22  ;;  %v2618_v41 = vsel %vm2239_vm1, %v2617_v31, %v2616_v8 }
 0x337   : > { %v3617_v12 = vmul.f32 1.442695, %v3587_v23  ;;  %v2739_v21 = vsel %vm2632_vm7, %v2618_v41, %v2738_v60 }
 0x338   : > { %v3393_v11 = vsel %vm2239_vm1, %v3392_v59, %v3391_v49  ;;  %v3869_v49 = vadd.s32 4294967272, %v4601_v22 }
 0x339   : > { %v1720_v7 = vpop.xlane.xlu0 %1719  ;;  %4110 = vpow2.f32 %v3617_v12  ;;  %v3507_v20 = vsel %vm2632_vm7, %v3393_v11, %v3506_v28  ;;  %v3877_v11 = vadd.s32 4294967256, %v4601_v22  ;;  %vm3879_vm7 = vcmask 392512  }
 0x33a   : > { %v1979_v37 = vsub.f32 0.0, %v1720_v7  ;;  %v2620_v19 = vperm.slane %v1720_v7, %v4604_v57 }
 0x33b   : > { %v3784_v61 = vpop.xlane.xlu1 %3783  ;;  %v3787_v2 = vpop.xlane.xlu2 %3786 }
 0x33c   : > { %v2621_v26 = vsel %vm2239_vm1, %v2620_v19, %v2619_v10  ;;  %v3395_v3 = vperm.slane %v1979_v37, %v4604_v57  ;;  %v3831_v23 = vsub.f32 0.0, %v3787_v2  ;;  %v3830_v1 = vsub.f32 0.0, %v3784_v61 }
 0x33d   : > { %v2740_v4 = vsel %vm2634_vm8, %v2621_v26, %v2739_v21  ;;  %v3873_v37 = vadd.s32 4294967264, %v4601_v22  ;;  %v3881_v26 = vadd.s32 4294967248, %v4601_v22 }
 0x33e   : > { %v3396_v46 = vsel %vm2239_vm1, %v3395_v3, %v3394_v39  ;;  %v3863_v35 = vperm.slane %v3831_v23, %v4604_v57  ;;  %v3862_v8 = vperm.slane %v3830_v1, %v4601_v22 }
 0x33f   : > { %v3508_v17 = vsel %vm2634_vm8, %v3396_v46, %v3507_v20  ;;  %v4111_v0 = vpop.eup %4110  ;;  %v3885_v20 = vadd.s32 4294967240, %v4601_v22  ;;  %vm3887_vm8 = vcmask 523712  }
 0x340   : > { %v3540_v43 = vsel %vm1723_vm9, %v2740_v4, %v3508_v17  ;;  %v3747_v13 = vadd.f32 1.0, %v4111_v0  ;;  %v3750_v36 = vmul.f32 -0.5, %v4111_v0  ;;  %v3753_v52 = vand.u32 2147483647, %v4111_v0 }
 0x341   : > { %v3572_v58 = vand.u32 2147483647, %v3540_v43  ;;  %v3556_v27 = vmin.f32 %v3540_v43, 0.0  ;;  %v3790_v29 = vpop.xlane.xlu0 %3789  ;;  %v3864_v62 = vsel %vm2239_vm1, %v3863_v35, %v3862_v8  ;;  %v3889_v43 = vadd.s32 4294967232, %v4601_v22 }
 0x342   : > { %4112 = vlog2.f32 %v3747_v13  ;;  %v3751_v40 = vadd.f32 1.0, %v3750_v36  ;;  %vm3754_vm2 = vcmp.lt.f32.partialorder %v3753_v52, 0.0004427343  ;;  %v3832_v47 = vsub.f32 0.0, %v3790_v29 }
 0x343   : > { %v3588_v5 = vsub.f32 0.0, %v3572_v58  ;;  %v3793_v44 = vpop.xlane.xlu1 %3792  ;;  %v3796_v31 = vpop.xlane.xlu2 %3795  ;;  %vm3883_vm1 = vcmask 458112   ;;  %vm3891_vm9 = vcmask 589312  }
 0x344   : > { %v3752_v42 = vmul.f32 %v4111_v0, %v3751_v40  ;;  %v3833_v7 = vsub.f32 0.0, %v3793_v44  ;;  %v3866_v12 = vperm.slane %v3832_v47, %v3865_v55  ;;  %v3834_v19 = vsub.f32 0.0, %v3796_v31 }
 0x345   : > { %v3619_v38 = vmul.f32 1.442695, %v3588_v5 }
 0x346   : > { %v3870_v41 = vperm.slane %v3833_v7, %v3869_v49  ;;  %v3868_v15 = vsel %vm3867_vm4, %v3866_v12, %v3864_v62  ;;  %v3874_v57 = vperm.slane %v3834_v19, %v3873_v37 }
 0x347   : > { %4114 = vpow2.f32 %v3619_v38  ;;  %v3893_v38 = vadd.s32 4294967224, %v4601_v22 }
 0x348   : > { %v4113_v32 = vpop.eup %4112  ;;  %v3872_v60 = vsel %vm3871_vm5, %v3870_v41, %v3868_v15 }
 0x349   : > { %v3749_v63 = vmul.f32 0.6931472, %v4113_v32  ;;  %v3799_v59 = vpop.xlane.xlu0 %3798  ;;  %v3876_v4 = vsel %vm3875_vm6, %v3874_v57, %v3872_v60 }
 0x34a   : > { %v3835_v24 = vsub.f32 0.0, %v3799_v59  ;;  %v3917_v59 = vadd.s32 4294967176, %v4601_v22 }
 0x34b   : > { %v3755_v48 = vsel %vm3754_vm2, %v3752_v42, %v3749_v63  ;;  %v3802_v10 = vpop.xlane.xlu1 %3801  ;;  %v3805_v50 = vpop.xlane.xlu2 %3804  ;;  %v3897_v63 = vadd.s32 4294967216, %v4601_v22 }
 0x34c   : > { %v3779_v34 = vsub.f32 %v3555_v51, %v3755_v48  ;;  %v3836_v3 = vsub.f32 0.0, %v3802_v10  ;;  %v3878_v28 = vperm.slane %v3835_v24, %v3877_v11  ;;  %v3837_v46 = vsub.f32 0.0, %v3805_v50 }
 0x34d   : > { %v4115_v30 = vpop.eup %4114  ;;  %v3901_v48 = vadd.s32 4294967208, %v4601_v22 }
 0x34e   : > { %v3756_v18 = vadd.f32 1.0, %v4115_v30  ;;  %v3824_v16 = vsel %vm3781_vm12, %v3779_v34, 0.0  ;;  %v3759_v9 = vmul.f32 -0.5, %v4115_v30  ;;  %v3762_v56 = vand.u32 2147483647, %v4115_v30 }
 0x34f   : > { %3825 = vadd.xlane.f32.xlu0 %v3824_v16  ;;  %v3882_v17 = vperm.slane %v3836_v3, %v3881_v26  ;;  %v3880_v13 = vsel %vm3879_vm7, %v3878_v28, %v3876_v4  ;;  %v3886_v5 = vperm.slane %v3837_v46, %v3885_v20 }
 0x350   : > { %4116 = vlog2.f32 %v3756_v18  ;;  %v3760_v6 = vadd.f32 1.0, %v3759_v9  ;;  %vm3763_vm3 = vcmp.lt.f32.partialorder %v3762_v56, 0.0004427343 }
 0x351   : > { %v3808_v39 = vpop.xlane.xlu0 %3807  ;;  %v3884_v52 = vsel %vm3883_vm1, %v3882_v17, %v3880_v13 }
 0x352   : > { %v3761_v45 = vmul.f32 %v4115_v30, %v3760_v6  ;;  %v3838_v0 = vsub.f32 0.0, %v3808_v39  ;;  %v3888_v51 = vsel %vm3887_vm8, %v3886_v5, %v3884_v52 }
 0x353   : > { %v3811_v21 = vpop.xlane.xlu1 %3810  ;;  %v3814_v58 = vpop.xlane.xlu2 %3813 }
 0x354   : > { %v3839_v40 = vsub.f32 0.0, %v3811_v21  ;;  %v3890_v32 = vperm.slane %v3838_v0, %v3889_v43  ;;  %v3840_v42 = vsub.f32 0.0, %v3814_v58 }
 0x356   : > { %v4117_v33 = vpop.eup %4116  ;;  %v3894_v30 = vperm.slane %v3839_v40, %v3893_v38  ;;  %v3892_v16 = vsel %vm3891_vm9, %v3890_v32, %v3888_v51  ;;  %v3898_v56 = vperm.slane %v3840_v42, %v3897_v63 }
 0x357   : > { %v3758_v14 = vmul.f32 0.6931472, %v4117_v33  ;;  %v3905_v33 = vadd.s32 4294967200, %v4601_v22 }
 0x359   : > { %v3764_v54 = vsel %vm3763_vm3, %v3761_v45, %v3758_v14  ;;  %v3817_v36 = vpop.xlane.xlu0 %3816 }
 0x35a   : > { %v3780_v25 = vsub.f32 %v3556_v27, %v3764_v54  ;;  %v3841_v34 = vsub.f32 0.0, %v3817_v36  ;;  %v3909_v54 = vadd.s32 4294967192, %v4601_v22 }
 0x35b   : > { %v3820_v18 = vpop.xlane.xlu1 %3819 }
 0x35c   : > { %v3827_v53 = vsel %vm3781_vm12, %v3780_v25, 0.0  ;;  %vm3895_vm12 = vcmask 654912   ;;  %v3842_v14 = vsub.f32 0.0, %v3820_v18  ;;  %v3902_v27 = vperm.slane %v3841_v34, %v3901_v48 }
 0x35d   : > { %3828 = vadd.xlane.f32.xlu1 %v3827_v53  ;;  %v3896_v45 = vsel %vm3895_vm12, %v3894_v30, %v3892_v16  ;;  %v3913_v53 = vadd.s32 4294967184, %v4601_v22 }
 0x35e   : > { %v3900_v2 = vsel %vm3899_vm0, %v3898_v56, %v3896_v45  ;;  %v3906_v29 = vperm.slane %v3842_v14, %v3905_v33 }
 0x35f   : > { %v3904_v44 = vsel %vm3903_vm14, %v3902_v27, %v3900_v2 }
 0x360   : > { %v3908_v47 = vsel %vm3907_vm15, %v3906_v29, %v3904_v44 }
 0x37a   : > { %v3823_v9 = vpop.xlane.xlu2 %3822 }
 0x37b   : > { %v3843_v25 = vsub.f32 0.0, %v3823_v9 }
 0x37d   : > { %v3910_v31 = vperm.slane %v3843_v25, %v3909_v54 }
 0x37f   : > { %v3912_v10 = vsel %vm3911_vm10, %v3910_v31, %v3908_v47 }
 0x3c2   : > { %v3826_v6 = vpop.xlane.xlu0 %3825 }
 0x3c3   : > { %v3844_v61 = vsub.f32 0.0, %v3826_v6 }
 0x3c5   : > { %v3914_v23 = vperm.slane %v3844_v61, %v3913_v53 }
 0x3c7   : > { %v3916_v8 = vsel %vm3915_vm11, %v3914_v23, %v3912_v10 }
 0x3d0   : > { %v3829_v1 = vpop.xlane.xlu1 %3828 }
 0x3d1   : > { %v3845_v55 = vsub.f32 0.0, %v3829_v1 }
 0x3d3   : > { %v3918_v35 = vperm.slane %v3845_v55, %v3917_v59 }
 0x3d5   : > { %v3920_v49 = vsel %vm3919_vm13, %v3918_v35, %v3916_v8 }
 0x3d6   : > { %3922 = vst [vmem:[%s154_s7] sm:$0x1] %v3920_v49 }
 0x3d7   : > { %4145 = shalt.err (!%p4142_p4)
}
 0x3d8   : > { %4015 = dma.vmem_to_hbm [thread:$0]  (%p4235_p5), %s3935_s8, 16, %s3937_s14, %s3924_s13  }
 0x3d9 PF: > { %p4021_p7 = scmp.ge.s32.totalorder %s4180_s12, 2  ;;  %s3948_s26 = sand.u32 1, %s4168_s9  }
 0x3da   : > { %s3949_s27 = scalar_lea.sflag [#allocation3], %s3948_s26 }
 0x3db   : > { %p4018_p8 = pnand %p4021_p7, %p4239_p6 }
 0x3dd   : > { %p4019_p9 = pneg %p4018_p8 }
 0x3df   : > { %4163 = dma.done.wait (%p4019_p9), %s3949_s27, 16  }
 0x3e0   : > { %4165 = vsyncadd (%p4019_p9), %s3949_s27, 4294967280  ;;  %p12_p10 = scmp.ge.s32.totalorder %s4222_s15, 4   ;;  %s7129_s9 = smov %s4172_s10 }
 0x3e1   : > { %s7130_s10 = smov %s4176_s11  ;;  %s7131_s11 = smov %s4233_s18 }
 0x3e2   : > { %s7132_s12 = smov %s4222_s15  ;;  %14 = sbr.rel (!%p12_p10) target bundleno = 3 (0x3), region = 66 }
 0x3e7   :  { %3954 = vsyncpa [#allocation3], 1 }
 0x3e8   :  { %3956 = vsyncpa [#allocation3 + $0x1], 1 }

</bundles_post_ra>
